<compile_context>
chip_gen: v7x
topology: tpu7x:2x2x1
jax: 0.10.0
libtpu: 0.0.40
codegen_flags: <defaults>
</compile_context>

<pallas_src>
import functools

import jax
import jax.numpy as jnp
from jax import lax
from jax.experimental import pallas as pl
from jax.experimental.pallas import tpu as pltpu

NEG_SLOPE = 0.2        # negative_slope default of GACEConv
MASK_NEG = -1e30       # additive mask value for non-edges (f32 softmax math only)


def _leaky_relu(x, slope=NEG_SLOPE):
    return jnp.where(x > 0, x, slope * x)


def _elu(x):
    # elu with alpha=1; exp only on the non-positive branch
    return jnp.where(x > 0, x, jnp.exp(jnp.minimum(x, 0.0)) - 1.0)


# ---------------------------------------------------------------------------
# Fused kernel: encoder (GAT0 -> elu -> GAT1) + decoder (GAT2 -> elu -> GAT3(tied) -> elu)
# ---------------------------------------------------------------------------
def gace_fused_kernel(x_ref, adj_ref,
                      w0_ref, as0_ref, ad0_ref, b0_ref,
                      w1_ref, as1_ref, ad1_ref, b1_ref,
                      w2_ref, as2_ref, ad2_ref, b2_ref,
                      w3_ref, b3_ref,
                      h_out_ref, xrec_out_ref):
    # additive edge mask: 0 where edge, -1e30 where no edge; computed ONCE, reused 3x
    neg_mask = jnp.where(adj_ref[...] > 0, jnp.float32(0.0), jnp.float32(MASK_NEG))

    def gat(x_in, w_ref, att_s_ref, att_d_ref, b_ref):
        # projection h = X @ W                                  (N, F_out)   MXU
        h = jnp.dot(x_in, w_ref[...], preferred_element_type=jnp.float32)
        # destination scores d_i = h_i . att_d                  (N, 1)       MXU
        d = jnp.dot(h, att_d_ref[...], preferred_element_type=jnp.float32)
        # source scores as a lane-major row s_j = h_j . att_s   (1, N)       MXU
        # (q.kT-style contraction; avoids an (N,1)->(1,N) XLU transpose)
        s_row = lax.dot_general(att_s_ref[...], h,
                                (((1,), (1,)), ((), ())),
                                preferred_element_type=jnp.float32)
        # e[i, j] = leaky_relu(d_i + s_j), masked softmax over j (row-wise)
        logits = _leaky_relu(d + s_row) + neg_mask
        m = jnp.max(logits, axis=-1, keepdims=True)
        p = jnp.exp(logits - m)                     # masked entries underflow to exactly 0
        denom = jnp.maximum(jnp.sum(p, axis=-1, keepdims=True), jnp.float32(1e-20))
        alpha = p * pl.reciprocal(denom, approx=True)
        # aggregation out_i = sum_j alpha[i, j] h_j + bias  (bf16 operands, f32 accumulate)
        agg = jnp.dot(alpha.astype(jnp.bfloat16), h.astype(jnp.bfloat16),
                      preferred_element_type=jnp.float32)
        return agg + b_ref[...], alpha

    x = x_ref[...]

    # ---- encoder ----
    h0, alpha0 = gat(x, w0_ref, as0_ref, ad0_ref, b0_ref)
    h0 = _elu(h0)                                   # hidden_act after encoder layer 0
    latent, _ = gat(h0, w1_ref, as1_ref, ad1_ref, b1_ref)   # no act on last encoder layer
    h_out_ref[...] = latent

    # ---- decoder ----
    d2, _ = gat(latent, w2_ref, as2_ref, ad2_ref, b2_ref)   # tied_attr[1]=False -> own attention
    d2 = _elu(d2)
    # decoder layer 3 reuses encoder layer 0's attention coefficients (tied_attr[0]=True)
    h3 = jnp.dot(d2, w3_ref[...], preferred_element_type=jnp.float32)
    x_rec = jnp.dot(alpha0.astype(jnp.bfloat16), h3.astype(jnp.bfloat16),
                    preferred_element_type=jnp.float32) + b3_ref[...]
    xrec_out_ref[...] = _elu(x_rec)


# ---------------------------------------------------------------------------
# Wrapper: single pallas_call, whole graph resident in VMEM (single block, no grid)
# ---------------------------------------------------------------------------
@jax.jit
def gace_forward(x, adj, params):
    n, f_in = x.shape
    f_lat = params['W1'].shape[1]
    args = (x, adj,
            params['W0'], params['as0'], params['ad0'], params['b0'],
            params['W1'], params['as1'], params['ad1'], params['b1'],
            params['W2'], params['as2'], params['ad2'], params['b2'],
            params['W3'], params['b3'])
    H, x_rec = pl.pallas_call(
        gace_fused_kernel,
        out_shape=(jax.ShapeDtypeStruct((n, f_lat), jnp.float32),
                   jax.ShapeDtypeStruct((n, f_in), jnp.float32)),
        in_specs=[pl.BlockSpec(memory_space=pltpu.MemorySpace.VMEM) for _ in args],
        out_specs=(pl.BlockSpec(memory_space=pltpu.MemorySpace.VMEM),
                   pl.BlockSpec(memory_space=pltpu.MemorySpace.VMEM)),
        compiler_params=pltpu.CompilerParams(vmem_limit_bytes=32 * 1024 * 1024),
    )(*args)
    return H, x_rec


def init_params(key, hidden_dims):
    """Deterministic glorot-ish init for all 4 GAT layers of the auto-encoder.

    att_s is stored as a (1, F_out) row and att_d as an (F_out, 1) column so the kernel
    can produce lane-major source scores without a transpose.
    """
    f_in, f_hid, f_lat = hidden_dims
    layer_dims = [(f_in, f_hid), (f_hid, f_lat),   # encoder
                  (f_lat, f_hid), (f_hid, f_in)]   # decoder (untied weights)
    params = {}
    keys = jax.random.split(key, 4 * 4)
    for li, (fi, fo) in enumerate(layer_dims):
        k_w, k_as, k_ad, k_b = keys[4 * li: 4 * li + 4]
        scale = jnp.sqrt(2.0 / (fi + fo))
        params[f'W{li}'] = (scale * jax.random.normal(k_w, (fi, fo))).astype(jnp.float32)
        params[f'as{li}'] = (0.1 * jax.random.normal(k_as, (1, fo))).astype(jnp.float32)
        params[f'ad{li}'] = (0.1 * jax.random.normal(k_ad, (fo, 1))).astype(jnp.float32)
        params[f'b{li}'] = (0.01 * jax.random.normal(k_b, (1, fo))).astype(jnp.float32)
    return params


if __name__ == "__main__":
    key = jax.random.PRNGKey(0)
    k_x, k_p = jax.random.split(key)

    N = 128                       # number of graph nodes
    hidden_dims = [32, 16, 8]     # F_in -> F_hid -> F_lat   (n_layer = 2)

    # node features
    x = jax.random.normal(k_x, (N, hidden_dims[0]), dtype=jnp.float32)

    # deterministic ring graph (edge_index equivalent) + self-loops, as dense mask
    eye = jnp.eye(N, dtype=jnp.float32)
    adj = jnp.clip(eye + jnp.roll(eye, 1, axis=1) + jnp.roll(eye, -1, axis=1), 0.0, 1.0)

    params = init_params(k_p, hidden_dims)

    H, X_rec = gace_forward(x, adj, params)
    jax.block_until_ready((H, X_rec))

    assert H.shape == (N, hidden_dims[-1]) and H.dtype == jnp.float32
    assert X_rec.shape == (N, hidden_dims[0]) and X_rec.dtype == jnp.float32
    assert bool(jnp.all(jnp.isfinite(H))) and bool(jnp.all(jnp.isfinite(X_rec)))
    print("KERNEL_OK")
</pallas_src>

<mosaic_0001>
module attributes {stable_mosaic.version = 11 : i64} {
  func.func @gace_fused_kernel(%arg0: memref<128x32xf32, #tpu.memory_space<vmem>>, %arg1: memref<128x128xf32, #tpu.memory_space<vmem>>, %arg2: memref<32x16xf32, #tpu.memory_space<vmem>>, %arg3: memref<1x16xf32, #tpu.memory_space<vmem>>, %arg4: memref<16x1xf32, #tpu.memory_space<vmem>>, %arg5: memref<1x16xf32, #tpu.memory_space<vmem>>, %arg6: memref<16x8xf32, #tpu.memory_space<vmem>>, %arg7: memref<1x8xf32, #tpu.memory_space<vmem>>, %arg8: memref<8x1xf32, #tpu.memory_space<vmem>>, %arg9: memref<1x8xf32, #tpu.memory_space<vmem>>, %arg10: memref<8x16xf32, #tpu.memory_space<vmem>>, %arg11: memref<1x16xf32, #tpu.memory_space<vmem>>, %arg12: memref<16x1xf32, #tpu.memory_space<vmem>>, %arg13: memref<1x16xf32, #tpu.memory_space<vmem>>, %arg14: memref<16x32xf32, #tpu.memory_space<vmem>>, %arg15: memref<1x32xf32, #tpu.memory_space<vmem>>, %arg16: memref<128x8xf32, #tpu.memory_space<vmem>>, %arg17: memref<128x32xf32, #tpu.memory_space<vmem>>) attributes {dimension_semantics = [], scalar_prefetch = 0 : i64, scratch_operands = 0 : i64, tpu.core_type = #tpu.core_type<tc>} {
    %c0 = arith.constant 0 : index
    %c0_0 = arith.constant 0 : index
    %0 = vector.load %arg1[%c0, %c0_0] : memref<128x128xf32, #tpu.memory_space<vmem>>, vector<128x128xf32>
    %cst = arith.constant 0.000000e+00 : f32
    %1 = vector.broadcast %cst : f32 to vector<128x128xf32>
    %2 = arith.cmpf ogt, %0, %1 : vector<128x128xf32>
    %cst_1 = arith.constant 0.000000e+00 : f32
    %cst_2 = arith.constant -1.000000e+30 : f32
    %3 = vector.broadcast %cst_1 : f32 to vector<128x128xf32>
    %4 = vector.broadcast %cst_2 : f32 to vector<128x128xf32>
    %5 = arith.select %2, %3, %4 : vector<128x128xi1>, vector<128x128xf32>
    %c0_3 = arith.constant 0 : index
    %c0_4 = arith.constant 0 : index
    %6 = vector.load %arg0[%c0_3, %c0_4] : memref<128x32xf32, #tpu.memory_space<vmem>>, vector<128x32xf32>
    %c0_5 = arith.constant 0 : index
    %c0_6 = arith.constant 0 : index
    %7 = vector.load %arg2[%c0_5, %c0_6] : memref<32x16xf32, #tpu.memory_space<vmem>>, vector<32x16xf32>
    %cst_7 = arith.constant dense<0.000000e+00> : vector<128x16xf32>
    %8 = tpu.matmul %6, %7, %cst_7 {dimension_numbers = #tpu.dot_dimension_numbers<[1], [0], [0], [1], [0, 0, 1, 1], [], []>} : vector<128x32xf32>, vector<32x16xf32>, vector<128x16xf32> -> vector<128x16xf32>
    %c0_8 = arith.constant 0 : index
    %c0_9 = arith.constant 0 : index
    %9 = vector.load %arg4[%c0_8, %c0_9] : memref<16x1xf32, #tpu.memory_space<vmem>>, vector<16x1xf32>
    %cst_10 = arith.constant dense<0.000000e+00> : vector<128x1xf32>
    %10 = tpu.matmul %8, %9, %cst_10 {dimension_numbers = #tpu.dot_dimension_numbers<[1], [0], [0], [1], [0, 0, 1, 1], [], []>} : vector<128x16xf32>, vector<16x1xf32>, vector<128x1xf32> -> vector<128x1xf32>
    %c0_11 = arith.constant 0 : index
    %c0_12 = arith.constant 0 : index
    %11 = vector.load %arg3[%c0_11, %c0_12] : memref<1x16xf32, #tpu.memory_space<vmem>>, vector<1x16xf32>
    %cst_13 = arith.constant dense<0.000000e+00> : vector<1x128xf32>
    %12 = tpu.matmul %11, %8, %cst_13 {dimension_numbers = #tpu.dot_dimension_numbers<[1], [1], [0], [0], [0, 0, 1, 0], [], []>} : vector<1x16xf32>, vector<128x16xf32>, vector<1x128xf32> -> vector<1x128xf32>
    %13 = vector.broadcast %10 : vector<128x1xf32> to vector<128x128xf32>
    %14 = vector.broadcast %12 : vector<1x128xf32> to vector<128x128xf32>
    %15 = arith.addf %13, %14 : vector<128x128xf32>
    %cst_14 = arith.constant 0.000000e+00 : f32
    %16 = vector.broadcast %cst_14 : f32 to vector<128x128xf32>
    %17 = arith.cmpf ogt, %15, %16 : vector<128x128xf32>
    %cst_15 = arith.constant 2.000000e-01 : f32
    %18 = vector.broadcast %cst_15 : f32 to vector<128x128xf32>
    %19 = arith.mulf %18, %15 : vector<128x128xf32>
    %20 = arith.select %17, %15, %19 : vector<128x128xi1>, vector<128x128xf32>
    %21 = arith.addf %20, %5 : vector<128x128xf32>
    %cst_16 = arith.constant dense<0xFF800000> : vector<128xf32>
    %22 = vector.multi_reduction <maximumf>, %21, %cst_16 [1] : vector<128x128xf32> to vector<128xf32>
    %23 = vector.shape_cast %22 : vector<128xf32> to vector<128x1xf32>
    %24 = vector.broadcast %23 : vector<128x1xf32> to vector<128x128xf32>
    %25 = arith.subf %21, %24 : vector<128x128xf32>
    %26 = math.exp %25 : vector<128x128xf32>
    %cst_17 = arith.constant dense<0.000000e+00> : vector<128xf32>
    %27 = vector.multi_reduction <add>, %26, %cst_17 [1] : vector<128x128xf32> to vector<128xf32>
    %28 = vector.shape_cast %27 : vector<128xf32> to vector<128x1xf32>
    %cst_18 = arith.constant 9.99999968E-21 : f32
    %29 = vector.broadcast %cst_18 : f32 to vector<128x1xf32>
    %30 = arith.maximumf %28, %29 : vector<128x1xf32>
    %31 = tpu.reciprocal %30 {approx = true} : vector<128x1xf32> -> vector<128x1xf32>
    %32 = vector.broadcast %31 : vector<128x1xf32> to vector<128x128xf32>
    %33 = arith.mulf %26, %32 : vector<128x128xf32>
    %34 = arith.truncf %33 : vector<128x128xf32> to vector<128x128xbf16>
    %35 = arith.truncf %8 : vector<128x16xf32> to vector<128x16xbf16>
    %cst_19 = arith.constant dense<0.000000e+00> : vector<128x16xf32>
    %36 = tpu.matmul %34, %35, %cst_19 {dimension_numbers = #tpu.dot_dimension_numbers<[1], [0], [0], [1], [0, 0, 1, 1], [], []>} : vector<128x128xbf16>, vector<128x16xbf16>, vector<128x16xf32> -> vector<128x16xf32>
    %c0_20 = arith.constant 0 : index
    %c0_21 = arith.constant 0 : index
    %37 = vector.load %arg5[%c0_20, %c0_21] : memref<1x16xf32, #tpu.memory_space<vmem>>, vector<1x16xf32>
    %38 = vector.broadcast %37 : vector<1x16xf32> to vector<128x16xf32>
    %39 = arith.addf %36, %38 : vector<128x16xf32>
    %cst_22 = arith.constant 0.000000e+00 : f32
    %40 = vector.broadcast %cst_22 : f32 to vector<128x16xf32>
    %41 = arith.cmpf ogt, %39, %40 : vector<128x16xf32>
    %cst_23 = arith.constant 0.000000e+00 : f32
    %42 = vector.broadcast %cst_23 : f32 to vector<128x16xf32>
    %43 = arith.minimumf %39, %42 : vector<128x16xf32>
    %44 = math.exp %43 : vector<128x16xf32>
    %cst_24 = arith.constant 1.000000e+00 : f32
    %45 = vector.broadcast %cst_24 : f32 to vector<128x16xf32>
    %46 = arith.subf %44, %45 : vector<128x16xf32>
    %47 = arith.select %41, %39, %46 : vector<128x16xi1>, vector<128x16xf32>
    %c0_25 = arith.constant 0 : index
    %c0_26 = arith.constant 0 : index
    %48 = vector.load %arg6[%c0_25, %c0_26] : memref<16x8xf32, #tpu.memory_space<vmem>>, vector<16x8xf32>
    %cst_27 = arith.constant dense<0.000000e+00> : vector<128x8xf32>
    %49 = tpu.matmul %47, %48, %cst_27 {dimension_numbers = #tpu.dot_dimension_numbers<[1], [0], [0], [1], [0, 0, 1, 1], [], []>} : vector<128x16xf32>, vector<16x8xf32>, vector<128x8xf32> -> vector<128x8xf32>
    %c0_28 = arith.constant 0 : index
    %c0_29 = arith.constant 0 : index
    %50 = vector.load %arg8[%c0_28, %c0_29] : memref<8x1xf32, #tpu.memory_space<vmem>>, vector<8x1xf32>
    %cst_30 = arith.constant dense<0.000000e+00> : vector<128x1xf32>
    %51 = tpu.matmul %49, %50, %cst_30 {dimension_numbers = #tpu.dot_dimension_numbers<[1], [0], [0], [1], [0, 0, 1, 1], [], []>} : vector<128x8xf32>, vector<8x1xf32>, vector<128x1xf32> -> vector<128x1xf32>
    %c0_31 = arith.constant 0 : index
    %c0_32 = arith.constant 0 : index
    %52 = vector.load %arg7[%c0_31, %c0_32] : memref<1x8xf32, #tpu.memory_space<vmem>>, vector<1x8xf32>
    %cst_33 = arith.constant dense<0.000000e+00> : vector<1x128xf32>
    %53 = tpu.matmul %52, %49, %cst_33 {dimension_numbers = #tpu.dot_dimension_numbers<[1], [1], [0], [0], [0, 0, 1, 0], [], []>} : vector<1x8xf32>, vector<128x8xf32>, vector<1x128xf32> -> vector<1x128xf32>
    %54 = vector.broadcast %51 : vector<128x1xf32> to vector<128x128xf32>
    %55 = vector.broadcast %53 : vector<1x128xf32> to vector<128x128xf32>
    %56 = arith.addf %54, %55 : vector<128x128xf32>
    %cst_34 = arith.constant 0.000000e+00 : f32
    %57 = vector.broadcast %cst_34 : f32 to vector<128x128xf32>
    %58 = arith.cmpf ogt, %56, %57 : vector<128x128xf32>
    %cst_35 = arith.constant 2.000000e-01 : f32
    %59 = vector.broadcast %cst_35 : f32 to vector<128x128xf32>
    %60 = arith.mulf %59, %56 : vector<128x128xf32>
    %61 = arith.select %58, %56, %60 : vector<128x128xi1>, vector<128x128xf32>
    %62 = arith.addf %61, %5 : vector<128x128xf32>
    %cst_36 = arith.constant dense<0xFF800000> : vector<128xf32>
    %63 = vector.multi_reduction <maximumf>, %62, %cst_36 [1] : vector<128x128xf32> to vector<128xf32>
    %64 = vector.shape_cast %63 : vector<128xf32> to vector<128x1xf32>
    %65 = vector.broadcast %64 : vector<128x1xf32> to vector<128x128xf32>
    %66 = arith.subf %62, %65 : vector<128x128xf32>
    %67 = math.exp %66 : vector<128x128xf32>
    %cst_37 = arith.constant dense<0.000000e+00> : vector<128xf32>
    %68 = vector.multi_reduction <add>, %67, %cst_37 [1] : vector<128x128xf32> to vector<128xf32>
    %69 = vector.shape_cast %68 : vector<128xf32> to vector<128x1xf32>
    %cst_38 = arith.constant 9.99999968E-21 : f32
    %70 = vector.broadcast %cst_38 : f32 to vector<128x1xf32>
    %71 = arith.maximumf %69, %70 : vector<128x1xf32>
    %72 = tpu.reciprocal %71 {approx = true} : vector<128x1xf32> -> vector<128x1xf32>
    %73 = vector.broadcast %72 : vector<128x1xf32> to vector<128x128xf32>
    %74 = arith.mulf %67, %73 : vector<128x128xf32>
    %75 = arith.truncf %74 : vector<128x128xf32> to vector<128x128xbf16>
    %76 = arith.truncf %49 : vector<128x8xf32> to vector<128x8xbf16>
    %cst_39 = arith.constant dense<0.000000e+00> : vector<128x8xf32>
    %77 = tpu.matmul %75, %76, %cst_39 {dimension_numbers = #tpu.dot_dimension_numbers<[1], [0], [0], [1], [0, 0, 1, 1], [], []>} : vector<128x128xbf16>, vector<128x8xbf16>, vector<128x8xf32> -> vector<128x8xf32>
    %c0_40 = arith.constant 0 : index
    %c0_41 = arith.constant 0 : index
    %78 = vector.load %arg9[%c0_40, %c0_41] : memref<1x8xf32, #tpu.memory_space<vmem>>, vector<1x8xf32>
    %79 = vector.broadcast %78 : vector<1x8xf32> to vector<128x8xf32>
    %80 = arith.addf %77, %79 : vector<128x8xf32>
    %c0_42 = arith.constant 0 : index
    %c0_43 = arith.constant 0 : index
    %81 = vector.load %arg16[%c0_42, %c0_43] : memref<128x8xf32, #tpu.memory_space<vmem>>, vector<128x8xf32>
    tpu.vector_store %arg16[%c0_42, %c0_43], %80 {strides = array<i32>} : memref<128x8xf32, #tpu.memory_space<vmem>>, vector<128x8xf32>,
    %c0_44 = arith.constant 0 : index
    %c0_45 = arith.constant 0 : index
    %82 = vector.load %arg10[%c0_44, %c0_45] : memref<8x16xf32, #tpu.memory_space<vmem>>, vector<8x16xf32>
    %cst_46 = arith.constant dense<0.000000e+00> : vector<128x16xf32>
    %83 = tpu.matmul %80, %82, %cst_46 {dimension_numbers = #tpu.dot_dimension_numbers<[1], [0], [0], [1], [0, 0, 1, 1], [], []>} : vector<128x8xf32>, vector<8x16xf32>, vector<128x16xf32> -> vector<128x16xf32>
    %c0_47 = arith.constant 0 : index
    %c0_48 = arith.constant 0 : index
    %84 = vector.load %arg12[%c0_47, %c0_48] : memref<16x1xf32, #tpu.memory_space<vmem>>, vector<16x1xf32>
    %cst_49 = arith.constant dense<0.000000e+00> : vector<128x1xf32>
    %85 = tpu.matmul %83, %84, %cst_49 {dimension_numbers = #tpu.dot_dimension_numbers<[1], [0], [0], [1], [0, 0, 1, 1], [], []>} : vector<128x16xf32>, vector<16x1xf32>, vector<128x1xf32> -> vector<128x1xf32>
    %c0_50 = arith.constant 0 : index
    %c0_51 = arith.constant 0 : index
    %86 = vector.load %arg11[%c0_50, %c0_51] : memref<1x16xf32, #tpu.memory_space<vmem>>, vector<1x16xf32>
    %cst_52 = arith.constant dense<0.000000e+00> : vector<1x128xf32>
    %87 = tpu.matmul %86, %83, %cst_52 {dimension_numbers = #tpu.dot_dimension_numbers<[1], [1], [0], [0], [0, 0, 1, 0], [], []>} : vector<1x16xf32>, vector<128x16xf32>, vector<1x128xf32> -> vector<1x128xf32>
    %88 = vector.broadcast %85 : vector<128x1xf32> to vector<128x128xf32>
    %89 = vector.broadcast %87 : vector<1x128xf32> to vector<128x128xf32>
    %90 = arith.addf %88, %89 : vector<128x128xf32>
    %cst_53 = arith.constant 0.000000e+00 : f32
    %91 = vector.broadcast %cst_53 : f32 to vector<128x128xf32>
    %92 = arith.cmpf ogt, %90, %91 : vector<128x128xf32>
    %cst_54 = arith.constant 2.000000e-01 : f32
    %93 = vector.broadcast %cst_54 : f32 to vector<128x128xf32>
    %94 = arith.mulf %93, %90 : vector<128x128xf32>
    %95 = arith.select %92, %90, %94 : vector<128x128xi1>, vector<128x128xf32>
    %96 = arith.addf %95, %5 : vector<128x128xf32>
    %cst_55 = arith.constant dense<0xFF800000> : vector<128xf32>
    %97 = vector.multi_reduction <maximumf>, %96, %cst_55 [1] : vector<128x128xf32> to vector<128xf32>
    %98 = vector.shape_cast %97 : vector<128xf32> to vector<128x1xf32>
    %99 = vector.broadcast %98 : vector<128x1xf32> to vector<128x128xf32>
    %100 = arith.subf %96, %99 : vector<128x128xf32>
    %101 = math.exp %100 : vector<128x128xf32>
    %cst_56 = arith.constant dense<0.000000e+00> : vector<128xf32>
    %102 = vector.multi_reduction <add>, %101, %cst_56 [1] : vector<128x128xf32> to vector<128xf32>
    %103 = vector.shape_cast %102 : vector<128xf32> to vector<128x1xf32>
    %cst_57 = arith.constant 9.99999968E-21 : f32
    %104 = vector.broadcast %cst_57 : f32 to vector<128x1xf32>
    %105 = arith.maximumf %103, %104 : vector<128x1xf32>
    %106 = tpu.reciprocal %105 {approx = true} : vector<128x1xf32> -> vector<128x1xf32>
    %107 = vector.broadcast %106 : vector<128x1xf32> to vector<128x128xf32>
    %108 = arith.mulf %101, %107 : vector<128x128xf32>
    %109 = arith.truncf %108 : vector<128x128xf32> to vector<128x128xbf16>
    %110 = arith.truncf %83 : vector<128x16xf32> to vector<128x16xbf16>
    %cst_58 = arith.constant dense<0.000000e+00> : vector<128x16xf32>
    %111 = tpu.matmul %109, %110, %cst_58 {dimension_numbers = #tpu.dot_dimension_numbers<[1], [0], [0], [1], [0, 0, 1, 1], [], []>} : vector<128x128xbf16>, vector<128x16xbf16>, vector<128x16xf32> -> vector<128x16xf32>
    %c0_59 = arith.constant 0 : index
    %c0_60 = arith.constant 0 : index
    %112 = vector.load %arg13[%c0_59, %c0_60] : memref<1x16xf32, #tpu.memory_space<vmem>>, vector<1x16xf32>
    %113 = vector.broadcast %112 : vector<1x16xf32> to vector<128x16xf32>
    %114 = arith.addf %111, %113 : vector<128x16xf32>
    %cst_61 = arith.constant 0.000000e+00 : f32
    %115 = vector.broadcast %cst_61 : f32 to vector<128x16xf32>
    %116 = arith.cmpf ogt, %114, %115 : vector<128x16xf32>
    %cst_62 = arith.constant 0.000000e+00 : f32
    %117 = vector.broadcast %cst_62 : f32 to vector<128x16xf32>
    %118 = arith.minimumf %114, %117 : vector<128x16xf32>
    %119 = math.exp %118 : vector<128x16xf32>
    %cst_63 = arith.constant 1.000000e+00 : f32
    %120 = vector.broadcast %cst_63 : f32 to vector<128x16xf32>
    %121 = arith.subf %119, %120 : vector<128x16xf32>
    %122 = arith.select %116, %114, %121 : vector<128x16xi1>, vector<128x16xf32>
    %c0_64 = arith.constant 0 : index
    %c0_65 = arith.constant 0 : index
    %123 = vector.load %arg14[%c0_64, %c0_65] : memref<16x32xf32, #tpu.memory_space<vmem>>, vector<16x32xf32>
    %cst_66 = arith.constant dense<0.000000e+00> : vector<128x32xf32>
    %124 = tpu.matmul %122, %123, %cst_66 {dimension_numbers = #tpu.dot_dimension_numbers<[1], [0], [0], [1], [0, 0, 1, 1], [], []>} : vector<128x16xf32>, vector<16x32xf32>, vector<128x32xf32> -> vector<128x32xf32>
    %125 = arith.truncf %33 : vector<128x128xf32> to vector<128x128xbf16>
    %126 = arith.truncf %124 : vector<128x32xf32> to vector<128x32xbf16>
    %cst_67 = arith.constant dense<0.000000e+00> : vector<128x32xf32>
    %127 = tpu.matmul %125, %126, %cst_67 {dimension_numbers = #tpu.dot_dimension_numbers<[1], [0], [0], [1], [0, 0, 1, 1], [], []>} : vector<128x128xbf16>, vector<128x32xbf16>, vector<128x32xf32> -> vector<128x32xf32>
    %c0_68 = arith.constant 0 : index
    %c0_69 = arith.constant 0 : index
    %128 = vector.load %arg15[%c0_68, %c0_69] : memref<1x32xf32, #tpu.memory_space<vmem>>, vector<1x32xf32>
    %129 = vector.broadcast %128 : vector<1x32xf32> to vector<128x32xf32>
    %130 = arith.addf %127, %129 : vector<128x32xf32>
    %cst_70 = arith.constant 0.000000e+00 : f32
    %131 = vector.broadcast %cst_70 : f32 to vector<128x32xf32>
    %132 = arith.cmpf ogt, %130, %131 : vector<128x32xf32>
    %cst_71 = arith.constant 0.000000e+00 : f32
    %133 = vector.broadcast %cst_71 : f32 to vector<128x32xf32>
    %134 = arith.minimumf %130, %133 : vector<128x32xf32>
    %135 = math.exp %134 : vector<128x32xf32>
    %cst_72 = arith.constant 1.000000e+00 : f32
    %136 = vector.broadcast %cst_72 : f32 to vector<128x32xf32>
    %137 = arith.subf %135, %136 : vector<128x32xf32>
    %138 = arith.select %132, %130, %137 : vector<128x32xi1>, vector<128x32xf32>
    %c0_73 = arith.constant 0 : index
    %c0_74 = arith.constant 0 : index
    %139 = vector.load %arg17[%c0_73, %c0_74] : memref<128x32xf32, #tpu.memory_space<vmem>>, vector<128x32xf32>
    tpu.vector_store %arg17[%c0_73, %c0_74], %138 {strides = array<i32>} : memref<128x32xf32, #tpu.memory_space<vmem>>, vector<128x32xf32>,
    return
  }
}

</mosaic_0001>

<bundles_post_ra>
// kernel: gace_forward.1
= control target key start
LH: loop header
LB: loop body
LE: loop exit
PB: predicated region body
PF: predicated region fallthrough
CT: control target
= control target key end

     0   :  { %vm124_vm0 = vcmask 261120   ;;  %v4798_v25 = vmov 0.0|0.0   ;;  %vm320_vm1 = vcmask 130048   ;;  %vm4799_vm3 = vmmov 0   ;;  %s6230_s2 = inlined_call_operand.vmem [shape: f32[32,16], index: 2, kind: input, shape index: {}]   ;;  %s6231_s0 = inlined_call_operand.vmem [shape: f32[128,32], index: 0, kind: input, shape index: {}]   ;;  %s6232_s4 = inlined_call_operand.vmem [shape: f32[16,1], index: 4, kind: input, shape index: {}]   ;;  %s6233_s3 = inlined_call_operand.vmem [shape: f32[1,16], index: 3, kind: input, shape index: {}]   ;;  %s6234_s1 = inlined_call_operand.vmem [shape: f32[128,128], index: 1, kind: input, shape index: {}]   ;;  %s6235_s6 = inlined_call_operand.vmem [shape: f32[16,8], index: 6, kind: input, shape index: {}]   ;;  %s6236_s8 = inlined_call_operand.vmem [shape: f32[8,1], index: 8, kind: input, shape index: {}]   ;;  %s6237_s5 = inlined_call_operand.vmem [shape: f32[1,16], index: 5, kind: input, shape index: {}]   ;;  %s6238_s7 = inlined_call_operand.vmem [shape: f32[1,8], index: 7, kind: input, shape index: {}]   ;;  %s6239_s10 = inlined_call_operand.vmem [shape: f32[8,16], index: 10, kind: input, shape index: {}]   ;;  %s6240_s12 = inlined_call_operand.vmem [shape: f32[16,1], index: 12, kind: input, shape index: {}]   ;;  %s6241_s9 = inlined_call_operand.vmem [shape: f32[1,8], index: 9, kind: input, shape index: {}]   ;;  %s6242_s16 = inlined_call_operand.vmem [shape: f32[128,8], index: 16, kind: output, shape index: {0}]   ;;  %s6243_s11 = inlined_call_operand.vmem [shape: f32[1,16], index: 11, kind: input, shape index: {}]   ;;  %s6244_s14 = inlined_call_operand.vmem [shape: f32[16,32], index: 14, kind: input, shape index: {}]   ;;  %s6245_s13 = inlined_call_operand.vmem [shape: f32[1,16], index: 13, kind: input, shape index: {}]   ;;  %s6246_s15 = inlined_call_operand.vmem [shape: f32[1,32], index: 15, kind: input, shape index: {}]   ;;  %s6247_s17 = inlined_call_operand.vmem [shape: f32[128,32], index: 17, kind: output, shape index: {1}]  }
   0x1   :  { %6250 = sst [smem:[#allocation2_spill]] %s6230_s2  ;;  %v318_v7 = vld [vmem:[%s6232_s4] sm:$0xff]  ;;  %v319_v8 = vld [vmem:[%s6232_s4 + $0x8] sm:$0xff]  ;;  %vm4978_vm2 = vmpackc.low %vm320_vm1, %vm320_vm1  ;;  %v4800_v51 = vmov 0.0   ;;  %v4801_v53 = vmov 0  }
   0x2   :  { %6251 = sst [smem:[#allocation3_spill]] %s6231_s0  ;;  %s6252_s26 = sld [smem:[#allocation2_spill]]  ;;  %v4375_v10 = vpack.c.bf16 %v319_v8, %v318_v7  ;;  %v514_v52 = vld [vmem:[%s6233_s3] sm:$0x1]  ;;  %4508 = vset.pattern.permute.xlu0 %v4801_v53  ;;  %4509 = vset.pattern.permute.xlu1 %v4801_v53  ;;  %v668_v8 = vlaneseq  ;;  %v63_v53 = vld [vmem:[%s6234_s1 + $0x38] sm:$0xff] }
   0x3   :  { %s6253_s20 = sld [smem:[#allocation3_spill]] }
   0x4   :  { %4376 = vmatprep.subr.bf16.mxu1 %v4375_v10 }
   0x5   :  { %4378 = vmatpush3.bf16.msra.mxu1 %v4375_v10 }
   0x6   :  { %4379 = vmatprep.subr.bf16.mxu1 %v4798_v25 }
   0x8   :  { %v120_v0 = vld [vmem:[%s6252_s26] sm:$0xff]  ;;  %v121_v1 = vld [vmem:[%s6252_s26 + $0x8] sm:$0xff]  ;;  %v122_v2 = vld [vmem:[%s6252_s26 + $0x10] sm:$0xff] }
   0x9   :  { %v4367_v3 = vpack.c.bf16 %v121_v1, %v120_v0  ;;  %v123_v4 = vld [vmem:[%s6252_s26 + $0x18] sm:$0xff]  ;;  %v104_v5 = vld [vmem:[%s6253_s20] sm:$0xff]  ;;  %v105_v9 = vld [vmem:[%s6253_s20 + $0x8] sm:$0xff] }
   0xa   :  { %v4371_v6 = vpack.c.bf16 %v123_v4, %v122_v2  ;;  %3946 = vmatprep.mubr.msk.f32.mxu0 %vm124_vm0, %v104_v5  ;;  %v106_v11 = vld [vmem:[%s6253_s20 + $0x10] sm:$0xff]  ;;  %v107_v12 = vld [vmem:[%s6253_s20 + $0x18] sm:$0xff]  ;;  %v108_v13 = vld [vmem:[%s6253_s20 + $0x20] sm:$0xff] }
   0xb   :  { %4368 = vmatprep.subr.bf16.mxu0 %v4367_v3  ;;  %v109_v14 = vld [vmem:[%s6253_s20 + $0x28] sm:$0xff]  ;;  %v110_v15 = vld [vmem:[%s6253_s20 + $0x30] sm:$0xff]  ;;  %v111_v16 = vld [vmem:[%s6253_s20 + $0x38] sm:$0xff] }
   0xc   :  { %4370 = vmatpush3.bf16.msra.mxu0 %v4367_v3  ;;  %v112_v17 = vld [vmem:[%s6253_s20 + $0x40] sm:$0xff]  ;;  %v113_v18 = vld [vmem:[%s6253_s20 + $0x48] sm:$0xff]  ;;  %v114_v19 = vld [vmem:[%s6253_s20 + $0x50] sm:$0xff] }
   0xd   :  { %4372 = vmatprep.subr.bf16.mxu0 %v4371_v6  ;;  %v115_v20 = vld [vmem:[%s6253_s20 + $0x58] sm:$0xff]  ;;  %v116_v21 = vld [vmem:[%s6253_s20 + $0x60] sm:$0xff]  ;;  %v117_v22 = vld [vmem:[%s6253_s20 + $0x68] sm:$0xff] }
   0xe   :  { %v118_v23 = vld [vmem:[%s6253_s20 + $0x70] sm:$0xff]  ;;  %v119_v24 = vld [vmem:[%s6253_s20 + $0x78] sm:$0xff] }
  0x10   :  { %4374 = vmatpush3.bf16.msra.mxu0 %v4371_v6 }
  0x13   :  { %3947 = vmatmul.mubr.msk.f32.vlgmr.msra.gmra.mrb[0].mxu0 %vm124_vm0, %v105_v9  ;;  %v669_v9 = vshrl.u32 %v668_v8, 7 }
  0x14   :  { %3949 = vmatprep.mubr.msk.f32.mxu0 %vm124_vm0, %v106_v11 }
  0x15   :  { %v5027_v10 = vsub.s32 0, %v669_v9 }
  0x17   :  { %3950 = vmatmul.mubr.msk.f32.gmra.mrb[2].mxu0 %vm124_vm0, %v107_v12  ;;  %v56_v12 = vld [vmem:[%s6234_s1] sm:$0xff] }
  0x18   :  { %3952 = vmatprep.mubr.msk.f32.mxu0 %vm124_vm0, %v108_v13  ;;  %vm72_vm4 = vcmp.gt.f32.partialorder %v56_v12, 0.0 }
  0x1b   :  { %3953 = vmatmul.mubr.msk.f32.gmra.mrb[4].mxu0 %vm124_vm0, %v109_v14  ;;  %v59_v14 = vld [vmem:[%s6234_s1 + $0x18] sm:$0xff] }
  0x1c   :  { %3955 = vmatprep.mubr.msk.f32.mxu0 %vm124_vm0, %v110_v15  ;;  %vm75_vm6 = vcmp.gt.f32.partialorder %v59_v14, 0.0 }
  0x1f   :  { %3956 = vmatmul.mubr.msk.f32.gmra.mrb[6].mxu0 %vm124_vm0, %v111_v16  ;;  %v57_v16 = vld [vmem:[%s6234_s1 + $0x8] sm:$0xff] }
  0x20   :  { %3958 = vmatprep.mubr.msk.f32.mxu0 %vm124_vm0, %v112_v17  ;;  %vm73_vm7 = vcmp.gt.f32.partialorder %v57_v16, 0.0 }
  0x23   :  { %3959 = vmatmul.mubr.msk.f32.gmra.mrb[8].mxu0 %vm124_vm0, %v113_v18 }
  0x24   :  { %3961 = vmatprep.mubr.msk.f32.mxu0 %vm124_vm0, %v114_v19  ;;  %v4802_v19 = vmov -1e+30  }
  0x27   :  { %3962 = vmatmul.mubr.msk.f32.gmra.mrb[10].mxu0 %vm124_vm0, %v115_v20  ;;  %v5043_v20 = vsel %vm72_vm4, 0.0, %v4802_v19 }
  0x28   :  { %3964 = vmatprep.mubr.msk.f32.mxu0 %vm124_vm0, %v116_v21 }
  0x2b   :  { %3965 = vmatmul.mubr.msk.f32.gmra.mrb[12].mxu0 %vm124_vm0, %v117_v22 }
  0x2c   :  { %3967 = vmatprep.mubr.msk.f32.mxu0 %vm124_vm0, %v118_v23  ;;  %v58_v23 = vld [vmem:[%s6234_s1 + $0x10] sm:$0xff] }
  0x2d   :  { %vm74_vm10 = vcmp.gt.f32.partialorder %v58_v23, 0.0 }
  0x2f   :  { %3968 = vmatmul.mubr.msk.f32.gmra.mrb[14].mxu0 %vm124_vm0, %v119_v24 }
  0xe6   :  { %v3948_v26 = vpop.f32.mrb[0].mxu0 }
  0xe7   :  { %v239_v27 = vpop.f32.mrb[1].mxu0 }
  0xe8   :  { %v4380_v29 = vpack.c.bf16 %v3948_v26, %v239_v27  ;;  %3974 = vmatprep.mubr.msk.f32.mxu1 %vm320_vm1, %v239_v27  ;;  %v60_v27 = vld [vmem:[%s6234_s1 + $0x20] sm:$0xff] }
  0xe9   :  { %3975 = vmatmul.mubr.msk.f32.vlgmr.msra.gmra.mrb[0].mxu1 %vm320_vm1, %v3948_v26  ;;  %vm76_vm11 = vcmp.gt.f32.partialorder %v60_v27, 0.0 }
  0xea   :  { %v3951_v30 = vpop.f32.mrb[2].mxu0  ;;  %4382 = vmatpush3.bf16.xpose.msk.msra.mxu1 %vm4978_vm2, %v4380_v29  ;;  %4033 = vmatprep.subr.bf16.mxu0 %v4380_v29 }
  0xeb   :  { %v249_v31 = vpop.f32.mrb[3].mxu0  ;;  %4034 = vmatpush3.bf16.msra.mxu0 %v4380_v29  ;;  %4383 = vmatprep.subr.bf16.mxu1 %v4798_v25 }
  0xec   :  { %v4384_v32 = vpack.c.bf16 %v3951_v30, %v249_v31  ;;  %3977 = vmatprep.mubr.msk.f32.mxu1 %vm320_vm1, %v249_v31  ;;  %v5057_v31 = vsel %vm75_vm6, 0.0, %v4802_v19  ;;  %vm79_vm6 = vcmp.gt.f32.partialorder %v63_v53, 0.0 }
  0xed   :  { %3978 = vmatmul.mubr.msk.f32.gmra.mrb[2].mxu1 %vm320_vm1, %v3951_v30  ;;  %v5122_v12 = vsel %vm79_vm6, 0.0, %v4802_v19 }
  0xee   :  { %v3954_v33 = vpop.f32.mrb[4].mxu0  ;;  %4035 = vmatprep.subr.bf16.mxu0 %v4384_v32 }
  0xef   :  { %v259_v34 = vpop.f32.mrb[5].mxu0  ;;  %4036 = vmatpush3.bf16.msra.mxu0 %v4384_v32 }
  0xf0   :  { %v4388_v35 = vpack.c.bf16 %v3954_v33, %v259_v34  ;;  %3980 = vmatprep.mubr.msk.f32.mxu1 %vm320_vm1, %v259_v34  ;;  %v5060_v34 = vsel %vm73_vm7, 0.0, %v4802_v19 }
  0xf1   :  { %3981 = vmatmul.mubr.msk.f32.gmra.mrb[4].mxu1 %vm320_vm1, %v3954_v33 }
  0xf2   :  { %v3957_v36 = vpop.f32.mrb[6].mxu0  ;;  %4386 = vmatpush3.bf16.xpose.msk.msra.mxu1 %vm4978_vm2, %v4384_v32  ;;  %4037 = vmatprep.subr.bf16.mxu0 %v4388_v35 }
  0xf3   :  { %v269_v37 = vpop.f32.mrb[7].mxu0  ;;  %4387 = vmatprep.subr.bf16.mxu1 %v4798_v25  ;;  %4038 = vmatpush3.bf16.msra.mxu0 %v4388_v35 }
  0xf4   :  { %v4392_v38 = vpack.c.bf16 %v3957_v36, %v269_v37  ;;  %3983 = vmatprep.mubr.msk.f32.mxu1 %vm320_vm1, %v269_v37 }
  0xf5   :  { %3984 = vmatmul.mubr.msk.f32.gmra.mrb[6].mxu1 %vm320_vm1, %v3957_v36 }
  0xf6   :  { %v3960_v39 = vpop.f32.mrb[8].mxu0  ;;  %4039 = vmatprep.subr.bf16.mxu0 %v4392_v38 }
  0xf7   :  { %v279_v40 = vpop.f32.mrb[9].mxu0  ;;  %4040 = vmatpush3.bf16.msra.mxu0 %v4392_v38 }
  0xf8   :  { %v4396_v41 = vpack.c.bf16 %v3960_v39, %v279_v40  ;;  %3986 = vmatprep.mubr.msk.f32.mxu1 %vm320_vm1, %v279_v40 }
  0xf9   :  { %3987 = vmatmul.mubr.msk.f32.gmra.mrb[8].mxu1 %vm320_vm1, %v3960_v39 }
  0xfa   :  { %v3963_v42 = vpop.f32.mrb[10].mxu0  ;;  %4390 = vmatpush3.bf16.xpose.msk.msra.mxu1 %vm4978_vm2, %v4388_v35  ;;  %4041 = vmatprep.subr.bf16.mxu0 %v4396_v41 }
  0xfb   :  { %v289_v43 = vpop.f32.mrb[11].mxu0  ;;  %4391 = vmatprep.subr.bf16.mxu1 %v4798_v25  ;;  %4042 = vmatpush3.bf16.msra.mxu0 %v4396_v41 }
  0xfc   :  { %v4400_v44 = vpack.c.bf16 %v3963_v42, %v289_v43  ;;  %3989 = vmatprep.mubr.msk.f32.mxu1 %vm320_vm1, %v289_v43 }
  0xfd   :  { %3990 = vmatmul.mubr.msk.f32.gmra.mrb[10].mxu1 %vm320_vm1, %v3963_v42  ;;  %v62_v42 = vld [vmem:[%s6234_s1 + $0x30] sm:$0xff] }
  0xfe   :  { %v3966_v45 = vpop.f32.mrb[12].mxu0  ;;  %4043 = vmatprep.subr.bf16.mxu0 %v4400_v44  ;;  %vm78_vm15 = vcmp.gt.f32.partialorder %v62_v42, 0.0 }
  0xff   :  { %v299_v46 = vpop.f32.mrb[13].mxu0  ;;  %4044 = vmatpush3.bf16.msra.mxu0 %v4400_v44 }
 0x100   :  { %v4404_v47 = vpack.c.bf16 %v3966_v45, %v299_v46  ;;  %3992 = vmatprep.mubr.msk.f32.mxu1 %vm320_vm1, %v299_v46 }
 0x101   :  { %3993 = vmatmul.mubr.msk.f32.gmra.mrb[12].mxu1 %vm320_vm1, %v3966_v45  ;;  %v5078_v45 = vsel %vm74_vm10, 0.0, %v4802_v19 }
 0x102   :  { %v3969_v48 = vpop.f32.mrb[14].mxu0  ;;  %4394 = vmatpush3.bf16.xpose.msk.msra.mxu1 %vm4978_vm2, %v4392_v38  ;;  %4045 = vmatprep.subr.bf16.mxu0 %v4404_v47  ;;  %v61_v38 = vld [vmem:[%s6234_s1 + $0x28] sm:$0xff] }
 0x103   :  { %v309_v49 = vpop.f32.mrb[15].mxu0  ;;  %4395 = vmatprep.subr.bf16.mxu1 %v4798_v25  ;;  %4046 = vmatpush3.bf16.msra.mxu0 %v4404_v47  ;;  %vm77_vm14 = vcmp.gt.f32.partialorder %v61_v38, 0.0 }
 0x104   :  { %v4408_v50 = vpack.c.bf16 %v3969_v48, %v309_v49  ;;  %3995 = vmatprep.mubr.msk.f32.mxu1 %vm320_vm1, %v309_v49 }
 0x105   :  { %3996 = vmatmul.mubr.msk.f32.gmra.mrb[14].mxu1 %vm320_vm1, %v3969_v48  ;;  %v5081_v48 = vsel %vm76_vm11, 0.0, %v4802_v19 }
 0x106   :  { %4047 = vmatprep.subr.bf16.mxu0 %v4408_v50  ;;  %4030 = vmatprep.mubr.msk.f32.mxu1 %vm4799_vm3, %v4800_v51 }
 0x107   :  { %4048 = vmatpush3.bf16.msra.mxu0 %v4408_v50 }
 0x10a   :  { %4398 = vmatpush3.bf16.xpose.msk.msra.mxu1 %vm4978_vm2, %v4396_v41 }
 0x10b   :  { %4399 = vmatprep.subr.bf16.mxu1 %v4798_v25 }
 0x112   :  { %4402 = vmatpush3.bf16.xpose.msk.msra.mxu1 %vm4978_vm2, %v4400_v44 }
 0x113   :  { %4403 = vmatprep.subr.bf16.mxu1 %v4798_v25 }
 0x11a   :  { %4406 = vmatpush3.bf16.xpose.msk.msra.mxu1 %vm4978_vm2, %v4404_v47 }
 0x11b   :  { %4407 = vmatprep.subr.bf16.mxu1 %v4798_v25 }
 0x122   :  { %4410 = vmatpush3.bf16.xpose.msk.msra.mxu1 %vm4978_vm2, %v4408_v50 }
 0x129   :  { %4031 = vmatmul.mubr.msk.f32.vlgmr.msra.gmra.mrb[16].mxu1 %vm320_vm1, %v514_v52 }
 0x1bc   :  { %v3976_v54 = vpop.f32.mrb[0].mxu1 }
 0x1bd   :  { %v435_v55 = vpop.f32.mrb[1].mxu1 }
 0x1be   :  { %590 = vperm.xlu0 %4508, %v435_v55  }
 0x1c0   :  { %v3979_v56 = vpop.f32.mrb[2].mxu1 }
 0x1c1   :  { %605 = vperm.xlu1 %4509, %v3979_v56   ;;  %v445_v57 = vpop.f32.mrb[3].mxu1 }
 0x1c2   :  { %595 = vperm.xlu0 %4508, %v3976_v54  }
 0x1c4   :  { %v3982_v58 = vpop.f32.mrb[4].mxu1 }
 0x1c5   :  { %600 = vperm.xlu1 %4509, %v445_v57   ;;  %v455_v59 = vpop.f32.mrb[5].mxu1  ;;  %v64_v57 = vld [vmem:[%s6234_s1 + $0x40] sm:$0xff] }
 0x1c6   :  { %610 = vperm.xlu0 %4508, %v455_v59   ;;  %vm80_vm7 = vcmp.gt.f32.partialorder %v64_v57, 0.0 }
 0x1c8   :  { %v3985_v60 = vpop.f32.mrb[6].mxu1 }
 0x1c9   :  { %615 = vperm.xlu1 %4509, %v3982_v58   ;;  %v465_v61 = vpop.f32.mrb[7].mxu1 }
 0x1ca   :  { %620 = vperm.xlu0 %4508, %v465_v61  }
 0x1cc   :  { %v3988_v62 = vpop.f32.mrb[8].mxu1 }
 0x1cd   :  { %625 = vperm.xlu1 %4509, %v3985_v60   ;;  %v475_v63 = vpop.f32.mrb[9].mxu1  ;;  %v5100_v60 = vsel %vm77_vm14, 0.0, %v4802_v19 }
 0x1ce   :  { %630 = vperm.xlu0 %4508, %v475_v63   ;;  %v5103_v63 = vsel %vm78_vm15, 0.0, %v4802_v19 }
 0x1d0   :  { %v3991_v0 = vpop.f32.mrb[10].mxu1 }
 0x1d1   :  { %635 = vperm.xlu1 %4509, %v3988_v62   ;;  %v485_v1 = vpop.f32.mrb[11].mxu1 }
 0x1d2   :  { %640 = vperm.xlu0 %4508, %v485_v1  }
 0x1d4   :  { %v3994_v2 = vpop.f32.mrb[12].mxu1 }
 0x1d5   :  { %645 = vperm.xlu1 %4509, %v3991_v0   ;;  %v495_v3 = vpop.f32.mrb[13].mxu1 }
 0x1d6   :  { %650 = vperm.xlu0 %4508, %v495_v3   ;;  %v65_v3 = vld [vmem:[%s6234_s1 + $0x48] sm:$0xff] }
 0x1d7   :  { %vm81_vm10 = vcmp.gt.f32.partialorder %v65_v3, 0.0 }
 0x1d8   :  { %v3997_v4 = vpop.f32.mrb[14].mxu1 }
 0x1d9   :  { %655 = vperm.xlu1 %4509, %v3994_v2   ;;  %v505_v5 = vpop.f32.mrb[15].mxu1 }
 0x1da   :  { %660 = vperm.xlu0 %4508, %v505_v5  }
 0x1dd   :  { %665 = vperm.xlu1 %4509, %v3997_v4  }
 0x1fc   :  { %v584_v6 = vpop.f32.mrb[16].mxu1 }
 0x1fd   :  { %v4032_v7 = vpop.f32.mrb[17].mxu1  ;;  %v5030_v11 = vrot.slane %v584_v6, %v5027_v10 }
 0x1fe   :  { %v66_v7 = vld [vmem:[%s6234_s1 + $0x50] sm:$0xff] }
 0x1ff   :  { %vm82_vm11 = vcmp.gt.f32.partialorder %v66_v7, 0.0 }
 0x23d   :  { %v591_v13 = vpop.permute.xlu0 %590 }
 0x23e   :  { %v672_v15 = vadd.f32 %v5030_v11, %v591_v13 }
 0x240   :  { %v704_v17 = vmul.f32 0.2, %v672_v15  ;;  %v606_v18 = vpop.permute.xlu1 %605  ;;  %vm688_vm5 = vcmp.gt.f32.partialorder %v672_v15, 0.0 }
 0x241   :  { %v675_v21 = vadd.f32 %v5030_v11, %v606_v18  ;;  %v596_v22 = vpop.permute.xlu0 %595 }
 0x242   :  { %v673_v24 = vadd.f32 %v5030_v11, %v596_v22  ;;  %v720_v26 = vsel %vm688_vm5, %v672_v15, %v704_v17  ;;  %v5125_v15 = vsel %vm80_vm7, 0.0, %v4802_v19 }
 0x243   :  { %v707_v29 = vmul.f32 0.2, %v675_v21  ;;  %v5054_v30 = vadd.f32 %v720_v26, %v5043_v20  ;;  %vm691_vm8 = vcmp.gt.f32.partialorder %v675_v21, 0.0  ;;  %v68_v26 = vld [vmem:[%s6234_s1 + $0x60] sm:$0xff] }
 0x244   :  { %v705_v32 = vmul.f32 0.2, %v673_v24  ;;  %v601_v33 = vpop.permute.xlu1 %600  ;;  %vm689_vm9 = vcmp.gt.f32.partialorder %v673_v24, 0.0  ;;  %vm84_vm15 = vcmp.gt.f32.partialorder %v68_v26, 0.0 }
 0x245   :  { %v674_v35 = vadd.f32 %v5030_v11, %v601_v33  ;;  %v611_v36 = vpop.permute.xlu0 %610  ;;  %752 = vmax.xlane.f32.xlu0 %v5054_v30  ;;  %v723_v37 = vsel %vm691_vm8, %v675_v21, %v707_v29  ;;  %v67_v21 = vld [vmem:[%s6234_s1 + $0x58] sm:$0xff] }
 0x246   :  { %v676_v39 = vadd.f32 %v5030_v11, %v611_v36  ;;  %v721_v40 = vsel %vm689_vm9, %v673_v24, %v705_v32  ;;  %v5069_v41 = vadd.f32 %v723_v37, %v5057_v31  ;;  %v5144_v32 = vsel %vm81_vm10, 0.0, %v4802_v19 }
 0x247   :  { %v706_v43 = vmul.f32 0.2, %v674_v35  ;;  %v5075_v44 = vadd.f32 %v721_v40, %v5060_v34  ;;  %vm690_vm12 = vcmp.gt.f32.partialorder %v674_v35, 0.0  ;;  %v5147_v36 = vsel %vm82_vm11, 0.0, %v4802_v19  ;;  %v69_v40 = vld [vmem:[%s6234_s1 + $0x68] sm:$0xff] }
 0x248   :  { %v708_v46 = vmul.f32 0.2, %v676_v39  ;;  %v616_v47 = vpop.permute.xlu1 %615  ;;  %vm692_vm13 = vcmp.gt.f32.partialorder %v676_v39, 0.0  ;;  %vm83_vm14 = vcmp.gt.f32.partialorder %v67_v21, 0.0  ;;  %vm85_vm6 = vcmp.gt.f32.partialorder %v69_v40, 0.0 }
 0x249   :  { %v677_v49 = vadd.f32 %v5030_v11, %v616_v47  ;;  %v621_v50 = vpop.permute.xlu0 %620  ;;  %754 = vmax.xlane.f32.xlu1 %v5075_v44  ;;  %758 = vmax.xlane.f32.xlu0 %v5069_v41  ;;  %v722_v52 = vsel %vm690_vm12, %v674_v35, %v706_v43  ;;  %v70_v47 = vld [vmem:[%s6234_s1 + $0x70] sm:$0xff] }
 0x24a   :  { %v678_v54 = vadd.f32 %v5030_v11, %v621_v50  ;;  %v724_v55 = vsel %vm692_vm13, %v676_v39, %v708_v46  ;;  %v5091_v56 = vadd.f32 %v722_v52, %v5078_v45  ;;  %v5166_v52 = vsel %vm83_vm14, 0.0, %v4802_v19 }
 0x24b   :  { %v709_v58 = vmul.f32 0.2, %v677_v49  ;;  %v5097_v59 = vadd.f32 %v724_v55, %v5081_v48  ;;  %vm693_vm4 = vcmp.gt.f32.partialorder %v677_v49, 0.0  ;;  %v5169_v55 = vsel %vm84_vm15, 0.0, %v4802_v19 }
 0x24c   :  { %v710_v61 = vmul.f32 0.2, %v678_v54  ;;  %v626_v62 = vpop.permute.xlu1 %625  ;;  %vm694_vm5 = vcmp.gt.f32.partialorder %v678_v54, 0.0  ;;  %vm86_vm7 = vcmp.gt.f32.partialorder %v70_v47, 0.0 }
 0x24d   :  { %v679_v0 = vadd.f32 %v5030_v11, %v626_v62  ;;  %v631_v1 = vpop.permute.xlu0 %630  ;;  %760 = vmax.xlane.f32.xlu1 %v5097_v59  ;;  %756 = vmax.xlane.f32.xlu0 %v5091_v56  ;;  %v725_v2 = vsel %vm693_vm4, %v677_v49, %v709_v58  ;;  %v71_v62 = vld [vmem:[%s6234_s1 + $0x78] sm:$0xff] }
 0x24e   :  { %v680_v4 = vadd.f32 %v5030_v11, %v631_v1  ;;  %v726_v5 = vsel %vm694_vm5, %v678_v54, %v710_v61  ;;  %v5113_v6 = vadd.f32 %v725_v2, %v5100_v60  ;;  %vm87_vm10 = vcmp.gt.f32.partialorder %v71_v62, 0.0 }
 0x24f   :  { %v711_v8 = vmul.f32 0.2, %v679_v0  ;;  %v5119_v9 = vadd.f32 %v726_v5, %v5103_v63  ;;  %vm695_vm8 = vcmp.gt.f32.partialorder %v679_v0, 0.0  ;;  %v5185_v5 = vsel %vm85_vm6, 0.0, %v4802_v19 }
 0x250   :  { %v712_v13 = vmul.f32 0.2, %v680_v4  ;;  %v636_v14 = vpop.permute.xlu1 %635  ;;  %vm696_vm9 = vcmp.gt.f32.partialorder %v680_v4, 0.0 }
 0x251   :  { %v681_v16 = vadd.f32 %v5030_v11, %v636_v14  ;;  %v641_v17 = vpop.permute.xlu0 %640  ;;  %764 = vmax.xlane.f32.xlu1 %v5119_v9  ;;  %762 = vmax.xlane.f32.xlu0 %v5113_v6  ;;  %v727_v18 = vsel %vm695_vm8, %v679_v0, %v711_v8 }
 0x252   :  { %v682_v22 = vadd.f32 %v5030_v11, %v641_v17  ;;  %v728_v23 = vsel %vm696_vm9, %v680_v4, %v712_v13  ;;  %v5135_v24 = vadd.f32 %v727_v18, %v5122_v12  ;;  %v5188_v13 = vsel %vm86_vm7, 0.0, %v4802_v19 }
 0x253   :  { %v713_v27 = vmul.f32 0.2, %v681_v16  ;;  %v5141_v29 = vadd.f32 %v728_v23, %v5125_v15  ;;  %vm697_vm12 = vcmp.gt.f32.partialorder %v681_v16, 0.0  ;;  %v5200_v23 = vsel %vm87_vm10, 0.0, %v4802_v19 }
 0x254   :  { %v714_v33 = vmul.f32 0.2, %v682_v22  ;;  %v646_v35 = vpop.permute.xlu1 %645  ;;  %vm698_vm13 = vcmp.gt.f32.partialorder %v682_v22, 0.0 }
 0x255   :  { %v683_v37 = vadd.f32 %v5030_v11, %v646_v35  ;;  %v651_v38 = vpop.permute.xlu0 %650  ;;  %768 = vmax.xlane.f32.xlu1 %v5141_v29  ;;  %766 = vmax.xlane.f32.xlu0 %v5135_v24  ;;  %v729_v39 = vsel %vm697_vm12, %v681_v16, %v713_v27 }
 0x256   :  { %v684_v42 = vadd.f32 %v5030_v11, %v651_v38  ;;  %v730_v43 = vsel %vm698_vm13, %v682_v22, %v714_v33  ;;  %v5157_v46 = vadd.f32 %v729_v39, %v5144_v32 }
 0x257   :  { %v715_v49 = vmul.f32 0.2, %v683_v37  ;;  %v5163_v50 = vadd.f32 %v730_v43, %v5147_v36  ;;  %vm699_vm4 = vcmp.gt.f32.partialorder %v683_v37, 0.0 }
 0x258   :  { %v716_v53 = vmul.f32 0.2, %v684_v42  ;;  %v656_v54 = vpop.permute.xlu1 %655  ;;  %vm700_vm5 = vcmp.gt.f32.partialorder %v684_v42, 0.0 }
 0x259   :  { %v685_v57 = vadd.f32 %v5030_v11, %v656_v54  ;;  %v661_v58 = vpop.permute.xlu0 %660  ;;  %772 = vmax.xlane.f32.xlu1 %v5163_v50  ;;  %770 = vmax.xlane.f32.xlu0 %v5157_v46  ;;  %v731_v61 = vsel %vm699_vm4, %v683_v37, %v715_v49 }
 0x25a   :  { %v686_v0 = vadd.f32 %v5030_v11, %v661_v58  ;;  %v732_v1 = vsel %vm700_vm5, %v684_v42, %v716_v53  ;;  %v5179_v2 = vadd.f32 %v731_v61, %v5166_v52 }
 0x25b   :  { %v717_v3 = vmul.f32 0.2, %v685_v57  ;;  %v5182_v4 = vadd.f32 %v732_v1, %v5169_v55  ;;  %vm701_vm8 = vcmp.gt.f32.partialorder %v685_v57, 0.0 }
 0x25c   :  { %v718_v7 = vmul.f32 0.2, %v686_v0  ;;  %v666_v8 = vpop.permute.xlu1 %665  ;;  %vm702_vm9 = vcmp.gt.f32.partialorder %v686_v0, 0.0 }
 0x25d   :  { %v687_v14 = vadd.f32 %v5030_v11, %v666_v8  ;;  %776 = vmax.xlane.f32.xlu1 %v5182_v4  ;;  %774 = vmax.xlane.f32.xlu0 %v5179_v2  ;;  %v733_v16 = vsel %vm701_vm8, %v685_v57, %v717_v3 }
 0x25e   :  { %v734_v17 = vsel %vm702_vm9, %v686_v0, %v718_v7  ;;  %v5194_v18 = vadd.f32 %v733_v16, %v5185_v5 }
 0x25f   :  { %v719_v21 = vmul.f32 0.2, %v687_v14  ;;  %v5197_v22 = vadd.f32 %v734_v17, %v5188_v13  ;;  %vm703_vm11 = vcmp.gt.f32.partialorder %v687_v14, 0.0 }
 0x261   :  { %780 = vmax.xlane.f32.xlu1 %v5197_v22  ;;  %778 = vmax.xlane.f32.xlu0 %v5194_v18  ;;  %v735_v11 = vsel %vm703_vm11, %v687_v14, %v719_v21 }
 0x262   :  { %v5205_v26 = vadd.f32 %v735_v11, %v5200_v23 }
 0x265   :  { %782 = vmax.xlane.f32.xlu0 %v5205_v26 }
 0x2d2   :  { %v753_v27 = vpop.xlane.xlu0 %752 }
 0x2d3   :  { %v784_v33 = vsub.f32 %v5054_v30, %v753_v27 }
 0x2d5   :  { %v800_v35 = vmul.f32 1.442695, %v784_v33 }
 0x2d6   :  { %v755_v37 = vpop.xlane.xlu1 %754  ;;  %v759_v38 = vpop.xlane.xlu0 %758 }
 0x2d7   :  { %4510 = vpow2.f32 %v800_v35  ;;  %v785_v19 = vsub.f32 %v5075_v44, %v755_v37  ;;  %v787_v39 = vsub.f32 %v5069_v41, %v759_v38 }
 0x2d9   :  { %v802_v40 = vmul.f32 1.442695, %v785_v19  ;;  %v806_v47 = vmul.f32 1.442695, %v787_v39 }
 0x2da   :  { %v761_v42 = vpop.xlane.xlu1 %760  ;;  %v757_v43 = vpop.xlane.xlu0 %756 }
 0x2db   :  { %4512 = vpow2.f32 %v802_v40  ;;  %v788_v49 = vsub.f32 %v5097_v59, %v761_v42  ;;  %v786_v53 = vsub.f32 %v5091_v56, %v757_v43 }
 0x2dc   :  { %4514 = vpow2.f32 %v806_v47 }
 0x2dd   :  { %v804_v54 = vmul.f32 1.442695, %v786_v53  ;;  %v808_v58 = vmul.f32 1.442695, %v788_v49 }
 0x2de   :  { %v765_v57 = vpop.xlane.xlu1 %764  ;;  %v763_v30 = vpop.xlane.xlu0 %762 }
 0x2df   :  { %v790_v61 = vsub.f32 %v5119_v9, %v765_v57  ;;  %v789_v44 = vsub.f32 %v5113_v6, %v763_v30  ;;  %4516 = vpow2.f32 %v804_v54 }
 0x2e0   :  { %4518 = vpow2.f32 %v808_v58 }
 0x2e1   :  { %v5215_v41 = vpop.eup %4510  ;;  %v810_v62 = vmul.f32 1.442695, %v789_v44  ;;  %v812_v59 = vmul.f32 1.442695, %v790_v61 }
 0x2e2   :  { %v769_v0 = vpop.xlane.xlu1 %768  ;;  %832 = vadd.xlane.f32.xlu1 %v5215_v41  ;;  %v767_v1 = vpop.xlane.xlu0 %766 }
 0x2e3   :  { %v792_v56 = vsub.f32 %v5141_v29, %v769_v0  ;;  %v791_v3 = vsub.f32 %v5135_v24, %v767_v1  ;;  %4520 = vpow2.f32 %v810_v62  ;;  %v1128_v0 = vld [vmem:[%s6235_s6] sm:$0xff]  ;;  %v1129_v1 = vld [vmem:[%s6235_s6 + $0x8] sm:$0xff] }
 0x2e4   :  { %4522 = vpow2.f32 %v812_v59  ;;  %v4411_v59 = vpack.c.bf16 %v1129_v1, %v1128_v0 }
 0x2e5   :  { %v5220_v7 = vpop.eup %4512  ;;  %v814_v9 = vmul.f32 1.442695, %v791_v3  ;;  %v816_v14 = vmul.f32 1.442695, %v792_v56 }
 0x2e6   :  { %v773_v8 = vpop.xlane.xlu1 %772  ;;  %834 = vadd.xlane.f32.xlu0 %v5220_v7  ;;  %v771_v6 = vpop.xlane.xlu0 %770  ;;  %4412 = vmatprep.subr.bf16.mxu0 %v4411_v59 }
 0x2e7   :  { %v794_v16 = vsub.f32 %v5163_v50, %v773_v8  ;;  %v793_v17 = vsub.f32 %v5157_v46, %v771_v6  ;;  %4524 = vpow2.f32 %v814_v9  ;;  %v5225_v21 = vpop.eup %4514 }
 0x2e8   :  { %4526 = vpow2.f32 %v816_v14 }
 0x2e9   :  { %v818_v29 = vmul.f32 1.442695, %v793_v17  ;;  %v5227_v11 = vpop.eup %4516  ;;  %v820_v33 = vmul.f32 1.442695, %v794_v16 }
 0x2ea   :  { %v777_v24 = vpop.xlane.xlu1 %776  ;;  %838 = vadd.xlane.f32.xlu0 %v5225_v21  ;;  %v775_v27 = vpop.xlane.xlu0 %774  ;;  %836 = vadd.xlane.f32.xlu1 %v5227_v11 }
 0x2eb   :  { %v796_v35 = vsub.f32 %v5182_v4, %v777_v24  ;;  %v795_v50 = vsub.f32 %v5179_v2, %v775_v27  ;;  %4528 = vpow2.f32 %v818_v29  ;;  %v5233_v46 = vpop.eup %4518 }
 0x2ec   :  { %4530 = vpow2.f32 %v820_v33 }
 0x2ed   :  { %v822_v37 = vmul.f32 1.442695, %v795_v50  ;;  %v5235_v38 = vpop.eup %4520  ;;  %v824_v40 = vmul.f32 1.442695, %v796_v35 }
 0x2ee   :  { %v781_v19 = vpop.xlane.xlu1 %780  ;;  %v779_v39 = vpop.xlane.xlu0 %778  ;;  %840 = vadd.xlane.f32.xlu1 %v5233_v46  ;;  %842 = vadd.xlane.f32.xlu0 %v5235_v38 }
 0x2ef   :  { %v797_v4 = vsub.f32 %v5194_v18, %v779_v39  ;;  %4532 = vpow2.f32 %v822_v37  ;;  %v798_v42 = vsub.f32 %v5197_v22, %v781_v19  ;;  %v5241_v2 = vpop.eup %4522 }
 0x2f0   :  { %4534 = vpow2.f32 %v824_v40 }
 0x2f1   :  { %v826_v43 = vmul.f32 1.442695, %v797_v4  ;;  %v5243_v47 = vpop.eup %4524  ;;  %v828_v54 = vmul.f32 1.442695, %v798_v42 }
 0x2f2   :  { %v783_v49 = vpop.xlane.xlu0 %782  ;;  %844 = vadd.xlane.f32.xlu1 %v5241_v2  ;;  %846 = vadd.xlane.f32.xlu0 %v5243_v47  ;;  %v5248_v57 = vpop.eup %4526 }
 0x2f3   :  { %v799_v53 = vsub.f32 %v5205_v26, %v783_v49  ;;  %4536 = vpow2.f32 %v826_v43 }
 0x2f5   :  { %v830_v18 = vmul.f32 1.442695, %v799_v53  ;;  %v5250_v30 = vpop.eup %4528 }
 0x2f6   :  { %848 = vadd.xlane.f32.xlu1 %v5248_v57  ;;  %850 = vadd.xlane.f32.xlu0 %v5250_v30  ;;  %v5254_v22 = vpop.eup %4530 }
 0x2f7   :  { %4538 = vpow2.f32 %v830_v18 }
 0x2f8   :  { %4540 = vpow2.f32 %v828_v54 }
 0x2f9   :  { %v5256_v58 = vpop.eup %4532 }
 0x2fa   :  { %852 = vadd.xlane.f32.xlu1 %v5254_v22  ;;  %854 = vadd.xlane.f32.xlu0 %v5256_v58  ;;  %v5260_v26 = vpop.eup %4534 }
 0x2fd   :  { %v5262_v61 = vpop.eup %4536 }
 0x2fe   :  { %856 = vadd.xlane.f32.xlu1 %v5260_v26  ;;  %858 = vadd.xlane.f32.xlu0 %v5262_v61 }
 0x301   :  { %v5266_v44 = vpop.eup %4538 }
 0x302   :  { %v5268_v62 = vpop.eup %4540  ;;  %862 = vadd.xlane.f32.xlu0 %v5266_v44 }
 0x303   :  { %860 = vadd.xlane.f32.xlu1 %v5268_v62 }
 0x36f   :  { %v833_v56 = vpop.xlane.xlu1 %832 }
 0x370   :  { %v864_v3 = vmax.f32 %v833_v56, 1e-20 }
 0x372   :  { %4542 = vrcp.f32 %v864_v3 }
 0x373   :  { %v835_v9 = vpop.xlane.xlu0 %834 }
 0x374   :  { %v865_v8 = vmax.f32 %v835_v9, 1e-20 }
 0x376   :  { %4544 = vrcp.f32 %v865_v8 }
 0x377   :  { %v839_v6 = vpop.xlane.xlu0 %838  ;;  %v837_v14 = vpop.xlane.xlu1 %836 }
 0x378   :  { %v867_v16 = vmax.f32 %v839_v6, 1e-20  ;;  %v866_v17 = vmax.f32 %v837_v14, 1e-20 }
 0x37a   :  { %4546 = vrcp.f32 %v867_v16 }
 0x37b   :  { %4548 = vrcp.f32 %v866_v17  ;;  %v841_v29 = vpop.xlane.xlu1 %840  ;;  %v843_v24 = vpop.xlane.xlu0 %842 }
 0x37c   :  { %v868_v27 = vmax.f32 %v841_v29, 1e-20  ;;  %v869_v33 = vmax.f32 %v843_v24, 1e-20  ;;  %v4543_v35 = vpop.eup %4542 }
 0x37d   :  { %v896_v4 = vmul.f32 %v4543_v35, %v5215_v41 }
 0x37e   :  { %4550 = vrcp.f32 %v868_v27 }
 0x37f   :  { %4552 = vrcp.f32 %v869_v33  ;;  %v845_v37 = vpop.xlane.xlu1 %844  ;;  %v847_v19 = vpop.xlane.xlu0 %846 }
 0x380   :  { %v4545_v50 = vpop.eup %4544  ;;  %v870_v39 = vmax.f32 %v845_v37, 1e-20  ;;  %v871_v40 = vmax.f32 %v847_v19, 1e-20 }
 0x381   :  { %v897_v42 = vmul.f32 %v4545_v50, %v5220_v7 }
 0x382   :  { %4554 = vrcp.f32 %v870_v39 }
 0x383   :  { %v5280_v43 = vpack.c.bf16 %v897_v42, %v896_v4  ;;  %4556 = vrcp.f32 %v871_v40  ;;  %v849_v53 = vpop.xlane.xlu1 %848  ;;  %v851_v54 = vpop.xlane.xlu0 %850 }
 0x384   :  { %v4547_v49 = vpop.eup %4546  ;;  %v872_v1 = vmax.f32 %v849_v53, 1e-20  ;;  %v873_v56 = vmax.f32 %v851_v54, 1e-20 }
 0x385   :  { %v4549_v18 = vpop.eup %4548  ;;  %v899_v0 = vmul.f32 %v4547_v49, %v5225_v21  ;;  %4049 = vmatprep.mubr.bf16.mxu0 %v5280_v43 }
 0x386   :  { %v898_v3 = vmul.f32 %v4549_v18, %v5227_v11  ;;  %4558 = vrcp.f32 %v872_v1 }
 0x387   :  { %4560 = vrcp.f32 %v873_v56  ;;  %v853_v41 = vpop.xlane.xlu1 %852  ;;  %v855_v7 = vpop.xlane.xlu0 %854 }
 0x388   :  { %v5285_v9 = vpack.c.bf16 %v899_v0, %v898_v3  ;;  %v4551_v8 = vpop.eup %4550  ;;  %v874_v6 = vmax.f32 %v853_v41, 1e-20  ;;  %v875_v14 = vmax.f32 %v855_v7, 1e-20 }
 0x389   :  { %v4553_v16 = vpop.eup %4552  ;;  %v900_v21 = vmul.f32 %v4551_v8, %v5233_v46 }
 0x38a   :  { %4050 = vmatmul.mubr.bf16.vlgmr.msra.gmra.mrb[16].mxu0 %v5285_v9  ;;  %4562 = vrcp.f32 %v874_v6  ;;  %v901_v17 = vmul.f32 %v4553_v16, %v5235_v38 }
 0x38b   :  { %4414 = vmatpush3.bf16.msra.mxu0 %v4411_v59  ;;  %4564 = vrcp.f32 %v875_v14  ;;  %v857_v11 = vpop.xlane.xlu1 %856  ;;  %v859_v29 = vpop.xlane.xlu0 %858 }
 0x38c   :  { %4415 = vmatprep.subr.bf16.mxu0 %v4798_v25  ;;  %v4555_v24 = vpop.eup %4554  ;;  %v876_v27 = vmax.f32 %v857_v11, 1e-20  ;;  %v877_v33 = vmax.f32 %v859_v29, 1e-20  ;;  %v5291_v35 = vpack.c.bf16 %v901_v17, %v900_v21 }
 0x38d   :  { %v4557_v50 = vpop.eup %4556  ;;  %v902_v37 = vmul.f32 %v4555_v24, %v5241_v2 }
 0x38e   :  { %4566 = vrcp.f32 %v876_v27  ;;  %4053 = vmatprep.mubr.bf16.mxu0 %v5291_v35  ;;  %v903_v46 = vmul.f32 %v4557_v50, %v5243_v47 }
 0x38f   :  { %4568 = vrcp.f32 %v877_v33  ;;  %v863_v59 = vpop.xlane.xlu0 %862 }
 0x390   :  { %v861_v38 = vpop.xlane.xlu1 %860  ;;  %v4559_v19 = vpop.eup %4558  ;;  %v879_v40 = vmax.f32 %v863_v59, 1e-20  ;;  %v5296_v4 = vpack.c.bf16 %v903_v46, %v902_v37 }
 0x391   :  { %v878_v39 = vmax.f32 %v861_v38, 1e-20  ;;  %v4561_v42 = vpop.eup %4560  ;;  %v904_v49 = vmul.f32 %v4559_v19, %v5248_v57 }
 0x392   :  { %4054 = vmatmul.mubr.bf16.gmra.mrb[20].mxu0 %v5296_v4  ;;  %v905_v2 = vmul.f32 %v4561_v42, %v5250_v30 }
 0x393   :  { %4570 = vrcp.f32 %v878_v39 }
 0x394   :  { %4572 = vrcp.f32 %v879_v40  ;;  %v4563_v53 = vpop.eup %4562  ;;  %v5301_v54 = vpack.c.bf16 %v905_v2, %v904_v49 }
 0x395   :  { %v4565_v47 = vpop.eup %4564  ;;  %v906_v18 = vmul.f32 %v4563_v53, %v5254_v22 }
 0x396   :  { %4057 = vmatprep.mubr.bf16.mxu0 %v5301_v54  ;;  %v907_v0 = vmul.f32 %v4565_v47, %v5256_v58 }
 0x398   :  { %v4567_v1 = vpop.eup %4566  ;;  %v5306_v56 = vpack.c.bf16 %v907_v0, %v906_v18 }
 0x399   :  { %v4569_v57 = vpop.eup %4568  ;;  %v908_v3 = vmul.f32 %v4567_v1, %v5260_v26  ;;  %v1323_v26 = vld [vmem:[%s6236_s8] sm:$0xff] }
 0x39a   :  { %4058 = vmatmul.mubr.bf16.gmra.mrb[24].mxu0 %v5306_v56  ;;  %v909_v30 = vmul.f32 %v4569_v57, %v5262_v61  ;;  %4093 = vmatprep.subr.mxu1 %v1323_v26  ;;  %v5325_v61 = vld [vmem:[%s6237_s5] ss:$0 sm:$0xff] }
 0x39b   :  { %4094 = vmatpush3.msra.mxu1 %v1323_v26 }
 0x39c   :  { %v5311_v7 = vpack.c.bf16 %v909_v30, %v908_v3 }
 0x39d   :  { %v4571_v41 = vpop.eup %4570 }
 0x39e   :  { %v4573_v8 = vpop.eup %4572  ;;  %v910_v22 = vmul.f32 %v4571_v41, %v5268_v62  ;;  %4061 = vmatprep.mubr.bf16.mxu0 %v5311_v7 }
 0x39f   :  { %v911_v58 = vmul.f32 %v4573_v8, %v5266_v44 }
 0x3a1   :  { %v5316_v6 = vpack.c.bf16 %v911_v58, %v910_v22 }
 0x3a3   :  { %4062 = vmatmul.mubr.bf16.gmra.mrb[28].mxu0 %v5316_v6 }
 0x45d   :  { %v4051_v62 = vpop.f32.mrb[16].mxu0 }
 0x45e   :  { %v5328_v14 = vadd.f32 %v4051_v62, %v5325_v61  ;;  %v969_v44 = vpop.f32.mrb[17].mxu0 }
 0x45f   :  { %v970_v16 = vadd.f32 %v5325_v61, %v969_v44  ;;  %v4052_v21 = vpop.f32.mrb[18].mxu0 }
 0x460   :  { %v1050_v17 = vmin.f32 %v5328_v14, 0.0  ;;  %v5333_v11 = vadd.f32 %v4052_v21, %v5325_v61  ;;  %v972_v29 = vpop.f32.mrb[19].mxu0  ;;  %vm1034_vm14 = vcmp.gt.f32.partialorder %v5328_v14, 0.0 }
 0x461   :  { %v1048_v24 = vmin.f32 %v970_v16, 0.0  ;;  %v973_v27 = vadd.f32 %v5325_v61, %v972_v29  ;;  %vm1032_vm12 = vcmp.gt.f32.partialorder %v970_v16, 0.0 }
 0x462   :  { %v1068_v33 = vmul.f32 1.442695, %v1050_v17  ;;  %v1051_v50 = vmin.f32 %v5333_v11, 0.0  ;;  %vm1035_vm15 = vcmp.gt.f32.partialorder %v5333_v11, 0.0 }
 0x463   :  { %v1064_v37 = vmul.f32 1.442695, %v1048_v24  ;;  %v1049_v46 = vmin.f32 %v973_v27, 0.0  ;;  %vm1033_vm13 = vcmp.gt.f32.partialorder %v973_v27, 0.0 }
 0x464   :  { %4574 = vpow2.f32 %v1068_v33  ;;  %v1070_v38 = vmul.f32 1.442695, %v1051_v50 }
 0x465   :  { %4576 = vpow2.f32 %v1064_v37  ;;  %v1066_v59 = vmul.f32 1.442695, %v1049_v46  ;;  %v4055_v19 = vpop.f32.mrb[20].mxu0 }
 0x466   :  { %v5338_v39 = vadd.f32 %v4055_v19, %v5325_v61  ;;  %v985_v40 = vpop.f32.mrb[21].mxu0 }
 0x467   :  { %4578 = vpow2.f32 %v1066_v59  ;;  %v5341_v42 = vadd.f32 %v5325_v61, %v985_v40  ;;  %v4056_v49 = vpop.f32.mrb[22].mxu0 }
 0x468   :  { %4580 = vpow2.f32 %v1070_v38  ;;  %v1054_v2 = vmin.f32 %v5338_v39, 0.0  ;;  %v5345_v53 = vadd.f32 %v4056_v49, %v5325_v61  ;;  %v988_v47 = vpop.f32.mrb[23].mxu0  ;;  %vm1038_vm5 = vcmp.gt.f32.partialorder %v5338_v39, 0.0 }
 0x469   :  { %v1052_v18 = vmin.f32 %v5341_v42, 0.0  ;;  %v5349_v0 = vadd.f32 %v5325_v61, %v988_v47  ;;  %vm1036_vm4 = vcmp.gt.f32.partialorder %v5341_v42, 0.0 }
 0x46a   :  { %v1076_v1 = vmul.f32 1.442695, %v1054_v2  ;;  %v1055_v57 = vmin.f32 %v5345_v53, 0.0  ;;  %vm1039_vm7 = vcmp.gt.f32.partialorder %v5345_v53, 0.0 }
 0x46b   :  { %v1072_v3 = vmul.f32 1.442695, %v1052_v18  ;;  %v1053_v30 = vmin.f32 %v5349_v0, 0.0  ;;  %vm1037_vm6 = vcmp.gt.f32.partialorder %v5349_v0, 0.0 }
 0x46c   :  { %4582 = vpow2.f32 %v1076_v1  ;;  %v1078_v41 = vmul.f32 1.442695, %v1055_v57 }
 0x46d   :  { %4584 = vpow2.f32 %v1072_v3  ;;  %v1074_v22 = vmul.f32 1.442695, %v1053_v30  ;;  %v4059_v58 = vpop.f32.mrb[24].mxu0 }
 0x46e   :  { %v4575_v8 = vpop.eup %4574  ;;  %v5354_v62 = vadd.f32 %v4059_v58, %v5325_v61  ;;  %v1001_v44 = vpop.f32.mrb[25].mxu0 }
 0x46f   :  { %v4577_v26 = vpop.eup %4576  ;;  %4586 = vpow2.f32 %v1074_v22  ;;  %v5357_v21 = vadd.f32 %v5325_v61, %v1001_v44  ;;  %v4060_v17 = vpop.f32.mrb[26].mxu0  ;;  %v3534_v46 = vadd.f32 -1.0, %v4575_v8 }
 0x470   :  { %v3532_v29 = vadd.f32 -1.0, %v4577_v26  ;;  %4588 = vpow2.f32 %v1078_v41  ;;  %v1058_v33 = vmin.f32 %v5354_v62, 0.0  ;;  %v5361_v50 = vadd.f32 %v4060_v17, %v5325_v61  ;;  %v1004_v37 = vpop.f32.mrb[27].mxu0 }
 0x471   :  { %v4579_v24 = vpop.eup %4578  ;;  %v1056_v19 = vmin.f32 %v5357_v21, 0.0  ;;  %v5365_v40 = vadd.f32 %v5325_v61, %v1004_v37  ;;  %v1114_v30 = vsel %vm1034_vm14, %v5328_v14, %v3534_v46  ;;  %vm1040_vm8 = vcmp.gt.f32.partialorder %v5357_v21, 0.0 }
 0x472   :  { %v4581_v38 = vpop.eup %4580  ;;  %v3533_v59 = vadd.f32 -1.0, %v4579_v24  ;;  %v1084_v49 = vmul.f32 1.442695, %v1058_v33  ;;  %v1059_v2 = vmin.f32 %v5361_v50, 0.0  ;;  %v1112_v47 = vsel %vm1032_vm12, %v970_v16, %v3532_v29 }
 0x473   :  { %v1080_v1 = vmul.f32 1.442695, %v1056_v19  ;;  %v1057_v57 = vmin.f32 %v5365_v40, 0.0  ;;  %4069 = vmatprep.mubr.msk.f32.mxu0 %vm320_vm1, %v1112_v47  ;;  %v3535_v41 = vadd.f32 -1.0, %v4581_v38  ;;  %vm1041_vm9 = vcmp.gt.f32.partialorder %v5365_v40, 0.0 }
 0x474   :  { %v1113_v18 = vsel %vm1033_vm13, %v973_v27, %v3533_v59  ;;  %4590 = vpow2.f32 %v1084_v49  ;;  %v1086_v3 = vmul.f32 1.442695, %v1059_v2  ;;  %vm1042_vm10 = vcmp.gt.f32.partialorder %v5354_v62, 0.0 }
 0x475   :  { %4070 = vmatmul.mubr.msk.f32.vlgmr.msra.gmra.mrb[32].mxu0 %vm320_vm1, %v1113_v18  ;;  %4592 = vpow2.f32 %v1080_v1  ;;  %v1082_v8 = vmul.f32 1.442695, %v1057_v57  ;;  %v1115_v14 = vsel %vm1035_vm15, %v5333_v11, %v3535_v41  ;;  %vm1043_vm11 = vcmp.gt.f32.partialorder %v5361_v50, 0.0 }
 0x476   :  { %v4063_v22 = vpop.f32.mrb[28].mxu0  ;;  %4072 = vmatprep.mubr.msk.f32.mxu0 %vm320_vm1, %v1114_v30  ;;  %v4583_v16 = vpop.eup %4582 }
 0x477   :  { %v5376_v27 = vadd.f32 %v4063_v22, %v5325_v61  ;;  %v1017_v58 = vpop.f32.mrb[29].mxu0  ;;  %v4585_v26 = vpop.eup %4584  ;;  %4594 = vpow2.f32 %v1082_v8  ;;  %v3538_v47 = vadd.f32 -1.0, %v4583_v16 }
 0x478   :  { %v5379_v44 = vadd.f32 %v5325_v61, %v1017_v58  ;;  %v4064_v17 = vpop.f32.mrb[30].mxu0  ;;  %4596 = vpow2.f32 %v1086_v3  ;;  %v3536_v37 = vadd.f32 -1.0, %v4585_v26 }
 0x479   :  { %v1062_v29 = vmin.f32 %v5376_v27, 0.0  ;;  %v5384_v24 = vadd.f32 %v4064_v17, %v5325_v61  ;;  %v1020_v33 = vpop.f32.mrb[31].mxu0  ;;  %4073 = vmatmul.mubr.msk.f32.gmra.mrb[34].mxu0 %vm320_vm1, %v1115_v14  ;;  %v4587_v46 = vpop.eup %4586  ;;  %vm1046_vm14 = vcmp.gt.f32.partialorder %v5376_v27, 0.0 }
 0x47a   :  { %v1060_v38 = vmin.f32 %v5379_v44, 0.0  ;;  %v1021_v59 = vadd.f32 %v5325_v61, %v1020_v33  ;;  %v4589_v19 = vpop.eup %4588  ;;  %v1116_v2 = vsel %vm1036_vm4, %v5341_v42, %v3536_v37  ;;  %v3537_v57 = vadd.f32 -1.0, %v4587_v46 }
 0x47b   :  { %v1092_v49 = vmul.f32 1.442695, %v1062_v29  ;;  %v1063_v11 = vmin.f32 %v5384_v24, 0.0  ;;  %4075 = vmatprep.mubr.msk.f32.mxu0 %vm320_vm1, %v1116_v2  ;;  %v3539_v41 = vadd.f32 -1.0, %v4589_v19  ;;  %v1118_v42 = vsel %vm1038_vm5, %v5338_v39, %v3538_v47 }
 0x47c   :  { %v1088_v18 = vmul.f32 1.442695, %v1060_v38  ;;  %v1061_v1 = vmin.f32 %v1021_v59, 0.0  ;;  %v1117_v30 = vsel %vm1037_vm6, %v5349_v0, %v3537_v57  ;;  %vm1044_vm12 = vcmp.gt.f32.partialorder %v5379_v44, 0.0 }
 0x47d   :  { %4598 = vpow2.f32 %v1092_v49  ;;  %v1094_v3 = vmul.f32 1.442695, %v1063_v11  ;;  %4076 = vmatmul.mubr.msk.f32.gmra.mrb[36].mxu0 %vm320_vm1, %v1117_v30  ;;  %v1119_v26 = vsel %vm1039_vm7, %v5345_v53, %v3539_v41  ;;  %vm1045_vm13 = vcmp.gt.f32.partialorder %v1021_v59, 0.0 }
 0x47e   :  { %4600 = vpow2.f32 %v1088_v18  ;;  %v1090_v61 = vmul.f32 1.442695, %v1061_v1  ;;  %v4591_v8 = vpop.eup %4590  ;;  %4078 = vmatprep.mubr.msk.f32.mxu0 %vm320_vm1, %v1118_v42  ;;  %vm1047_vm15 = vcmp.gt.f32.partialorder %v5384_v24, 0.0  ;;  %vm1324_vm4 = vcmask 64512  }
 0x47f   :  { %v4593_v22 = vpop.eup %4592  ;;  %v3542_v39 = vadd.f32 -1.0, %v4591_v8  ;;  %vm5428_vm5 = vmpackc.low %vm1324_vm4, %vm1324_vm4 }
 0x480   :  { %4602 = vpow2.f32 %v1090_v61  ;;  %v3540_v16 = vadd.f32 -1.0, %v4593_v22 }
 0x481   :  { %4604 = vpow2.f32 %v1094_v3  ;;  %v4595_v58 = vpop.eup %4594  ;;  %4079 = vmatmul.mubr.msk.f32.gmra.mrb[38].mxu0 %vm320_vm1, %v1119_v26  ;;  %v1122_v53 = vsel %vm1042_vm10, %v5354_v62, %v3542_v39 }
 0x482   :  { %v4597_v0 = vpop.eup %4596  ;;  %v1120_v17 = vsel %vm1040_vm8, %v5357_v21, %v3540_v16  ;;  %v3541_v14 = vadd.f32 -1.0, %v4595_v58 }
 0x483   :  { %4081 = vmatprep.mubr.msk.f32.mxu0 %vm320_vm1, %v1120_v17  ;;  %v3543_v33 = vadd.f32 -1.0, %v4597_v0 }
 0x484   :  { %v1121_v29 = vsel %vm1041_vm9, %v5365_v40, %v3541_v14 }
 0x485   :  { %4082 = vmatmul.mubr.msk.f32.gmra.mrb[40].mxu0 %vm320_vm1, %v1121_v29  ;;  %v1123_v19 = vsel %vm1043_vm11, %v5361_v50, %v3543_v33 }
 0x486   :  { %4084 = vmatprep.mubr.msk.f32.mxu0 %vm320_vm1, %v1122_v53 }
 0x487   :  { %v4599_v37 = vpop.eup %4598 }
 0x488   :  { %v4601_v46 = vpop.eup %4600  ;;  %v3546_v2 = vadd.f32 -1.0, %v4599_v37 }
 0x489   :  { %v3544_v21 = vadd.f32 -1.0, %v4601_v46  ;;  %4085 = vmatmul.mubr.msk.f32.gmra.mrb[42].mxu0 %vm320_vm1, %v1123_v19 }
 0x48a   :  { %v4603_v38 = vpop.eup %4602  ;;  %v1126_v18 = vsel %vm1046_vm14, %v5376_v27, %v3546_v2 }
 0x48b   :  { %v4605_v40 = vpop.eup %4604  ;;  %v1124_v49 = vsel %vm1044_vm12, %v5379_v44, %v3544_v21  ;;  %v3545_v11 = vadd.f32 -1.0, %v4603_v38  ;;  %v1518_v21 = vld [vmem:[%s6238_s7] sm:$0x1] }
 0x48c   :  { %4087 = vmatprep.mubr.msk.f32.mxu0 %vm320_vm1, %v1124_v49  ;;  %v3547_v47 = vadd.f32 -1.0, %v4605_v40 }
 0x48d   :  { %v1125_v62 = vsel %vm1045_vm13, %v1021_v59, %v3545_v11 }
 0x48e   :  { %4088 = vmatmul.mubr.msk.f32.gmra.mrb[44].mxu0 %vm320_vm1, %v1125_v62  ;;  %v1127_v50 = vsel %vm1047_vm15, %v5384_v24, %v3547_v47 }
 0x48f   :  { %4090 = vmatprep.mubr.msk.f32.mxu0 %vm320_vm1, %v1126_v18 }
 0x492   :  { %4091 = vmatmul.mubr.msk.f32.gmra.mrb[46].mxu0 %vm320_vm1, %v1127_v50 }
 0x493   :  { %4151 = vmatprep.mubr.msk.f32.mxu0 %vm4799_vm3, %v4800_v51 }
 0x548   :  { %v4071_v44 = vpop.f32.mrb[32].mxu0 }
 0x549   :  { %v1244_v59 = vpop.f32.mrb[33].mxu0 }
 0x54a   :  { %v4416_v27 = vpack.c.bf16 %v4071_v44, %v1244_v59  ;;  %4095 = vmatprep.mubr.msk.f32.mxu1 %vm1324_vm4, %v1244_v59 }
 0x54b   :  { %4096 = vmatmul.mubr.msk.f32.vlgmr.msra.gmra.mrb[18].mxu1 %vm1324_vm4, %v4071_v44 }
 0x54c   :  { %v4074_v24 = vpop.f32.mrb[34].mxu0  ;;  %4418 = vmatpush3.bf16.xpose.msk.msra.mxu0 %vm5428_vm5, %v4416_v27  ;;  %4154 = vmatprep.subr.bf16.mxu1 %v4416_v27 }
 0x54d   :  { %v1254_v57 = vpop.f32.mrb[35].mxu0  ;;  %4155 = vmatpush3.bf16.msra.mxu1 %v4416_v27  ;;  %4419 = vmatprep.subr.bf16.mxu0 %v4798_v25 }
 0x54e   :  { %v4420_v3 = vpack.c.bf16 %v4074_v24, %v1254_v57  ;;  %4098 = vmatprep.mubr.msk.f32.mxu1 %vm1324_vm4, %v1254_v57 }
 0x54f   :  { %4099 = vmatmul.mubr.msk.f32.gmra.mrb[20].mxu1 %vm1324_vm4, %v4074_v24 }
 0x550   :  { %4156 = vmatprep.subr.bf16.mxu1 %v4420_v3  ;;  %v4077_v61 = vpop.f32.mrb[36].mxu0 }
 0x551   :  { %4157 = vmatpush3.bf16.msra.mxu1 %v4420_v3  ;;  %v1264_v30 = vpop.f32.mrb[37].mxu0 }
 0x552   :  { %v4424_v41 = vpack.c.bf16 %v4077_v61, %v1264_v30  ;;  %4101 = vmatprep.mubr.msk.f32.mxu1 %vm1324_vm4, %v1264_v30 }
 0x553   :  { %4102 = vmatmul.mubr.msk.f32.gmra.mrb[22].mxu1 %vm1324_vm4, %v4077_v61 }
 0x554   :  { %4422 = vmatpush3.bf16.xpose.msk.msra.mxu0 %vm5428_vm5, %v4420_v3  ;;  %v4080_v8 = vpop.f32.mrb[38].mxu0  ;;  %4158 = vmatprep.subr.bf16.mxu1 %v4424_v41 }
 0x555   :  { %4423 = vmatprep.subr.bf16.mxu0 %v4798_v25  ;;  %v1274_v42 = vpop.f32.mrb[39].mxu0  ;;  %4159 = vmatpush3.bf16.msra.mxu1 %v4424_v41 }
 0x556   :  { %v4428_v22 = vpack.c.bf16 %v4080_v8, %v1274_v42  ;;  %4104 = vmatprep.mubr.msk.f32.mxu1 %vm1324_vm4, %v1274_v42 }
 0x557   :  { %4105 = vmatmul.mubr.msk.f32.gmra.mrb[24].mxu1 %vm1324_vm4, %v4080_v8 }
 0x558   :  { %v4083_v16 = vpop.f32.mrb[40].mxu0  ;;  %4160 = vmatprep.subr.bf16.mxu1 %v4428_v22 }
 0x559   :  { %v1284_v58 = vpop.f32.mrb[41].mxu0  ;;  %4161 = vmatpush3.bf16.msra.mxu1 %v4428_v22 }
 0x55a   :  { %v4432_v26 = vpack.c.bf16 %v4083_v16, %v1284_v58  ;;  %4107 = vmatprep.mubr.msk.f32.mxu1 %vm1324_vm4, %v1284_v58 }
 0x55b   :  { %4108 = vmatmul.mubr.msk.f32.gmra.mrb[26].mxu1 %vm1324_vm4, %v4083_v16 }
 0x55c   :  { %4426 = vmatpush3.bf16.xpose.msk.msra.mxu0 %vm5428_vm5, %v4424_v41  ;;  %v4086_v0 = vpop.f32.mrb[42].mxu0  ;;  %4162 = vmatprep.subr.bf16.mxu1 %v4432_v26 }
 0x55d   :  { %4427 = vmatprep.subr.bf16.mxu0 %v4798_v25  ;;  %v1294_v17 = vpop.f32.mrb[43].mxu0  ;;  %4163 = vmatpush3.bf16.msra.mxu1 %v4432_v26 }
 0x55e   :  { %v4436_v14 = vpack.c.bf16 %v4086_v0, %v1294_v17  ;;  %4110 = vmatprep.mubr.msk.f32.mxu1 %vm1324_vm4, %v1294_v17 }
 0x55f   :  { %4111 = vmatmul.mubr.msk.f32.gmra.mrb[28].mxu1 %vm1324_vm4, %v4086_v0 }
 0x560   :  { %4164 = vmatprep.subr.bf16.mxu1 %v4436_v14 }
 0x561   :  { %v4089_v39 = vpop.f32.mrb[44].mxu0  ;;  %4165 = vmatpush3.bf16.msra.mxu1 %v4436_v14 }
 0x562   :  { %v1304_v29 = vpop.f32.mrb[45].mxu0 }
 0x563   :  { %v4440_v33 = vpack.c.bf16 %v4089_v39, %v1304_v29  ;;  %4113 = vmatprep.mubr.msk.f32.mxu1 %vm1324_vm4, %v1304_v29 }
 0x564   :  { %4430 = vmatpush3.bf16.xpose.msk.msra.mxu0 %vm5428_vm5, %v4428_v22  ;;  %4114 = vmatmul.mubr.msk.f32.gmra.mrb[30].mxu1 %vm1324_vm4, %v4089_v39 }
 0x565   :  { %4431 = vmatprep.subr.bf16.mxu0 %v4798_v25  ;;  %v4092_v37 = vpop.f32.mrb[46].mxu0  ;;  %4166 = vmatprep.subr.bf16.mxu1 %v4440_v33 }
 0x566   :  { %v1314_v53 = vpop.f32.mrb[47].mxu0  ;;  %4167 = vmatpush3.bf16.msra.mxu1 %v4440_v33 }
 0x567   :  { %v4444_v46 = vpack.c.bf16 %v4092_v37, %v1314_v53  ;;  %4116 = vmatprep.mubr.msk.f32.mxu1 %vm1324_vm4, %v1314_v53 }
 0x568   :  { %4117 = vmatmul.mubr.msk.f32.gmra.mrb[32].mxu1 %vm1324_vm4, %v4092_v37 }
 0x569   :  { %4168 = vmatprep.subr.bf16.mxu1 %v4444_v46 }
 0x56a   :  { %4169 = vmatpush3.bf16.msra.mxu1 %v4444_v46 }
 0x56c   :  { %4434 = vmatpush3.bf16.xpose.msk.msra.mxu0 %vm5428_vm5, %v4432_v26 }
 0x56d   :  { %4435 = vmatprep.subr.bf16.mxu0 %v4798_v25 }
 0x574   :  { %4438 = vmatpush3.bf16.xpose.msk.msra.mxu0 %vm5428_vm5, %v4436_v14 }
 0x575   :  { %4439 = vmatprep.subr.bf16.mxu0 %v4798_v25 }
 0x57c   :  { %4442 = vmatpush3.bf16.xpose.msk.msra.mxu0 %vm5428_vm5, %v4440_v33 }
 0x57d   :  { %4443 = vmatprep.subr.bf16.mxu0 %v4798_v25 }
 0x584   :  { %4446 = vmatpush3.bf16.xpose.msk.msra.mxu0 %vm5428_vm5, %v4444_v46 }
 0x58b   :  { %4152 = vmatmul.mubr.msk.f32.vlgmr.msra.gmra.mrb[48].mxu0 %vm1324_vm4, %v1518_v21 }
 0x61e   :  { %v4097_v38 = vpop.f32.mrb[18].mxu1 }
 0x61f   :  { %1599 = vperm.xlu0 %4508, %v4097_v38   ;;  %v1439_v19 = vpop.f32.mrb[19].mxu1 }
 0x620   :  { %1594 = vperm.xlu1 %4509, %v1439_v19  }
 0x622   :  { %v4100_v40 = vpop.f32.mrb[20].mxu1 }
 0x623   :  { %v1449_v49 = vpop.f32.mrb[21].mxu1 }
 0x624   :  { %1609 = vperm.xlu1 %4509, %v4100_v40  }
 0x626   :  { %v4103_v11 = vpop.f32.mrb[22].mxu1 }
 0x627   :  { %v1459_v2 = vpop.f32.mrb[23].mxu1 }
 0x628   :  { %1604 = vperm.xlu1 %4509, %v1449_v49   ;;  %1614 = vperm.xlu0 %4508, %v1459_v2  }
 0x62a   :  { %v4106_v62 = vpop.f32.mrb[24].mxu1 }
 0x62b   :  { %v1469_v47 = vpop.f32.mrb[25].mxu1 }
 0x62c   :  { %1619 = vperm.xlu1 %4509, %v4103_v11   ;;  %1624 = vperm.xlu0 %4508, %v1469_v47  }
 0x62e   :  { %v4109_v18 = vpop.f32.mrb[26].mxu1 }
 0x62f   :  { %v1479_v50 = vpop.f32.mrb[27].mxu1 }
 0x630   :  { %1629 = vperm.xlu1 %4509, %v4106_v62   ;;  %1634 = vperm.xlu0 %4508, %v1479_v50  }
 0x632   :  { %v4112_v44 = vpop.f32.mrb[28].mxu1 }
 0x633   :  { %v1489_v59 = vpop.f32.mrb[29].mxu1 }
 0x634   :  { %1639 = vperm.xlu1 %4509, %v4109_v18   ;;  %1644 = vperm.xlu0 %4508, %v1489_v59  }
 0x637   :  { %v4115_v1 = vpop.f32.mrb[30].mxu1 }
 0x638   :  { %1649 = vperm.xlu1 %4509, %v4112_v44   ;;  %v1499_v27 = vpop.f32.mrb[31].mxu1 }
 0x639   :  { %1654 = vperm.xlu0 %4508, %v1499_v27  }
 0x63b   :  { %v4118_v24 = vpop.f32.mrb[32].mxu1 }
 0x63c   :  { %1659 = vperm.xlu1 %4509, %v4115_v1   ;;  %v1509_v57 = vpop.f32.mrb[33].mxu1 }
 0x63d   :  { %1664 = vperm.xlu0 %4508, %v1509_v57  }
 0x640   :  { %1669 = vperm.xlu1 %4509, %v4118_v24  }
 0x65e   :  { %v1588_v3 = vpop.f32.mrb[48].mxu0 }
 0x65f   :  { %v4153_v61 = vpop.f32.mrb[49].mxu0  ;;  %v5476_v30 = vrot.slane %v1588_v3, %v5027_v10 }
 0x69e   :  { %v1600_v41 = vpop.permute.xlu0 %1599 }
 0x69f   :  { %v1677_v8 = vadd.f32 %v5476_v30, %v1600_v41  ;;  %v1595_v42 = vpop.permute.xlu1 %1594 }
 0x6a0   :  { %v1676_v22 = vadd.f32 %v5476_v30, %v1595_v42 }
 0x6a1   :  { %v1709_v16 = vmul.f32 0.2, %v1677_v8  ;;  %vm1693_vm6 = vcmp.gt.f32.partialorder %v1677_v8, 0.0 }
 0x6a2   :  { %v1708_v58 = vmul.f32 0.2, %v1676_v22  ;;  %vm1692_vm7 = vcmp.gt.f32.partialorder %v1676_v22, 0.0 }
 0x6a3   :  { %v1610_v26 = vpop.permute.xlu1 %1609  ;;  %v1725_v0 = vsel %vm1693_vm6, %v1677_v8, %v1709_v16 }
 0x6a4   :  { %v1679_v17 = vadd.f32 %v5476_v30, %v1610_v26  ;;  %v5482_v14 = vadd.f32 %v1725_v0, %v5060_v34  ;;  %v1724_v39 = vsel %vm1692_vm7, %v1676_v22, %v1708_v58 }
 0x6a5   :  { %v5485_v29 = vadd.f32 %v1724_v39, %v5043_v20 }
 0x6a6   :  { %v1711_v33 = vmul.f32 0.2, %v1679_v17  ;;  %1758 = vmax.xlane.f32.xlu1 %v5482_v14  ;;  %vm1695_vm8 = vcmp.gt.f32.partialorder %v1679_v17, 0.0 }
 0x6a7   :  { %v1605_v37 = vpop.permute.xlu1 %1604  ;;  %1756 = vmax.xlane.f32.xlu0 %v5485_v29  ;;  %v1615_v21 = vpop.permute.xlu0 %1614 }
 0x6a8   :  { %v1678_v53 = vadd.f32 %v5476_v30, %v1605_v37  ;;  %v1727_v46 = vsel %vm1695_vm8, %v1679_v17, %v1711_v33  ;;  %v1680_v40 = vadd.f32 %v5476_v30, %v1615_v21 }
 0x6a9   :  { %v5491_v38 = vadd.f32 %v1727_v46, %v5057_v31 }
 0x6aa   :  { %v1710_v19 = vmul.f32 0.2, %v1678_v53  ;;  %vm1694_vm9 = vcmp.gt.f32.partialorder %v1678_v53, 0.0  ;;  %v1712_v11 = vmul.f32 0.2, %v1680_v40  ;;  %vm1696_vm10 = vcmp.gt.f32.partialorder %v1680_v40, 0.0 }
 0x6ab   :  { %v1620_v49 = vpop.permute.xlu1 %1619  ;;  %1762 = vmax.xlane.f32.xlu0 %v5491_v38  ;;  %v1625_v47 = vpop.permute.xlu0 %1624 }
 0x6ac   :  { %v1681_v2 = vadd.f32 %v5476_v30, %v1620_v49  ;;  %v1726_v62 = vsel %vm1694_vm9, %v1678_v53, %v1710_v19  ;;  %v1682_v44 = vadd.f32 %v5476_v30, %v1625_v47  ;;  %v1728_v59 = vsel %vm1696_vm10, %v1680_v40, %v1712_v11 }
 0x6ad   :  { %v5497_v18 = vadd.f32 %v1726_v62, %v5078_v45  ;;  %v5501_v27 = vadd.f32 %v1728_v59, %v5081_v48 }
 0x6ae   :  { %v1713_v50 = vmul.f32 0.2, %v1681_v2  ;;  %vm1697_vm11 = vcmp.gt.f32.partialorder %v1681_v2, 0.0  ;;  %v1714_v24 = vmul.f32 0.2, %v1682_v44  ;;  %vm1698_vm12 = vcmp.gt.f32.partialorder %v1682_v44, 0.0 }
 0x6af   :  { %v1630_v1 = vpop.permute.xlu1 %1629  ;;  %1760 = vmax.xlane.f32.xlu0 %v5497_v18  ;;  %v1635_v61 = vpop.permute.xlu0 %1634  ;;  %1764 = vmax.xlane.f32.xlu1 %v5501_v27 }
 0x6b0   :  { %v1683_v57 = vadd.f32 %v5476_v30, %v1630_v1  ;;  %v1729_v3 = vsel %vm1697_vm11, %v1681_v2, %v1713_v50  ;;  %v1684_v42 = vadd.f32 %v5476_v30, %v1635_v61  ;;  %v1730_v22 = vsel %vm1698_vm12, %v1682_v44, %v1714_v24 }
 0x6b1   :  { %v5507_v41 = vadd.f32 %v1729_v3, %v5100_v60  ;;  %v5511_v58 = vadd.f32 %v1730_v22, %v5103_v63 }
 0x6b2   :  { %v1715_v8 = vmul.f32 0.2, %v1683_v57  ;;  %vm1699_vm13 = vcmp.gt.f32.partialorder %v1683_v57, 0.0  ;;  %v1716_v26 = vmul.f32 0.2, %v1684_v42  ;;  %vm1700_vm14 = vcmp.gt.f32.partialorder %v1684_v42, 0.0 }
 0x6b3   :  { %v1640_v16 = vpop.permute.xlu1 %1639  ;;  %1766 = vmax.xlane.f32.xlu0 %v5507_v41  ;;  %v1645_v39 = vpop.permute.xlu0 %1644  ;;  %1768 = vmax.xlane.f32.xlu1 %v5511_v58 }
 0x6b4   :  { %v1685_v0 = vadd.f32 %v5476_v30, %v1640_v16  ;;  %v1731_v17 = vsel %vm1699_vm13, %v1683_v57, %v1715_v8  ;;  %v1686_v53 = vadd.f32 %v5476_v30, %v1645_v39  ;;  %v1732_v46 = vsel %vm1700_vm14, %v1684_v42, %v1716_v26 }
 0x6b5   :  { %v5517_v33 = vadd.f32 %v1731_v17, %v5122_v12  ;;  %v5521_v19 = vadd.f32 %v1732_v46, %v5125_v15 }
 0x6b6   :  { %v1717_v37 = vmul.f32 0.2, %v1685_v0  ;;  %vm1701_vm15 = vcmp.gt.f32.partialorder %v1685_v0, 0.0  ;;  %v1718_v40 = vmul.f32 0.2, %v1686_v53  ;;  %vm1702_vm5 = vcmp.gt.f32.partialorder %v1686_v53, 0.0 }
 0x6b7   :  { %v1650_v21 = vpop.permute.xlu1 %1649  ;;  %1770 = vmax.xlane.f32.xlu0 %v5517_v33  ;;  %1772 = vmax.xlane.f32.xlu1 %v5521_v19 }
 0x6b8   :  { %v1687_v49 = vadd.f32 %v5476_v30, %v1650_v21  ;;  %v1733_v11 = vsel %vm1701_vm15, %v1685_v0, %v1717_v37  ;;  %v1655_v2 = vpop.permute.xlu0 %1654  ;;  %v1734_v44 = vsel %vm1702_vm5, %v1686_v53, %v1718_v40 }
 0x6b9   :  { %v5527_v62 = vadd.f32 %v1733_v11, %v5144_v32  ;;  %v1688_v50 = vadd.f32 %v5476_v30, %v1655_v2  ;;  %v5531_v1 = vadd.f32 %v1734_v44, %v5147_v36 }
 0x6ba   :  { %v1719_v47 = vmul.f32 0.2, %v1687_v49  ;;  %vm1703_vm6 = vcmp.gt.f32.partialorder %v1687_v49, 0.0 }
 0x6bb   :  { %v1660_v59 = vpop.permute.xlu1 %1659  ;;  %1774 = vmax.xlane.f32.xlu0 %v5527_v62  ;;  %v1720_v24 = vmul.f32 0.2, %v1688_v50  ;;  %vm1704_vm7 = vcmp.gt.f32.partialorder %v1688_v50, 0.0  ;;  %1776 = vmax.xlane.f32.xlu1 %v5531_v1 }
 0x6bc   :  { %v1689_v57 = vadd.f32 %v5476_v30, %v1660_v59  ;;  %v1735_v3 = vsel %vm1703_vm6, %v1687_v49, %v1719_v47  ;;  %v1665_v61 = vpop.permute.xlu0 %1664 }
 0x6bd   :  { %v5537_v8 = vadd.f32 %v1735_v3, %v5166_v52  ;;  %v1690_v22 = vadd.f32 %v5476_v30, %v1665_v61  ;;  %v1736_v16 = vsel %vm1704_vm7, %v1688_v50, %v1720_v24 }
 0x6be   :  { %v1721_v42 = vmul.f32 0.2, %v1689_v57  ;;  %vm1705_vm8 = vcmp.gt.f32.partialorder %v1689_v57, 0.0  ;;  %v5541_v26 = vadd.f32 %v1736_v16, %v5169_v55 }
 0x6bf   :  { %v1670_v0 = vpop.permute.xlu1 %1669  ;;  %1778 = vmax.xlane.f32.xlu0 %v5537_v8  ;;  %v1722_v17 = vmul.f32 0.2, %v1690_v22  ;;  %vm1706_vm9 = vcmp.gt.f32.partialorder %v1690_v22, 0.0 }
 0x6c0   :  { %v1691_v39 = vadd.f32 %v5476_v30, %v1670_v0  ;;  %v1737_v37 = vsel %vm1705_vm8, %v1689_v57, %v1721_v42  ;;  %1780 = vmax.xlane.f32.xlu1 %v5541_v26 }
 0x6c1   :  { %v5547_v53 = vadd.f32 %v1737_v37, %v5185_v5  ;;  %v1738_v21 = vsel %vm1706_vm9, %v1690_v22, %v1722_v17 }
 0x6c2   :  { %v1723_v46 = vmul.f32 0.2, %v1691_v39  ;;  %vm1707_vm10 = vcmp.gt.f32.partialorder %v1691_v39, 0.0  ;;  %v5551_v40 = vadd.f32 %v1738_v21, %v5188_v13 }
 0x6c3   :  { %1782 = vmax.xlane.f32.xlu0 %v5547_v53 }
 0x6c4   :  { %v1739_v49 = vsel %vm1707_vm10, %v1691_v39, %v1723_v46  ;;  %1784 = vmax.xlane.f32.xlu1 %v5551_v40 }
 0x6c5   :  { %v5555_v30 = vadd.f32 %v1739_v49, %v5200_v23 }
 0x6c7   :  { %1786 = vmax.xlane.f32.xlu0 %v5555_v30 }
 0x733   :  { %v1759_v11 = vpop.xlane.xlu1 %1758 }
 0x734   :  { %v1789_v2 = vsub.f32 %v5482_v14, %v1759_v11  ;;  %v1757_v47 = vpop.xlane.xlu0 %1756 }
 0x735   :  { %v1788_v50 = vsub.f32 %v5485_v29, %v1757_v47 }
 0x736   :  { %v1806_v44 = vmul.f32 1.442695, %v1789_v2 }
 0x737   :  { %v1804_v59 = vmul.f32 1.442695, %v1788_v50 }
 0x738   :  { %4606 = vpow2.f32 %v1806_v44  ;;  %v1763_v24 = vpop.xlane.xlu0 %1762 }
 0x739   :  { %4608 = vpow2.f32 %v1804_v59  ;;  %v1791_v57 = vsub.f32 %v5491_v38, %v1763_v24 }
 0x73b   :  { %v1810_v3 = vmul.f32 1.442695, %v1791_v57 }
 0x73c   :  { %v1761_v61 = vpop.xlane.xlu0 %1760  ;;  %v1765_v22 = vpop.xlane.xlu1 %1764 }
 0x73d   :  { %4610 = vpow2.f32 %v1810_v3  ;;  %v1790_v42 = vsub.f32 %v5497_v18, %v1761_v61  ;;  %v1792_v16 = vsub.f32 %v5501_v27, %v1765_v22 }
 0x73f   :  { %v1808_v0 = vmul.f32 1.442695, %v1790_v42  ;;  %v1812_v17 = vmul.f32 1.442695, %v1792_v16 }
 0x740   :  { %v1767_v14 = vpop.xlane.xlu0 %1766  ;;  %v1769_v37 = vpop.xlane.xlu1 %1768 }
 0x741   :  { %4612 = vpow2.f32 %v1808_v0  ;;  %v1793_v29 = vsub.f32 %v5507_v41, %v1767_v14  ;;  %v1794_v38 = vsub.f32 %v5511_v58, %v1769_v37 }
 0x742   :  { %v5564_v39 = vpop.eup %4606  ;;  %4614 = vpow2.f32 %v1812_v17 }
 0x743   :  { %v5566_v46 = vpop.eup %4608  ;;  %v1814_v21 = vmul.f32 1.442695, %v1793_v29  ;;  %1838 = vadd.xlane.f32.xlu0 %v5564_v39  ;;  %v1816_v27 = vmul.f32 1.442695, %v1794_v38 }
 0x744   :  { %1836 = vadd.xlane.f32.xlu1 %v5566_v46  ;;  %v1771_v18 = vpop.xlane.xlu0 %1770  ;;  %v1773_v11 = vpop.xlane.xlu1 %1772 }
 0x745   :  { %4616 = vpow2.f32 %v1814_v21  ;;  %v1795_v49 = vsub.f32 %v5517_v33, %v1771_v18  ;;  %v1796_v2 = vsub.f32 %v5521_v19, %v1773_v11 }
 0x746   :  { %4618 = vpow2.f32 %v1816_v27 }
 0x747   :  { %v5572_v41 = vpop.eup %4610  ;;  %v1818_v47 = vmul.f32 1.442695, %v1795_v49  ;;  %v1820_v50 = vmul.f32 1.442695, %v1796_v2 }
 0x748   :  { %1842 = vadd.xlane.f32.xlu0 %v5572_v41  ;;  %v1775_v58 = vpop.xlane.xlu0 %1774  ;;  %v1777_v59 = vpop.xlane.xlu1 %1776 }
 0x749   :  { %4620 = vpow2.f32 %v1818_v47  ;;  %v1797_v44 = vsub.f32 %v5527_v62, %v1775_v58  ;;  %v1798_v57 = vsub.f32 %v5531_v1, %v1777_v59 }
 0x74a   :  { %4622 = vpow2.f32 %v1820_v50 }
 0x74b   :  { %v5577_v24 = vpop.eup %4612  ;;  %v1822_v33 = vmul.f32 1.442695, %v1797_v44  ;;  %v1824_v19 = vmul.f32 1.442695, %v1798_v57  ;;  %v2052_v44 = vld [vmem:[%s6239_s10] sm:$0xff] }
 0x74c   :  { %1840 = vadd.xlane.f32.xlu1 %v5577_v24  ;;  %v1779_v3 = vpop.xlane.xlu0 %1778  ;;  %v5582_v42 = vpop.eup %4614  ;;  %4186 = vmatprep.subr.mxu1 %v2052_v44 }
 0x74d   :  { %4624 = vpow2.f32 %v1822_v33  ;;  %v1799_v61 = vsub.f32 %v5537_v8, %v1779_v3  ;;  %v1781_v22 = vpop.xlane.xlu1 %1780 }
 0x74e   :  { %v1800_v62 = vsub.f32 %v5541_v26, %v1781_v22  ;;  %4626 = vpow2.f32 %v1824_v19 }
 0x74f   :  { %v5584_v16 = vpop.eup %4616  ;;  %v1826_v0 = vmul.f32 1.442695, %v1799_v61 }
 0x750   :  { %1844 = vadd.xlane.f32.xlu1 %v5582_v42  ;;  %1846 = vadd.xlane.f32.xlu0 %v5584_v16  ;;  %v1783_v1 = vpop.xlane.xlu0 %1782  ;;  %v1828_v14 = vmul.f32 1.442695, %v1800_v62  ;;  %v5590_v29 = vpop.eup %4618 }
 0x751   :  { %4628 = vpow2.f32 %v1826_v0  ;;  %v1801_v17 = vsub.f32 %v5547_v53, %v1783_v1  ;;  %v1785_v8 = vpop.xlane.xlu1 %1784 }
 0x752   :  { %v1802_v38 = vsub.f32 %v5551_v40, %v1785_v8  ;;  %4630 = vpow2.f32 %v1828_v14 }
 0x753   :  { %v5592_v37 = vpop.eup %4620  ;;  %v1830_v21 = vmul.f32 1.442695, %v1801_v17 }
 0x754   :  { %1848 = vadd.xlane.f32.xlu1 %v5590_v29  ;;  %1850 = vadd.xlane.f32.xlu0 %v5592_v37  ;;  %v1787_v26 = vpop.xlane.xlu0 %1786  ;;  %v1832_v18 = vmul.f32 1.442695, %v1802_v38  ;;  %v5598_v49 = vpop.eup %4622 }
 0x755   :  { %4632 = vpow2.f32 %v1830_v21  ;;  %v1803_v27 = vsub.f32 %v5555_v30, %v1787_v26 }
 0x756   :  { %4634 = vpow2.f32 %v1832_v18 }
 0x757   :  { %v5600_v53 = vpop.eup %4624  ;;  %v1834_v11 = vmul.f32 1.442695, %v1803_v27 }
 0x758   :  { %1852 = vadd.xlane.f32.xlu1 %v5598_v49  ;;  %1854 = vadd.xlane.f32.xlu0 %v5600_v53  ;;  %v5604_v40 = vpop.eup %4626 }
 0x759   :  { %4636 = vpow2.f32 %v1834_v11 }
 0x75b   :  { %v5606_v2 = vpop.eup %4628 }
 0x75c   :  { %1856 = vadd.xlane.f32.xlu1 %v5604_v40  ;;  %1858 = vadd.xlane.f32.xlu0 %v5606_v2  ;;  %v5610_v30 = vpop.eup %4630 }
 0x75f   :  { %v5612_v47 = vpop.eup %4632 }
 0x760   :  { %1860 = vadd.xlane.f32.xlu1 %v5610_v30  ;;  %1862 = vadd.xlane.f32.xlu0 %v5612_v47  ;;  %v5616_v58 = vpop.eup %4634 }
 0x763   :  { %v5618_v50 = vpop.eup %4636 }
 0x764   :  { %1864 = vadd.xlane.f32.xlu1 %v5616_v58  ;;  %1866 = vadd.xlane.f32.xlu0 %v5618_v50 }
 0x7d0   :  { %v1839_v59 = vpop.xlane.xlu0 %1838 }
 0x7d1   :  { %v1869_v57 = vmax.f32 %v1839_v59, 1e-20  ;;  %v1837_v33 = vpop.xlane.xlu1 %1836 }
 0x7d2   :  { %v1868_v3 = vmax.f32 %v1837_v33, 1e-20 }
 0x7d3   :  { %4638 = vrcp.f32 %v1869_v57 }
 0x7d4   :  { %4640 = vrcp.f32 %v1868_v3 }
 0x7d5   :  { %v1843_v19 = vpop.xlane.xlu0 %1842 }
 0x7d6   :  { %v1871_v61 = vmax.f32 %v1843_v19, 1e-20 }
 0x7d8   :  { %4642 = vrcp.f32 %v1871_v61 }
 0x7d9   :  { %v1841_v22 = vpop.xlane.xlu1 %1840 }
 0x7da   :  { %v1870_v62 = vmax.f32 %v1841_v22, 1e-20 }
 0x7dc   :  { %4644 = vrcp.f32 %v1870_v62 }
 0x7dd   :  { %v4639_v0 = vpop.eup %4638  ;;  %v1845_v1 = vpop.xlane.xlu1 %1844 }
 0x7de   :  { %v1847_v14 = vpop.xlane.xlu0 %1846  ;;  %v4641_v17 = vpop.eup %4640  ;;  %v1872_v8 = vmax.f32 %v1845_v1, 1e-20  ;;  %v1901_v21 = vmul.f32 %v4639_v0, %v5564_v39 }
 0x7df   :  { %v1873_v38 = vmax.f32 %v1847_v14, 1e-20  ;;  %v1900_v26 = vmul.f32 %v4641_v17, %v5566_v46 }
 0x7e0   :  { %4646 = vrcp.f32 %v1872_v8 }
 0x7e1   :  { %4648 = vrcp.f32 %v1873_v38  ;;  %v1849_v18 = vpop.xlane.xlu1 %1848  ;;  %v1916_v11 = vpack.c.bf16 %v1901_v21, %v1900_v26 }
 0x7e2   :  { %v1851_v27 = vpop.xlane.xlu0 %1850  ;;  %v1874_v59 = vmax.f32 %v1849_v18, 1e-20  ;;  %v4643_v33 = vpop.eup %4642 }
 0x7e3   :  { %v1875_v57 = vmax.f32 %v1851_v27, 1e-20  ;;  %4170 = vmatprep.mubr.bf16.mxu1 %v1916_v11  ;;  %v1903_v39 = vmul.f32 %v4643_v33, %v5572_v41 }
 0x7e4   :  { %4650 = vrcp.f32 %v1874_v59 }
 0x7e5   :  { %4652 = vrcp.f32 %v1875_v57  ;;  %v1853_v3 = vpop.xlane.xlu1 %1852 }
 0x7e6   :  { %v1855_v19 = vpop.xlane.xlu0 %1854  ;;  %v4645_v61 = vpop.eup %4644  ;;  %v1876_v22 = vmax.f32 %v1853_v3, 1e-20 }
 0x7e7   :  { %v1877_v62 = vmax.f32 %v1855_v19, 1e-20  ;;  %v1902_v46 = vmul.f32 %v4645_v61, %v5577_v24 }
 0x7e8   :  { %4654 = vrcp.f32 %v1876_v22 }
 0x7e9   :  { %4656 = vrcp.f32 %v1877_v62  ;;  %v1857_v0 = vpop.xlane.xlu1 %1856  ;;  %v1917_v14 = vpack.c.bf16 %v1903_v39, %v1902_v46 }
 0x7ea   :  { %v1859_v1 = vpop.xlane.xlu0 %1858  ;;  %v4647_v17 = vpop.eup %4646  ;;  %v1878_v8 = vmax.f32 %v1857_v0, 1e-20 }
 0x7eb   :  { %v1879_v38 = vmax.f32 %v1859_v1, 1e-20  ;;  %v4649_v21 = vpop.eup %4648  ;;  %4171 = vmatmul.mubr.bf16.vlgmr.msra.gmra.mrb[36].mxu1 %v1917_v14  ;;  %v1904_v26 = vmul.f32 %v4647_v17, %v5582_v42 }
 0x7ec   :  { %4658 = vrcp.f32 %v1878_v8  ;;  %v1905_v18 = vmul.f32 %v4649_v21, %v5584_v16  ;;  %4187 = vmatpush3.msra.mxu1 %v2052_v44 }
 0x7ed   :  { %4660 = vrcp.f32 %v1879_v38  ;;  %v1861_v41 = vpop.xlane.xlu1 %1860  ;;  %4451 = vmatprep.subr.bf16.mxu1 %v4798_v25 }
 0x7ee   :  { %v1863_v27 = vpop.xlane.xlu0 %1862  ;;  %v4651_v24 = vpop.eup %4650  ;;  %v1880_v11 = vmax.f32 %v1861_v41, 1e-20  ;;  %v1918_v57 = vpack.c.bf16 %v1905_v18, %v1904_v26 }
 0x7ef   :  { %v1881_v59 = vmax.f32 %v1863_v27, 1e-20  ;;  %v4653_v33 = vpop.eup %4652  ;;  %v1906_v3 = vmul.f32 %v4651_v24, %v5590_v29 }
 0x7f0   :  { %4662 = vrcp.f32 %v1880_v11  ;;  %4174 = vmatprep.mubr.bf16.mxu1 %v1918_v57  ;;  %v1907_v42 = vmul.f32 %v4653_v33, %v5592_v37 }
 0x7f1   :  { %4664 = vrcp.f32 %v1881_v59  ;;  %v1865_v19 = vpop.xlane.xlu1 %1864 }
 0x7f2   :  { %v1867_v16 = vpop.xlane.xlu0 %1866  ;;  %v4655_v44 = vpop.eup %4654  ;;  %v1882_v61 = vmax.f32 %v1865_v19, 1e-20  ;;  %v1919_v62 = vpack.c.bf16 %v1907_v42, %v1906_v3 }
 0x7f3   :  { %v1883_v22 = vmax.f32 %v1867_v16, 1e-20  ;;  %v4657_v39 = vpop.eup %4656  ;;  %v1908_v46 = vmul.f32 %v4655_v44, %v5598_v49 }
 0x7f4   :  { %4666 = vrcp.f32 %v1882_v61  ;;  %4175 = vmatmul.mubr.bf16.gmra.mrb[40].mxu1 %v1919_v62  ;;  %v1909_v0 = vmul.f32 %v4657_v39, %v5600_v53 }
 0x7f5   :  { %4668 = vrcp.f32 %v1883_v22 }
 0x7f6   :  { %v4659_v29 = vpop.eup %4658  ;;  %v1920_v1 = vpack.c.bf16 %v1909_v0, %v1908_v46 }
 0x7f7   :  { %v4661_v14 = vpop.eup %4660  ;;  %v1910_v37 = vmul.f32 %v4659_v29, %v5604_v40 }
 0x7f8   :  { %4178 = vmatprep.mubr.bf16.mxu1 %v1920_v1  ;;  %v1911_v17 = vmul.f32 %v4661_v14, %v5606_v2  ;;  %v2246_v2 = vld [vmem:[%s6240_s12] sm:$0xff] }
 0x7fa   :  { %v4663_v8 = vpop.eup %4662  ;;  %v1921_v38 = vpack.c.bf16 %v1911_v17, %v1910_v37 }
 0x7fb   :  { %v4665_v21 = vpop.eup %4664  ;;  %v1912_v26 = vmul.f32 %v4663_v8, %v5610_v30  ;;  %v2247_v30 = vld [vmem:[%s6240_s12 + $0x8] sm:$0xff] }
 0x7fc   :  { %4179 = vmatmul.mubr.bf16.gmra.mrb[44].mxu1 %v1921_v38  ;;  %v1913_v49 = vmul.f32 %v4665_v21, %v5612_v47  ;;  %v4447_v11 = vpack.c.bf16 %v2247_v30, %v2246_v2  ;;  %v3597_v47 = vld [vmem:[%s6241_s9] ss:$0 sm:$0xff] }
 0x7fe   :  { %v4667_v18 = vpop.eup %4666  ;;  %v1922_v41 = vpack.c.bf16 %v1913_v49, %v1912_v26  ;;  %4448 = vmatprep.subr.bf16.mxu0 %v4447_v11 }
 0x7ff   :  { %v4669_v53 = vpop.eup %4668  ;;  %v1914_v27 = vmul.f32 %v4667_v18, %v5616_v58  ;;  %4450 = vmatpush3.bf16.msra.mxu0 %v4447_v11 }
 0x800   :  { %4182 = vmatprep.mubr.bf16.mxu1 %v1922_v41  ;;  %v1915_v24 = vmul.f32 %v4669_v53, %v5618_v50 }
 0x802   :  { %v1923_v40 = vpack.c.bf16 %v1915_v24, %v1914_v27 }
 0x804   :  { %4183 = vmatmul.mubr.bf16.gmra.mrb[48].mxu1 %v1923_v40 }
 0x8be   :  { %v4172_v58 = vpop.f32.mrb[36].mxu1 }
 0x8bf   :  { %v1982_v59 = vadd.f32 %v4172_v58, %v3597_v47  ;;  %v1973_v50 = vpop.f32.mrb[37].mxu1 }
 0x8c0   :  { %v1974_v57 = vadd.f32 %v3597_v47, %v1973_v50  ;;  %v4173_v33 = vpop.f32.mrb[38].mxu1 }
 0x8c1   :  { %2038 = vst.msk [vmem:[%s6242_s16 + $0x10] sm:$0xff] %vm1324_vm4, %v1982_v59  ;;  %v1985_v3 = vadd.f32 %v4173_v33, %v3597_v47  ;;  %v1976_v42 = vpop.f32.mrb[39].mxu1 }
 0x8c2   :  { %2036 = vst.msk [vmem:[%s6242_s16] sm:$0xff] %vm1324_vm4, %v1974_v57  ;;  %v1977_v19 = vadd.f32 %v3597_v47, %v1976_v42  ;;  %4188 = vmatprep.mubr.msk.f32.mxu1 %vm1324_vm4, %v1974_v57 }
 0x8c3   :  { %2039 = vst.msk [vmem:[%s6242_s16 + $0x18] sm:$0xff] %vm1324_vm4, %v1985_v3 }
 0x8c4   :  { %2037 = vst.msk [vmem:[%s6242_s16 + $0x8] sm:$0xff] %vm1324_vm4, %v1977_v19  ;;  %4189 = vmatmul.mubr.msk.f32.vlgmr.msra.gmra.mrb[34].mxu1 %vm1324_vm4, %v1977_v19 }
 0x8c5   :  { %4191 = vmatprep.mubr.msk.f32.mxu1 %vm1324_vm4, %v1982_v59 }
 0x8c7   :  { %v4176_v16 = vpop.f32.mrb[40].mxu1 }
 0x8c8   :  { %v1998_v44 = vadd.f32 %v4176_v16, %v3597_v47  ;;  %v1989_v61 = vpop.f32.mrb[41].mxu1  ;;  %4192 = vmatmul.mubr.msk.f32.gmra.mrb[52].mxu1 %vm1324_vm4, %v1985_v3 }
 0x8c9   :  { %v1990_v22 = vadd.f32 %v3597_v47, %v1989_v61  ;;  %v4177_v62 = vpop.f32.mrb[42].mxu1 }
 0x8ca   :  { %2042 = vst.msk [vmem:[%s6242_s16 + $0x30] sm:$0xff] %vm1324_vm4, %v1998_v44  ;;  %v2001_v39 = vadd.f32 %v4177_v62, %v3597_v47  ;;  %v1992_v46 = vpop.f32.mrb[43].mxu1 }
 0x8cb   :  { %2040 = vst.msk [vmem:[%s6242_s16 + $0x20] sm:$0xff] %vm1324_vm4, %v1990_v22  ;;  %v1993_v0 = vadd.f32 %v3597_v47, %v1992_v46  ;;  %4194 = vmatprep.mubr.msk.f32.mxu1 %vm1324_vm4, %v1990_v22 }
 0x8cc   :  { %2043 = vst.msk [vmem:[%s6242_s16 + $0x38] sm:$0xff] %vm1324_vm4, %v2001_v39 }
 0x8cd   :  { %2041 = vst.msk [vmem:[%s6242_s16 + $0x28] sm:$0xff] %vm1324_vm4, %v1993_v0  ;;  %4195 = vmatmul.mubr.msk.f32.gmra.mrb[54].mxu1 %vm1324_vm4, %v1993_v0 }
 0x8ce   :  { %4197 = vmatprep.mubr.msk.f32.mxu1 %vm1324_vm4, %v1998_v44 }
 0x8cf   :  { %v4180_v29 = vpop.f32.mrb[44].mxu1 }
 0x8d0   :  { %v2014_v1 = vadd.f32 %v4180_v29, %v3597_v47  ;;  %v2005_v14 = vpop.f32.mrb[45].mxu1 }
 0x8d1   :  { %v2006_v37 = vadd.f32 %v3597_v47, %v2005_v14  ;;  %v4181_v17 = vpop.f32.mrb[46].mxu1  ;;  %4198 = vmatmul.mubr.msk.f32.gmra.mrb[56].mxu1 %vm1324_vm4, %v2001_v39 }
 0x8d2   :  { %2046 = vst.msk [vmem:[%s6242_s16 + $0x50] sm:$0xff] %vm1324_vm4, %v2014_v1  ;;  %v2017_v8 = vadd.f32 %v4181_v17, %v3597_v47  ;;  %v2008_v38 = vpop.f32.mrb[47].mxu1 }
 0x8d3   :  { %2044 = vst.msk [vmem:[%s6242_s16 + $0x40] sm:$0xff] %vm1324_vm4, %v2006_v37  ;;  %v2009_v21 = vadd.f32 %v3597_v47, %v2008_v38  ;;  %4200 = vmatprep.mubr.msk.f32.mxu1 %vm1324_vm4, %v2006_v37  ;;  %v2441_v37 = vld [vmem:[%s6243_s11] sm:$0x1] }
 0x8d4   :  { %2047 = vst.msk [vmem:[%s6242_s16 + $0x58] sm:$0xff] %vm1324_vm4, %v2017_v8 }
 0x8d5   :  { %2045 = vst.msk [vmem:[%s6242_s16 + $0x48] sm:$0xff] %vm1324_vm4, %v2009_v21  ;;  %4201 = vmatmul.mubr.msk.f32.gmra.mrb[58].mxu1 %vm1324_vm4, %v2009_v21 }
 0x8d6   :  { %4203 = vmatprep.mubr.msk.f32.mxu1 %vm1324_vm4, %v2014_v1 }
 0x8d7   :  { %v4184_v26 = vpop.f32.mrb[48].mxu1 }
 0x8d8   :  { %v2030_v49 = vadd.f32 %v4184_v26, %v3597_v47  ;;  %v2021_v18 = vpop.f32.mrb[49].mxu1 }
 0x8d9   :  { %v2022_v41 = vadd.f32 %v3597_v47, %v2021_v18  ;;  %v4185_v53 = vpop.f32.mrb[50].mxu1  ;;  %4204 = vmatmul.mubr.msk.f32.gmra.mrb[60].mxu1 %vm1324_vm4, %v2017_v8 }
 0x8da   :  { %2050 = vst.msk [vmem:[%s6242_s16 + $0x70] sm:$0xff] %vm1324_vm4, %v2030_v49  ;;  %v2033_v27 = vadd.f32 %v4185_v53, %v3597_v47  ;;  %v2024_v24 = vpop.f32.mrb[51].mxu1 }
 0x8db   :  { %2048 = vst.msk [vmem:[%s6242_s16 + $0x60] sm:$0xff] %vm1324_vm4, %v2022_v41  ;;  %v2025_v40 = vadd.f32 %v3597_v47, %v2024_v24  ;;  %4206 = vmatprep.mubr.msk.f32.mxu1 %vm1324_vm4, %v2022_v41 }
 0x8dc   :  { %2051 = vst.msk [vmem:[%s6242_s16 + $0x78] sm:$0xff] %vm1324_vm4, %v2033_v27 }
 0x8dd   :  { %2049 = vst.msk [vmem:[%s6242_s16 + $0x68] sm:$0xff] %vm1324_vm4, %v2025_v40  ;;  %4207 = vmatmul.mubr.msk.f32.gmra.mrb[62].mxu1 %vm1324_vm4, %v2025_v40 }
 0x8de   :  { %4209 = vmatprep.mubr.msk.f32.mxu1 %vm1324_vm4, %v2030_v49 }
 0x8e1   :  { %4210 = vmatmul.mubr.msk.f32.gmra.mrb[64].mxu1 %vm1324_vm4, %v2033_v27 }
 0x8e2   :  { %4272 = vmatprep.mubr.msk.f32.mxu1 %vm4799_vm3, %v4800_v51 }
 0x997   :  { %v4190_v2 = vpop.f32.mrb[34].mxu1 }
 0x998   :  { %v2167_v30 = vpop.f32.mrb[35].mxu1 }
 0x999   :  { %v4452_v11 = vpack.c.bf16 %v4190_v2, %v2167_v30  ;;  %4216 = vmatprep.mubr.msk.f32.mxu0 %vm320_vm1, %v2167_v30 }
 0x99a   :  { %4217 = vmatmul.mubr.msk.f32.vlgmr.msra.gmra.mrb[50].mxu0 %vm320_vm1, %v4190_v2 }
 0x99b   :  { %v4193_v47 = vpop.f32.mrb[52].mxu1  ;;  %4454 = vmatpush3.bf16.xpose.msk.msra.mxu1 %vm4978_vm2, %v4452_v11  ;;  %4275 = vmatprep.subr.bf16.mxu0 %v4452_v11 }
 0x99c   :  { %v2177_v58 = vpop.f32.mrb[53].mxu1  ;;  %4276 = vmatpush3.bf16.msra.mxu0 %v4452_v11  ;;  %4455 = vmatprep.subr.bf16.mxu1 %v4798_v25 }
 0x99d   :  { %v4456_v59 = vpack.c.bf16 %v4193_v47, %v2177_v58  ;;  %4219 = vmatprep.mubr.msk.f32.mxu0 %vm320_vm1, %v2177_v58 }
 0x99e   :  { %4220 = vmatmul.mubr.msk.f32.gmra.mrb[52].mxu0 %vm320_vm1, %v4193_v47 }
 0x99f   :  { %4277 = vmatprep.subr.bf16.mxu0 %v4456_v59 }
 0x9a0   :  { %v4196_v51 = vpop.f32.mrb[54].mxu1  ;;  %4278 = vmatpush3.bf16.msra.mxu0 %v4456_v59 }
 0x9a1   :  { %v2187_v50 = vpop.f32.mrb[55].mxu1 }
 0x9a2   :  { %v4460_v57 = vpack.c.bf16 %v4196_v51, %v2187_v50  ;;  %4222 = vmatprep.mubr.msk.f32.mxu0 %vm320_vm1, %v2187_v50 }
 0x9a3   :  { %4223 = vmatmul.mubr.msk.f32.gmra.mrb[54].mxu0 %vm320_vm1, %v4196_v51  ;;  %4458 = vmatpush3.bf16.xpose.msk.msra.mxu1 %vm4978_vm2, %v4456_v59 }
 0x9a4   :  { %v4199_v33 = vpop.f32.mrb[56].mxu1  ;;  %4279 = vmatprep.subr.bf16.mxu0 %v4460_v57  ;;  %4459 = vmatprep.subr.bf16.mxu1 %v4798_v25 }
 0x9a5   :  { %v2197_v3 = vpop.f32.mrb[57].mxu1  ;;  %4280 = vmatpush3.bf16.msra.mxu0 %v4460_v57 }
 0x9a6   :  { %v4464_v42 = vpack.c.bf16 %v4199_v33, %v2197_v3  ;;  %4225 = vmatprep.mubr.msk.f32.mxu0 %vm320_vm1, %v2197_v3 }
 0x9a7   :  { %4226 = vmatmul.mubr.msk.f32.gmra.mrb[56].mxu0 %vm320_vm1, %v4199_v33 }
 0x9a8   :  { %v4202_v19 = vpop.f32.mrb[58].mxu1  ;;  %4281 = vmatprep.subr.bf16.mxu0 %v4464_v42 }
 0x9a9   :  { %v2207_v16 = vpop.f32.mrb[59].mxu1  ;;  %4282 = vmatpush3.bf16.msra.mxu0 %v4464_v42 }
 0x9aa   :  { %v4468_v44 = vpack.c.bf16 %v4202_v19, %v2207_v16  ;;  %4228 = vmatprep.mubr.msk.f32.mxu0 %vm320_vm1, %v2207_v16 }
 0x9ab   :  { %4229 = vmatmul.mubr.msk.f32.gmra.mrb[58].mxu0 %vm320_vm1, %v4202_v19  ;;  %4462 = vmatpush3.bf16.xpose.msk.msra.mxu1 %vm4978_vm2, %v4460_v57 }
 0x9ac   :  { %v4205_v61 = vpop.f32.mrb[60].mxu1  ;;  %4283 = vmatprep.subr.bf16.mxu0 %v4468_v44  ;;  %4463 = vmatprep.subr.bf16.mxu1 %v4798_v25 }
 0x9ad   :  { %v2217_v22 = vpop.f32.mrb[61].mxu1  ;;  %4284 = vmatpush3.bf16.msra.mxu0 %v4468_v44 }
 0x9ae   :  { %v4472_v62 = vpack.c.bf16 %v4205_v61, %v2217_v22  ;;  %4231 = vmatprep.mubr.msk.f32.mxu0 %vm320_vm1, %v2217_v22 }
 0x9af   :  { %4232 = vmatmul.mubr.msk.f32.gmra.mrb[60].mxu0 %vm320_vm1, %v4205_v61 }
 0x9b0   :  { %v4208_v39 = vpop.f32.mrb[62].mxu1  ;;  %4285 = vmatprep.subr.bf16.mxu0 %v4472_v62 }
 0x9b1   :  { %v2227_v46 = vpop.f32.mrb[63].mxu1  ;;  %4286 = vmatpush3.bf16.msra.mxu0 %v4472_v62 }
 0x9b2   :  { %v4476_v0 = vpack.c.bf16 %v4208_v39, %v2227_v46  ;;  %4234 = vmatprep.mubr.msk.f32.mxu0 %vm320_vm1, %v2227_v46 }
 0x9b3   :  { %4235 = vmatmul.mubr.msk.f32.gmra.mrb[62].mxu0 %vm320_vm1, %v4208_v39  ;;  %4466 = vmatpush3.bf16.xpose.msk.msra.mxu1 %vm4978_vm2, %v4464_v42 }
 0x9b4   :  { %v4211_v29 = vpop.f32.mrb[64].mxu1  ;;  %4287 = vmatprep.subr.bf16.mxu0 %v4476_v0  ;;  %4467 = vmatprep.subr.bf16.mxu1 %v4798_v25 }
 0x9b5   :  { %v2237_v1 = vpop.f32.mrb[65].mxu1  ;;  %4288 = vmatpush3.bf16.msra.mxu0 %v4476_v0 }
 0x9b6   :  { %v4480_v14 = vpack.c.bf16 %v4211_v29, %v2237_v1  ;;  %4237 = vmatprep.mubr.msk.f32.mxu0 %vm320_vm1, %v2237_v1 }
 0x9b7   :  { %4238 = vmatmul.mubr.msk.f32.gmra.mrb[64].mxu0 %vm320_vm1, %v4211_v29 }
 0x9b8   :  { %4289 = vmatprep.subr.bf16.mxu0 %v4480_v14 }
 0x9b9   :  { %4290 = vmatpush3.bf16.msra.mxu0 %v4480_v14 }
 0x9bb   :  { %4470 = vmatpush3.bf16.xpose.msk.msra.mxu1 %vm4978_vm2, %v4468_v44 }
 0x9bc   :  { %4471 = vmatprep.subr.bf16.mxu1 %v4798_v25 }
 0x9c3   :  { %4474 = vmatpush3.bf16.xpose.msk.msra.mxu1 %vm4978_vm2, %v4472_v62 }
 0x9c4   :  { %4475 = vmatprep.subr.bf16.mxu1 %v4798_v25 }
 0x9cb   :  { %4478 = vmatpush3.bf16.xpose.msk.msra.mxu1 %vm4978_vm2, %v4476_v0 }
 0x9cc   :  { %4479 = vmatprep.subr.bf16.mxu1 %v4798_v25 }
 0x9d3   :  { %4482 = vmatpush3.bf16.xpose.msk.msra.mxu1 %vm4978_vm2, %v4480_v14 }
 0x9da   :  { %4273 = vmatmul.mubr.msk.f32.vlgmr.msra.gmra.mrb[66].mxu1 %vm320_vm1, %v2441_v37 }
 0x9db   :  { %4355 = vmatprep.mubr.bf16.mxu1 %v5291_v35 }
 0xa6d   :  { %v4218_v17 = vpop.f32.mrb[50].mxu0 }
 0xa6e   :  { %2522 = vperm.xlu0 %4508, %v4218_v17   ;;  %v2362_v8 = vpop.f32.mrb[51].mxu0 }
 0xa6f   :  { %2517 = vperm.xlu1 %4509, %v2362_v8  }
 0xa71   :  { %v4221_v38 = vpop.f32.mrb[52].mxu0 }
 0xa72   :  { %v2372_v21 = vpop.f32.mrb[53].mxu0 }
 0xa73   :  { %2532 = vperm.xlu1 %4509, %v4221_v38  }
 0xa76   :  { %v4224_v26 = vpop.f32.mrb[54].mxu0 }
 0xa77   :  { %v2382_v25 = vpop.f32.mrb[55].mxu0  ;;  %2527 = vperm.xlu1 %4509, %v2372_v21  }
 0xa78   :  { %2537 = vperm.xlu0 %4508, %v2382_v25  }
 0xa7a   :  { %v4227_v28 = vpop.f32.mrb[56].mxu0 }
 0xa7b   :  { %v2392_v49 = vpop.f32.mrb[57].mxu0  ;;  %2542 = vperm.xlu1 %4509, %v4224_v26  }
 0xa7c   :  { %2547 = vperm.xlu0 %4508, %v2392_v49  }
 0xa7e   :  { %v4230_v18 = vpop.f32.mrb[58].mxu0 }
 0xa7f   :  { %v2402_v41 = vpop.f32.mrb[59].mxu0  ;;  %2552 = vperm.xlu1 %4509, %v4227_v28  }
 0xa80   :  { %2557 = vperm.xlu0 %4508, %v2402_v41  }
 0xa82   :  { %v4233_v35 = vpop.f32.mrb[60].mxu0 }
 0xa83   :  { %v2412_v53 = vpop.f32.mrb[61].mxu0  ;;  %2562 = vperm.xlu1 %4509, %v4230_v18  }
 0xa84   :  { %2567 = vperm.xlu0 %4508, %v2412_v53  }
 0xa86   :  { %v4236_v27 = vpop.f32.mrb[62].mxu0 }
 0xa87   :  { %v2422_v24 = vpop.f32.mrb[63].mxu0  ;;  %2572 = vperm.xlu1 %4509, %v4233_v35  }
 0xa88   :  { %2577 = vperm.xlu0 %4508, %v2422_v24  }
 0xa8a   :  { %v4239_v40 = vpop.f32.mrb[64].mxu0 }
 0xa8b   :  { %v2432_v2 = vpop.f32.mrb[65].mxu0  ;;  %2582 = vperm.xlu1 %4509, %v4236_v27  }
 0xa8c   :  { %2587 = vperm.xlu0 %4508, %v2432_v2  }
 0xa8f   :  { %2592 = vperm.xlu1 %4509, %v4239_v40  }
 0xaad   :  { %v2511_v30 = vpop.f32.mrb[66].mxu1 }
 0xaae   :  { %v4274_v11 = vpop.f32.mrb[67].mxu1  ;;  %v5778_v47 = vrot.slane %v2511_v30, %v5027_v10 }
 0xaed   :  { %v2523_v58 = vpop.permute.xlu0 %2522 }
 0xaee   :  { %v2600_v59 = vadd.f32 %v5778_v47, %v2523_v58  ;;  %v2518_v51 = vpop.permute.xlu1 %2517 }
 0xaef   :  { %v2599_v50 = vadd.f32 %v5778_v47, %v2518_v51 }
 0xaf0   :  { %vm2616_vm2 = vcmp.gt.f32.partialorder %v2600_v59, 0.0  ;;  %v2632_v57 = vmul.f32 0.2, %v2600_v59 }
 0xaf1   :  { %vm2615_vm3 = vcmp.gt.f32.partialorder %v2599_v50, 0.0  ;;  %v2631_v33 = vmul.f32 0.2, %v2599_v50 }
 0xaf2   :  { %v2533_v3 = vpop.permute.xlu1 %2532  ;;  %v2648_v42 = vsel %vm2616_vm2, %v2600_v59, %v2632_v57 }
 0xaf3   :  { %v2602_v19 = vadd.f32 %v5778_v47, %v2533_v3  ;;  %v5784_v16 = vadd.f32 %v2648_v42, %v5060_v34  ;;  %v2647_v44 = vsel %vm2615_vm3, %v2599_v50, %v2631_v33 }
 0xaf4   :  { %v5787_v10 = vadd.f32 %v2647_v44, %v5043_v20 }
 0xaf5   :  { %vm2618_vm4 = vcmp.gt.f32.partialorder %v2602_v19, 0.0  ;;  %v2634_v61 = vmul.f32 0.2, %v2602_v19  ;;  %2681 = vmax.xlane.f32.xlu1 %v5784_v16 }
 0xaf6   :  { %v2528_v22 = vpop.permute.xlu1 %2527  ;;  %2679 = vmax.xlane.f32.xlu0 %v5787_v10 }
 0xaf7   :  { %v2601_v62 = vadd.f32 %v5778_v47, %v2528_v22  ;;  %v2538_v39 = vpop.permute.xlu0 %2537  ;;  %v2650_v46 = vsel %vm2618_vm4, %v2602_v19, %v2634_v61 }
 0xaf8   :  { %v2603_v0 = vadd.f32 %v5778_v47, %v2538_v39  ;;  %v5794_v34 = vadd.f32 %v2650_v46, %v5057_v31 }
 0xaf9   :  { %vm2617_vm11 = vcmp.gt.f32.partialorder %v2601_v62, 0.0  ;;  %v2633_v29 = vmul.f32 0.2, %v2601_v62 }
 0xafa   :  { %vm2619_vm12 = vcmp.gt.f32.partialorder %v2603_v0, 0.0  ;;  %v2635_v20 = vmul.f32 0.2, %v2603_v0  ;;  %v2543_v1 = vpop.permute.xlu1 %2542  ;;  %2685 = vmax.xlane.f32.xlu0 %v5794_v34 }
 0xafb   :  { %v2604_v14 = vadd.f32 %v5778_v47, %v2543_v1  ;;  %v2548_v37 = vpop.permute.xlu0 %2547  ;;  %v2649_v17 = vsel %vm2617_vm11, %v2601_v62, %v2633_v29 }
 0xafc   :  { %v2605_v8 = vadd.f32 %v5778_v47, %v2548_v37  ;;  %v2651_v38 = vsel %vm2619_vm12, %v2603_v0, %v2635_v20  ;;  %v5800_v21 = vadd.f32 %v2649_v17, %v5078_v45 }
 0xafd   :  { %vm2620_vm13 = vcmp.gt.f32.partialorder %v2604_v14, 0.0  ;;  %v2636_v31 = vmul.f32 0.2, %v2604_v14  ;;  %v5803_v26 = vadd.f32 %v2651_v38, %v5081_v48 }
 0xafe   :  { %vm2621_vm14 = vcmp.gt.f32.partialorder %v2605_v8, 0.0  ;;  %v2637_v25 = vmul.f32 0.2, %v2605_v8  ;;  %v2553_v28 = vpop.permute.xlu1 %2552  ;;  %2683 = vmax.xlane.f32.xlu0 %v5800_v21 }
 0xaff   :  { %v2606_v49 = vadd.f32 %v5778_v47, %v2553_v28  ;;  %v2558_v18 = vpop.permute.xlu0 %2557  ;;  %2687 = vmax.xlane.f32.xlu1 %v5803_v26  ;;  %v2652_v41 = vsel %vm2620_vm13, %v2604_v14, %v2636_v31 }
 0xb00   :  { %v2607_v35 = vadd.f32 %v5778_v47, %v2558_v18  ;;  %v2653_v45 = vsel %vm2621_vm14, %v2605_v8, %v2637_v25  ;;  %v5810_v53 = vadd.f32 %v2652_v41, %v5100_v60 }
 0xb01   :  { %vm2622_vm15 = vcmp.gt.f32.partialorder %v2606_v49, 0.0  ;;  %v2638_v48 = vmul.f32 0.2, %v2606_v49  ;;  %v5813_v27 = vadd.f32 %v2653_v45, %v5103_v63 }
 0xb02   :  { %vm2623_vm5 = vcmp.gt.f32.partialorder %v2607_v35, 0.0  ;;  %v2639_v24 = vmul.f32 0.2, %v2607_v35  ;;  %v2563_v40 = vpop.permute.xlu1 %2562  ;;  %2689 = vmax.xlane.f32.xlu0 %v5810_v53 }
 0xb03   :  { %v2608_v2 = vadd.f32 %v5778_v47, %v2563_v40  ;;  %v2568_v30 = vpop.permute.xlu0 %2567  ;;  %2691 = vmax.xlane.f32.xlu1 %v5813_v27  ;;  %v2654_v11 = vsel %vm2622_vm15, %v2606_v49, %v2638_v48 }
 0xb04   :  { %v2609_v58 = vadd.f32 %v5778_v47, %v2568_v30  ;;  %v2655_v60 = vsel %vm2623_vm5, %v2607_v35, %v2639_v24  ;;  %v5820_v59 = vadd.f32 %v2654_v11, %v5122_v12 }
 0xb05   :  { %vm2624_vm6 = vcmp.gt.f32.partialorder %v2608_v2, 0.0  ;;  %v2640_v63 = vmul.f32 0.2, %v2608_v2  ;;  %v5823_v51 = vadd.f32 %v2655_v60, %v5125_v15 }
 0xb06   :  { %vm2625_vm7 = vcmp.gt.f32.partialorder %v2609_v58, 0.0  ;;  %v2641_v50 = vmul.f32 0.2, %v2609_v58  ;;  %v2573_v57 = vpop.permute.xlu1 %2572  ;;  %2693 = vmax.xlane.f32.xlu0 %v5820_v59 }
 0xb07   :  { %v2610_v33 = vadd.f32 %v5778_v47, %v2573_v57  ;;  %v2578_v3 = vpop.permute.xlu0 %2577  ;;  %2695 = vmax.xlane.f32.xlu1 %v5823_v51  ;;  %v2656_v42 = vsel %vm2624_vm6, %v2608_v2, %v2640_v63 }
 0xb08   :  { %v2611_v19 = vadd.f32 %v5778_v47, %v2578_v3  ;;  %v2657_v12 = vsel %vm2625_vm7, %v2609_v58, %v2641_v50  ;;  %v5830_v44 = vadd.f32 %v2656_v42, %v5144_v32 }
 0xb09   :  { %vm2626_vm8 = vcmp.gt.f32.partialorder %v2610_v33, 0.0  ;;  %v2642_v15 = vmul.f32 0.2, %v2610_v33  ;;  %v5833_v61 = vadd.f32 %v2657_v12, %v5147_v36 }
 0xb0a   :  { %vm2627_vm9 = vcmp.gt.f32.partialorder %v2611_v19, 0.0  ;;  %v2643_v22 = vmul.f32 0.2, %v2611_v19  ;;  %v2583_v62 = vpop.permute.xlu1 %2582  ;;  %2697 = vmax.xlane.f32.xlu0 %v5830_v44 }
 0xb0b   :  { %v2612_v39 = vadd.f32 %v5778_v47, %v2583_v62  ;;  %2699 = vmax.xlane.f32.xlu1 %v5833_v61  ;;  %v2588_v46 = vpop.permute.xlu0 %2587  ;;  %v2658_v0 = vsel %vm2626_vm8, %v2610_v33, %v2642_v15 }
 0xb0c   :  { %v2613_v29 = vadd.f32 %v5778_v47, %v2588_v46  ;;  %v2659_v32 = vsel %vm2627_vm9, %v2611_v19, %v2643_v22  ;;  %v5840_v20 = vadd.f32 %v2658_v0, %v5166_v52 }
 0xb0d   :  { %vm2628_vm10 = vcmp.gt.f32.partialorder %v2612_v39, 0.0  ;;  %v2644_v36 = vmul.f32 0.2, %v2612_v39  ;;  %v5843_v1 = vadd.f32 %v2659_v32, %v5169_v55 }
 0xb0e   :  { %vm2629_vm2 = vcmp.gt.f32.partialorder %v2613_v29, 0.0  ;;  %v2645_v14 = vmul.f32 0.2, %v2613_v29  ;;  %v2593_v37 = vpop.permute.xlu1 %2592  ;;  %2701 = vmax.xlane.f32.xlu0 %v5840_v20 }
 0xb0f   :  { %2703 = vmax.xlane.f32.xlu1 %v5843_v1  ;;  %v2614_v17 = vadd.f32 %v5778_v47, %v2593_v37  ;;  %v2660_v8 = vsel %vm2628_vm10, %v2612_v39, %v2644_v36 }
 0xb10   :  { %v5849_v38 = vadd.f32 %v2660_v8, %v5185_v5  ;;  %v2661_v52 = vsel %vm2629_vm2, %v2613_v29, %v2645_v14 }
 0xb11   :  { %vm2630_vm3 = vcmp.gt.f32.partialorder %v2614_v17, 0.0  ;;  %v2646_v31 = vmul.f32 0.2, %v2614_v17  ;;  %v5852_v25 = vadd.f32 %v2661_v52, %v5188_v13 }
 0xb12   :  { %2705 = vmax.xlane.f32.xlu0 %v5849_v38 }
 0xb13   :  { %2707 = vmax.xlane.f32.xlu1 %v5852_v25  ;;  %v2662_v55 = vsel %vm2630_vm3, %v2614_v17, %v2646_v31 }
 0xb14   :  { %v5857_v28 = vadd.f32 %v2662_v55, %v5200_v23 }
 0xb16   :  { %2709 = vmax.xlane.f32.xlu0 %v5857_v28 }
 0xb82   :  { %v2682_v47 = vpop.xlane.xlu1 %2681 }
 0xb83   :  { %v2712_v5 = vsub.f32 %v5784_v16, %v2682_v47  ;;  %v2680_v49 = vpop.xlane.xlu0 %2679 }
 0xb84   :  { %v2711_v18 = vsub.f32 %v5787_v10, %v2680_v49 }
 0xb85   :  { %v2729_v41 = vmul.f32 1.442695, %v2712_v5 }
 0xb86   :  { %v2727_v35 = vmul.f32 1.442695, %v2711_v18 }
 0xb87   :  { %4670 = vpow2.f32 %v2729_v41  ;;  %v2686_v13 = vpop.xlane.xlu0 %2685 }
 0xb88   :  { %4672 = vpow2.f32 %v2727_v35  ;;  %v2714_v45 = vsub.f32 %v5794_v34, %v2686_v13 }
 0xb8a   :  { %v2733_v48 = vmul.f32 1.442695, %v2714_v45  ;;  %v3055_v45 = vld [vmem:[%s6244_s14] sm:$0xff] }
 0xb8b   :  { %v2684_v24 = vpop.xlane.xlu0 %2683 }
 0xb8c   :  { %4674 = vpow2.f32 %v2733_v48  ;;  %v2688_v23 = vpop.xlane.xlu1 %2687  ;;  %v2713_v40 = vsub.f32 %v5800_v21, %v2684_v24  ;;  %v3056_v48 = vld [vmem:[%s6244_s14 + $0x8] sm:$0xff] }
 0xb8d   :  { %v2715_v2 = vsub.f32 %v5803_v26, %v2688_v23  ;;  %v4483_v24 = vpack.c.bf16 %v3056_v48, %v3055_v45 }
 0xb8e   :  { %v2731_v30 = vmul.f32 1.442695, %v2713_v40 }
 0xb8f   :  { %v2735_v16 = vmul.f32 1.442695, %v2715_v2  ;;  %v2690_v11 = vpop.xlane.xlu0 %2689  ;;  %4484 = vmatprep.subr.bf16.mxu0 %v4483_v24 }
 0xb90   :  { %4676 = vpow2.f32 %v2731_v30  ;;  %v2692_v10 = vpop.xlane.xlu1 %2691  ;;  %v2716_v58 = vsub.f32 %v5810_v53, %v2690_v11 }
 0xb91   :  { %v5866_v60 = vpop.eup %4670  ;;  %v2717_v63 = vsub.f32 %v5813_v27, %v2692_v10  ;;  %4678 = vpow2.f32 %v2735_v16 }
 0xb92   :  { %v5869_v34 = vpop.eup %4672  ;;  %v2737_v50 = vmul.f32 1.442695, %v2716_v58  ;;  %2761 = vadd.xlane.f32.xlu0 %v5866_v60 }
 0xb93   :  { %v2739_v21 = vmul.f32 1.442695, %v2717_v63  ;;  %2759 = vadd.xlane.f32.xlu1 %v5869_v34  ;;  %v2694_v26 = vpop.xlane.xlu0 %2693 }
 0xb94   :  { %4680 = vpow2.f32 %v2737_v50  ;;  %v2696_v57 = vpop.xlane.xlu1 %2695  ;;  %v2718_v33 = vsub.f32 %v5820_v59, %v2694_v26 }
 0xb95   :  { %v2719_v53 = vsub.f32 %v5823_v51, %v2696_v57  ;;  %4682 = vpow2.f32 %v2739_v21 }
 0xb96   :  { %v5875_v3 = vpop.eup %4674  ;;  %v2741_v42 = vmul.f32 1.442695, %v2718_v33 }
 0xb97   :  { %v2743_v27 = vmul.f32 1.442695, %v2719_v53  ;;  %2765 = vadd.xlane.f32.xlu0 %v5875_v3  ;;  %v2698_v19 = vpop.xlane.xlu0 %2697 }
 0xb98   :  { %4684 = vpow2.f32 %v2741_v42  ;;  %v2700_v12 = vpop.xlane.xlu1 %2699  ;;  %v2720_v15 = vsub.f32 %v5830_v44, %v2698_v19 }
 0xb99   :  { %v2721_v22 = vsub.f32 %v5833_v61, %v2700_v12  ;;  %4686 = vpow2.f32 %v2743_v27 }
 0xb9a   :  { %v5880_v62 = vpop.eup %4676  ;;  %v2745_v39 = vmul.f32 1.442695, %v2720_v15 }
 0xb9b   :  { %v2747_v59 = vmul.f32 1.442695, %v2721_v22  ;;  %2763 = vadd.xlane.f32.xlu1 %v5880_v62  ;;  %v2702_v51 = vpop.xlane.xlu0 %2701  ;;  %v5884_v29 = vpop.eup %4678 }
 0xb9c   :  { %4688 = vpow2.f32 %v2745_v39  ;;  %v2704_v46 = vpop.xlane.xlu1 %2703  ;;  %v2722_v0 = vsub.f32 %v5840_v20, %v2702_v51 }
 0xb9d   :  { %v2723_v32 = vsub.f32 %v5843_v1, %v2704_v46  ;;  %4690 = vpow2.f32 %v2747_v59 }
 0xb9e   :  { %v5887_v36 = vpop.eup %4680  ;;  %v2749_v44 = vmul.f32 1.442695, %v2722_v0 }
 0xb9f   :  { %v2751_v61 = vmul.f32 1.442695, %v2723_v32  ;;  %2767 = vadd.xlane.f32.xlu1 %v5884_v29  ;;  %2769 = vadd.xlane.f32.xlu0 %v5887_v36  ;;  %v2706_v14 = vpop.xlane.xlu0 %2705  ;;  %v5892_v8 = vpop.eup %4682 }
 0xba0   :  { %4692 = vpow2.f32 %v2749_v44  ;;  %v2708_v37 = vpop.xlane.xlu1 %2707  ;;  %v2724_v17 = vsub.f32 %v5849_v38, %v2706_v14 }
 0xba1   :  { %v2725_v20 = vsub.f32 %v5852_v25, %v2708_v37  ;;  %4694 = vpow2.f32 %v2751_v61 }
 0xba2   :  { %v5895_v52 = vpop.eup %4684  ;;  %v2753_v1 = vmul.f32 1.442695, %v2724_v17 }
 0xba3   :  { %v2755_v31 = vmul.f32 1.442695, %v2725_v20  ;;  %2771 = vadd.xlane.f32.xlu1 %v5892_v8  ;;  %2773 = vadd.xlane.f32.xlu0 %v5895_v52  ;;  %v2710_v55 = vpop.xlane.xlu0 %2709  ;;  %v5900_v5 = vpop.eup %4686 }
 0xba4   :  { %4696 = vpow2.f32 %v2753_v1  ;;  %v2726_v47 = vsub.f32 %v5857_v28, %v2710_v55 }
 0xba5   :  { %4698 = vpow2.f32 %v2755_v31 }
 0xba6   :  { %v5902_v38 = vpop.eup %4688  ;;  %v2757_v49 = vmul.f32 1.442695, %v2726_v47 }
 0xba7   :  { %2775 = vadd.xlane.f32.xlu1 %v5900_v5  ;;  %2777 = vadd.xlane.f32.xlu0 %v5902_v38  ;;  %v5906_v25 = vpop.eup %4690 }
 0xba8   :  { %4700 = vpow2.f32 %v2757_v49 }
 0xbaa   :  { %v5908_v18 = vpop.eup %4692 }
 0xbab   :  { %2779 = vadd.xlane.f32.xlu1 %v5906_v25  ;;  %2781 = vadd.xlane.f32.xlu0 %v5908_v18  ;;  %v5912_v28 = vpop.eup %4694 }
 0xbae   :  { %v5914_v41 = vpop.eup %4696 }
 0xbaf   :  { %2783 = vadd.xlane.f32.xlu1 %v5912_v28  ;;  %2785 = vadd.xlane.f32.xlu0 %v5914_v41  ;;  %v5918_v35 = vpop.eup %4698 }
 0xbb2   :  { %v5920_v13 = vpop.eup %4700 }
 0xbb3   :  { %2787 = vadd.xlane.f32.xlu1 %v5918_v35  ;;  %2789 = vadd.xlane.f32.xlu0 %v5920_v13 }
 0xc1f   :  { %v2762_v23 = vpop.xlane.xlu0 %2761 }
 0xc20   :  { %v2792_v40 = vmax.f32 %v2762_v23, 1e-20  ;;  %v2760_v2 = vpop.xlane.xlu1 %2759 }
 0xc21   :  { %v2791_v30 = vmax.f32 %v2760_v2, 1e-20 }
 0xc22   :  { %4702 = vrcp.f32 %v2792_v40 }
 0xc23   :  { %4704 = vrcp.f32 %v2791_v30 }
 0xc24   :  { %v2766_v16 = vpop.xlane.xlu0 %2765 }
 0xc25   :  { %v2794_v11 = vmax.f32 %v2766_v16, 1e-20 }
 0xc27   :  { %4706 = vrcp.f32 %v2794_v11 }
 0xc28   :  { %v2764_v10 = vpop.xlane.xlu1 %2763 }
 0xc29   :  { %v2793_v58 = vmax.f32 %v2764_v10, 1e-20 }
 0xc2b   :  { %4708 = vrcp.f32 %v2793_v58 }
 0xc2c   :  { %v4703_v63 = vpop.eup %4702  ;;  %v2768_v50 = vpop.xlane.xlu1 %2767 }
 0xc2d   :  { %v2770_v21 = vpop.xlane.xlu0 %2769  ;;  %v4705_v26 = vpop.eup %4704  ;;  %v2795_v57 = vmax.f32 %v2768_v50, 1e-20  ;;  %v2824_v53 = vmul.f32 %v4703_v63, %v5866_v60 }
 0xc2e   :  { %v2796_v33 = vmax.f32 %v2770_v21, 1e-20  ;;  %v2823_v42 = vmul.f32 %v4705_v26, %v5869_v34 }
 0xc2f   :  { %4710 = vrcp.f32 %v2795_v57 }
 0xc30   :  { %4712 = vrcp.f32 %v2796_v33  ;;  %v2772_v27 = vpop.xlane.xlu1 %2771  ;;  %v2839_v12 = vpack.c.bf16 %v2824_v53, %v2823_v42 }
 0xc31   :  { %v2774_v19 = vpop.xlane.xlu0 %2773  ;;  %v2797_v15 = vmax.f32 %v2772_v27, 1e-20  ;;  %v4707_v39 = vpop.eup %4706 }
 0xc32   :  { %v2798_v22 = vmax.f32 %v2774_v19, 1e-20  ;;  %4291 = vmatprep.mubr.bf16.mxu0 %v2839_v12  ;;  %v2826_v60 = vmul.f32 %v4707_v39, %v5875_v3 }
 0xc33   :  { %4714 = vrcp.f32 %v2797_v15 }
 0xc34   :  { %4716 = vrcp.f32 %v2798_v22  ;;  %v2776_v59 = vpop.xlane.xlu1 %2775 }
 0xc35   :  { %v2778_v51 = vpop.xlane.xlu0 %2777  ;;  %v4709_v46 = vpop.eup %4708  ;;  %v2799_v0 = vmax.f32 %v2776_v59, 1e-20 }
 0xc36   :  { %v2800_v32 = vmax.f32 %v2778_v51, 1e-20  ;;  %v2825_v34 = vmul.f32 %v4709_v46, %v5880_v62 }
 0xc37   :  { %4718 = vrcp.f32 %v2799_v0 }
 0xc38   :  { %4720 = vrcp.f32 %v2800_v32  ;;  %v2780_v44 = vpop.xlane.xlu1 %2779  ;;  %v2840_v14 = vpack.c.bf16 %v2826_v60, %v2825_v34 }
 0xc39   :  { %v2782_v61 = vpop.xlane.xlu0 %2781  ;;  %v4711_v37 = vpop.eup %4710  ;;  %v2801_v17 = vmax.f32 %v2780_v44, 1e-20 }
 0xc3a   :  { %v2802_v20 = vmax.f32 %v2782_v61, 1e-20  ;;  %v4713_v1 = vpop.eup %4712  ;;  %4292 = vmatmul.mubr.bf16.vlgmr.msra.gmra.mrb[68].mxu0 %v2840_v14  ;;  %v2827_v31 = vmul.f32 %v4711_v37, %v5884_v29 }
 0xc3b   :  { %4722 = vrcp.f32 %v2801_v17  ;;  %v2828_v55 = vmul.f32 %v4713_v1, %v5887_v36  ;;  %4486 = vmatpush3.bf16.msra.mxu0 %v4483_v24 }
 0xc3c   :  { %4724 = vrcp.f32 %v2802_v20  ;;  %v2784_v3 = vpop.xlane.xlu1 %2783 }
 0xc3d   :  { %v2786_v47 = vpop.xlane.xlu0 %2785  ;;  %v4715_v62 = vpop.eup %4714  ;;  %v2803_v49 = vmax.f32 %v2784_v3, 1e-20  ;;  %v2841_v48 = vpack.c.bf16 %v2828_v55, %v2827_v31 }
 0xc3e   :  { %v2804_v45 = vmax.f32 %v2786_v47, 1e-20  ;;  %v4717_v23 = vpop.eup %4716  ;;  %v2829_v40 = vmul.f32 %v4715_v62, %v5892_v8 }
 0xc3f   :  { %4726 = vrcp.f32 %v2803_v49  ;;  %4295 = vmatprep.mubr.bf16.mxu0 %v2841_v48  ;;  %v2830_v2 = vmul.f32 %v4717_v23, %v5895_v52 }
 0xc40   :  { %4728 = vrcp.f32 %v2804_v45  ;;  %v2788_v29 = vpop.xlane.xlu1 %2787 }
 0xc41   :  { %v2790_v30 = vpop.xlane.xlu0 %2789  ;;  %v4719_v16 = vpop.eup %4718  ;;  %v2805_v36 = vmax.f32 %v2788_v29, 1e-20  ;;  %v2842_v11 = vpack.c.bf16 %v2830_v2, %v2829_v40 }
 0xc42   :  { %v2806_v24 = vmax.f32 %v2790_v30, 1e-20  ;;  %v4721_v10 = vpop.eup %4720  ;;  %v2831_v58 = vmul.f32 %v4719_v16, %v5900_v5 }
 0xc43   :  { %4730 = vrcp.f32 %v2805_v36  ;;  %4296 = vmatmul.mubr.bf16.gmra.mrb[72].mxu0 %v2842_v11  ;;  %v2832_v63 = vmul.f32 %v4721_v10, %v5902_v38 }
 0xc44   :  { %4732 = vrcp.f32 %v2806_v24 }
 0xc45   :  { %v4723_v8 = vpop.eup %4722  ;;  %v2843_v50 = vpack.c.bf16 %v2832_v63, %v2831_v58 }
 0xc46   :  { %v4725_v21 = vpop.eup %4724  ;;  %v2833_v52 = vmul.f32 %v4723_v8, %v5906_v25 }
 0xc47   :  { %4299 = vmatprep.mubr.bf16.mxu0 %v2843_v50  ;;  %v2834_v26 = vmul.f32 %v4725_v21, %v5908_v18  ;;  %v5949_v18 = vld [vmem:[%s6245_s13] ss:$0 sm:$0xff] }
 0xc49   :  { %v4727_v57 = vpop.eup %4726  ;;  %v2844_v33 = vpack.c.bf16 %v2834_v26, %v2833_v52 }
 0xc4a   :  { %v4729_v53 = vpop.eup %4728  ;;  %v2835_v42 = vmul.f32 %v4727_v57, %v5912_v28 }
 0xc4b   :  { %4300 = vmatmul.mubr.bf16.gmra.mrb[76].mxu0 %v2844_v33  ;;  %v2836_v5 = vmul.f32 %v4729_v53, %v5914_v41 }
 0xc4d   :  { %v4731_v27 = vpop.eup %4730  ;;  %v2845_v19 = vpack.c.bf16 %v2836_v5, %v2835_v42 }
 0xc4e   :  { %v4733_v38 = vpop.eup %4732  ;;  %v2837_v12 = vmul.f32 %v4731_v27, %v5918_v35 }
 0xc4f   :  { %4303 = vmatprep.mubr.bf16.mxu0 %v2845_v19  ;;  %v2838_v15 = vmul.f32 %v4733_v38, %v5920_v13 }
 0xc51   :  { %v2846_v25 = vpack.c.bf16 %v2838_v15, %v2837_v12 }
 0xc53   :  { %4304 = vmatmul.mubr.bf16.gmra.mrb[80].mxu0 %v2846_v25 }
 0xd0d   :  { %v4293_v22 = vpop.f32.mrb[68].mxu0 }
 0xd0e   :  { %v5952_v28 = vadd.f32 %v4293_v22, %v5949_v18  ;;  %v2896_v41 = vpop.f32.mrb[69].mxu0 }
 0xd0f   :  { %v2897_v39 = vadd.f32 %v5949_v18, %v2896_v41  ;;  %v4294_v59 = vpop.f32.mrb[70].mxu0 }
 0xd10   :  { %v2977_v35 = vmin.f32 %v5952_v28, 0.0  ;;  %v5957_v51 = vadd.f32 %v4294_v59, %v5949_v18  ;;  %v2899_v13 = vpop.f32.mrb[71].mxu0  ;;  %vm2961_vm12 = vcmp.gt.f32.partialorder %v5952_v28, 0.0 }
 0xd11   :  { %v2975_v46 = vmin.f32 %v2897_v39, 0.0  ;;  %v2900_v0 = vadd.f32 %v5949_v18, %v2899_v13  ;;  %vm2959_vm4 = vcmp.gt.f32.partialorder %v2897_v39, 0.0 }
 0xd12   :  { %v2995_v32 = vmul.f32 1.442695, %v2977_v35  ;;  %v2978_v60 = vmin.f32 %v5957_v51, 0.0  ;;  %vm2962_vm13 = vcmp.gt.f32.partialorder %v5957_v51, 0.0 }
 0xd13   :  { %v2991_v34 = vmul.f32 1.442695, %v2975_v46  ;;  %v2976_v44 = vmin.f32 %v2900_v0, 0.0  ;;  %vm2960_vm11 = vcmp.gt.f32.partialorder %v2900_v0, 0.0 }
 0xd14   :  { %4734 = vpow2.f32 %v2995_v32  ;;  %v2997_v61 = vmul.f32 1.442695, %v2978_v60 }
 0xd15   :  { %4736 = vpow2.f32 %v2991_v34  ;;  %v2993_v14 = vmul.f32 1.442695, %v2976_v44 }
 0xd16   :  { %v4297_v37 = vpop.f32.mrb[72].mxu0 }
 0xd17   :  { %4738 = vpow2.f32 %v2993_v14  ;;  %v5962_v17 = vadd.f32 %v4297_v37, %v5949_v18  ;;  %v2912_v20 = vpop.f32.mrb[73].mxu0 }
 0xd18   :  { %4740 = vpow2.f32 %v2997_v61  ;;  %v5965_v1 = vadd.f32 %v5949_v18, %v2912_v20  ;;  %v4298_v31 = vpop.f32.mrb[74].mxu0 }
 0xd19   :  { %v2981_v55 = vmin.f32 %v5962_v17, 0.0  ;;  %v5969_v3 = vadd.f32 %v4298_v31, %v5949_v18  ;;  %v2915_v47 = vpop.f32.mrb[75].mxu0  ;;  %vm2965_vm15 = vcmp.gt.f32.partialorder %v5962_v17, 0.0 }
 0xd1a   :  { %v2979_v62 = vmin.f32 %v5965_v1, 0.0  ;;  %v5973_v49 = vadd.f32 %v5949_v18, %v2915_v47  ;;  %vm2963_vm14 = vcmp.gt.f32.partialorder %v5965_v1, 0.0 }
 0xd1b   :  { %v3003_v45 = vmul.f32 1.442695, %v2981_v55  ;;  %v2982_v48 = vmin.f32 %v5969_v3, 0.0  ;;  %vm2966_vm6 = vcmp.gt.f32.partialorder %v5969_v3, 0.0 }
 0xd1c   :  { %v2999_v23 = vmul.f32 1.442695, %v2979_v62  ;;  %v2980_v40 = vmin.f32 %v5973_v49, 0.0  ;;  %vm2964_vm5 = vcmp.gt.f32.partialorder %v5973_v49, 0.0 }
 0xd1d   :  { %4742 = vpow2.f32 %v3003_v45  ;;  %v3005_v2 = vmul.f32 1.442695, %v2982_v48 }
 0xd1e   :  { %v4735_v29 = vpop.eup %4734  ;;  %4744 = vpow2.f32 %v2999_v23  ;;  %v3001_v30 = vmul.f32 1.442695, %v2980_v40  ;;  %v4301_v16 = vpop.f32.mrb[76].mxu0 }
 0xd1f   :  { %v4737_v36 = vpop.eup %4736  ;;  %v5978_v24 = vadd.f32 %v4301_v16, %v5949_v18  ;;  %v2928_v11 = vpop.f32.mrb[77].mxu0  ;;  %v3650_v26 = vadd.f32 -1.0, %v4735_v29 }
 0xd20   :  { %4746 = vpow2.f32 %v3001_v30  ;;  %v5981_v10 = vadd.f32 %v5949_v18, %v2928_v11  ;;  %v4302_v58 = vpop.f32.mrb[78].mxu0  ;;  %v3648_v63 = vadd.f32 -1.0, %v4737_v36 }
 0xd21   :  { %v4739_v8 = vpop.eup %4738  ;;  %4748 = vpow2.f32 %v3005_v2  ;;  %v2985_v50 = vmin.f32 %v5978_v24, 0.0  ;;  %v5985_v21 = vadd.f32 %v4302_v58, %v5949_v18  ;;  %v2931_v52 = vpop.f32.mrb[79].mxu0  ;;  %v3041_v22 = vsel %vm2961_vm12, %v5952_v28, %v3650_v26 }
 0xd22   :  { %v4741_v57 = vpop.eup %4740  ;;  %v3649_v33 = vadd.f32 -1.0, %v4739_v8  ;;  %v2983_v53 = vmin.f32 %v5981_v10, 0.0  ;;  %v5989_v42 = vadd.f32 %v5949_v18, %v2931_v52  ;;  %v3039_v19 = vsel %vm2959_vm4, %v2897_v39, %v3648_v63 }
 0xd23   :  { %v3011_v5 = vmul.f32 1.442695, %v2985_v50  ;;  %v2986_v27 = vmin.f32 %v5985_v21, 0.0  ;;  %4311 = vmatprep.mubr.msk.f32.mxu0 %vm320_vm1, %v3039_v19  ;;  %v3651_v41 = vadd.f32 -1.0, %v4741_v57  ;;  %vm2967_vm7 = vcmp.gt.f32.partialorder %v5981_v10, 0.0 }
 0xd24   :  { %v3040_v38 = vsel %vm2960_vm11, %v2900_v0, %v3649_v33  ;;  %v3007_v12 = vmul.f32 1.442695, %v2983_v53  ;;  %v2984_v15 = vmin.f32 %v5989_v42, 0.0  ;;  %vm2968_vm8 = vcmp.gt.f32.partialorder %v5989_v42, 0.0 }
 0xd25   :  { %4750 = vpow2.f32 %v3011_v5  ;;  %v3013_v25 = vmul.f32 1.442695, %v2986_v27  ;;  %4312 = vmatmul.mubr.msk.f32.vlgmr.msra.gmra.mrb[66].mxu0 %vm320_vm1, %v3040_v38  ;;  %v3042_v28 = vsel %vm2962_vm13, %v5957_v51, %v3651_v41  ;;  %vm2969_vm9 = vcmp.gt.f32.partialorder %v5978_v24, 0.0 }
 0xd26   :  { %4752 = vpow2.f32 %v3007_v12  ;;  %v3009_v59 = vmul.f32 1.442695, %v2984_v15  ;;  %v4305_v35 = vpop.f32.mrb[80].mxu0  ;;  %4314 = vmatprep.mubr.msk.f32.mxu0 %vm320_vm1, %v3041_v22  ;;  %vm2970_vm10 = vcmp.gt.f32.partialorder %v5985_v21, 0.0 }
 0xd27   :  { %v4743_v39 = vpop.eup %4742  ;;  %v6000_v13 = vadd.f32 %v4305_v35, %v5949_v18  ;;  %v2944_v46 = vpop.f32.mrb[81].mxu0 }
 0xd28   :  { %v4745_v0 = vpop.eup %4744  ;;  %4754 = vpow2.f32 %v3009_v59  ;;  %v6003_v32 = vadd.f32 %v5949_v18, %v2944_v46  ;;  %v4306_v60 = vpop.f32.mrb[82].mxu0  ;;  %v3654_v45 = vadd.f32 -1.0, %v4743_v39 }
 0xd29   :  { %4756 = vpow2.f32 %v3013_v25  ;;  %v2989_v34 = vmin.f32 %v6000_v13, 0.0  ;;  %v6008_v44 = vadd.f32 %v4306_v60, %v5949_v18  ;;  %v2947_v61 = vpop.f32.mrb[83].mxu0  ;;  %4315 = vmatmul.mubr.msk.f32.gmra.mrb[84].mxu0 %vm320_vm1, %v3042_v28  ;;  %v3652_v14 = vadd.f32 -1.0, %v4745_v0 }
 0xd2a   :  { %v4747_v37 = vpop.eup %4746  ;;  %v2987_v20 = vmin.f32 %v6003_v32, 0.0  ;;  %v2948_v31 = vadd.f32 %v5949_v18, %v2947_v61  ;;  %vm2971_vm2 = vcmp.gt.f32.partialorder %v6003_v32, 0.0  ;;  %vm2973_vm4 = vcmp.gt.f32.partialorder %v6000_v13, 0.0 }
 0xd2b   :  { %v4749_v55 = vpop.eup %4748  ;;  %v3019_v47 = vmul.f32 1.442695, %v2989_v34  ;;  %v2990_v51 = vmin.f32 %v6008_v44, 0.0  ;;  %v3043_v62 = vsel %vm2963_vm14, %v5965_v1, %v3652_v14  ;;  %v3653_v40 = vadd.f32 -1.0, %v4747_v37 }
 0xd2c   :  { %v3015_v48 = vmul.f32 1.442695, %v2987_v20  ;;  %v2988_v23 = vmin.f32 %v2948_v31, 0.0  ;;  %4317 = vmatprep.mubr.msk.f32.mxu0 %vm320_vm1, %v3043_v62  ;;  %v3655_v30 = vadd.f32 -1.0, %v4749_v55  ;;  %v3045_v1 = vsel %vm2965_vm15, %v5962_v17, %v3654_v45  ;;  %v6058_v45 = vld [vmem:[%s6246_s15] ss:$0 sm:$0xff] }
 0xd2d   :  { %4758 = vpow2.f32 %v3019_v47  ;;  %v3021_v2 = vmul.f32 1.442695, %v2990_v51  ;;  %v3044_v29 = vsel %vm2964_vm5, %v5973_v49, %v3653_v40  ;;  %vm2972_vm3 = vcmp.gt.f32.partialorder %v2948_v31, 0.0 }
 0xd2e   :  { %4760 = vpow2.f32 %v3015_v48  ;;  %v3017_v18 = vmul.f32 1.442695, %v2988_v23  ;;  %4318 = vmatmul.mubr.msk.f32.gmra.mrb[86].mxu0 %vm320_vm1, %v3044_v29  ;;  %v3046_v63 = vsel %vm2966_vm6, %v5969_v3, %v3655_v30  ;;  %vm2974_vm11 = vcmp.gt.f32.partialorder %v6008_v44, 0.0 }
 0xd2f   :  { %v4751_v16 = vpop.eup %4750  ;;  %4320 = vmatprep.mubr.msk.f32.mxu0 %vm320_vm1, %v3045_v1 }
 0xd30   :  { %v4753_v36 = vpop.eup %4752  ;;  %4762 = vpow2.f32 %v3017_v18  ;;  %v3658_v17 = vadd.f32 -1.0, %v4751_v16 }
 0xd31   :  { %4764 = vpow2.f32 %v3021_v2  ;;  %v3656_v11 = vadd.f32 -1.0, %v4753_v36 }
 0xd32   :  { %v4755_v58 = vpop.eup %4754  ;;  %4321 = vmatmul.mubr.msk.f32.gmra.mrb[88].mxu0 %vm320_vm1, %v3046_v63  ;;  %v3049_v3 = vsel %vm2969_vm9, %v5978_v24, %v3658_v17 }
 0xd33   :  { %v4757_v49 = vpop.eup %4756  ;;  %v3047_v8 = vsel %vm2967_vm7, %v5981_v10, %v3656_v11  ;;  %v3657_v50 = vadd.f32 -1.0, %v4755_v58 }
 0xd34   :  { %4323 = vmatprep.mubr.msk.f32.mxu0 %vm320_vm1, %v3047_v8  ;;  %v3659_v26 = vadd.f32 -1.0, %v4757_v49 }
 0xd35   :  { %v3048_v52 = vsel %vm2968_vm8, %v5989_v42, %v3657_v50 }
 0xd36   :  { %4324 = vmatmul.mubr.msk.f32.gmra.mrb[90].mxu0 %vm320_vm1, %v3048_v52  ;;  %v3050_v5 = vsel %vm2970_vm10, %v5985_v21, %v3659_v26 }
 0xd37   :  { %v4759_v57 = vpop.eup %4758  ;;  %4326 = vmatprep.mubr.msk.f32.mxu0 %vm320_vm1, %v3049_v3 }
 0xd38   :  { %v4761_v33 = vpop.eup %4760  ;;  %v3662_v38 = vadd.f32 -1.0, %v4759_v57 }
 0xd39   :  { %v3660_v10 = vadd.f32 -1.0, %v4761_v33 }
 0xd3a   :  { %v4763_v53 = vpop.eup %4762  ;;  %4327 = vmatmul.mubr.msk.f32.gmra.mrb[92].mxu0 %vm320_vm1, %v3050_v5  ;;  %v3053_v15 = vsel %vm2973_vm4, %v6000_v13, %v3662_v38 }
 0xd3b   :  { %v4765_v42 = vpop.eup %4764  ;;  %v3051_v27 = vsel %vm2971_vm2, %v6003_v32, %v3660_v10  ;;  %v3661_v19 = vadd.f32 -1.0, %v4763_v53 }
 0xd3c   :  { %4329 = vmatprep.mubr.msk.f32.mxu0 %vm320_vm1, %v3051_v27  ;;  %v3663_v12 = vadd.f32 -1.0, %v4765_v42 }
 0xd3d   :  { %v3052_v24 = vsel %vm2972_vm3, %v2948_v31, %v3661_v19 }
 0xd3e   :  { %4330 = vmatmul.mubr.msk.f32.gmra.mrb[94].mxu0 %vm320_vm1, %v3052_v24  ;;  %v3054_v21 = vsel %vm2974_vm11, %v6008_v44, %v3663_v12 }
 0xd3f   :  { %4332 = vmatprep.mubr.msk.f32.mxu0 %vm320_vm1, %v3053_v15 }
 0xd42   :  { %4333 = vmatmul.mubr.msk.f32.gmra.mrb[96].mxu0 %vm320_vm1, %v3054_v21 }
 0xd43   :  { %4351 = vmatprep.mubr.bf16.mxu0 %v5280_v43 }
 0xdf8   :  { %v4313_v25 = vpop.f32.mrb[66].mxu0 }
 0xdf9   :  { %v3171_v22 = vpop.f32.mrb[67].mxu0 }
 0xdfa   :  { %v3250_v41 = vpack.c.bf16 %v4313_v25, %v3171_v22 }
 0xdfc   :  { %v4316_v59 = vpop.f32.mrb[84].mxu0  ;;  %4335 = vmatprep.subr.bf16.mxu0 %v3250_v41  ;;  %4487 = vmatprep.subr.bf16.mxu1 %v3250_v41 }
 0xdfd   :  { %v3181_v35 = vpop.f32.mrb[85].mxu0  ;;  %4336 = vmatpush3.bf16.msra.mxu0 %v3250_v41  ;;  %4495 = vmatpush3.bf16.msra.mxu1 %v3250_v41 }
 0xdfe   :  { %v3251_v39 = vpack.c.bf16 %v4316_v59, %v3181_v35 }
 0xe00   :  { %4337 = vmatprep.subr.bf16.mxu0 %v3251_v39  ;;  %4488 = vmatprep.subr.bf16.mxu1 %v3251_v39 }
 0xe01   :  { %4338 = vmatpush3.bf16.msra.mxu0 %v3251_v39  ;;  %4496 = vmatpush3.bf16.msra.mxu1 %v3251_v39  ;;  %v4319_v13 = vpop.f32.mrb[86].mxu0 }
 0xe02   :  { %v3191_v46 = vpop.f32.mrb[87].mxu0 }
 0xe03   :  { %v3252_v0 = vpack.c.bf16 %v4319_v13, %v3191_v46 }
 0xe05   :  { %v4322_v32 = vpop.f32.mrb[88].mxu0  ;;  %4339 = vmatprep.subr.bf16.mxu0 %v3252_v0  ;;  %4489 = vmatprep.subr.bf16.mxu1 %v3252_v0 }
 0xe06   :  { %v3201_v43 = vpop.f32.mrb[89].mxu0  ;;  %4340 = vmatpush3.bf16.msra.mxu0 %v3252_v0  ;;  %4497 = vmatpush3.bf16.msra.mxu1 %v3252_v0 }
 0xe07   :  { %v3253_v60 = vpack.c.bf16 %v4322_v32, %v3201_v43 }
 0xe09   :  { %v4325_v28 = vpop.f32.mrb[90].mxu0  ;;  %4341 = vmatprep.subr.bf16.mxu0 %v3253_v60  ;;  %4490 = vmatprep.subr.bf16.mxu1 %v3253_v60 }
 0xe0a   :  { %v3211_v34 = vpop.f32.mrb[91].mxu0  ;;  %4342 = vmatpush3.bf16.msra.mxu0 %v3253_v60  ;;  %4498 = vmatpush3.bf16.msra.mxu1 %v3253_v60 }
 0xe0b   :  { %v3254_v44 = vpack.c.bf16 %v4325_v28, %v3211_v34 }
 0xe0d   :  { %v4328_v61 = vpop.f32.mrb[92].mxu0  ;;  %4343 = vmatprep.subr.bf16.mxu0 %v3254_v44  ;;  %4491 = vmatprep.subr.bf16.mxu1 %v3254_v44 }
 0xe0e   :  { %v3221_v14 = vpop.f32.mrb[93].mxu0  ;;  %4344 = vmatpush3.bf16.msra.mxu0 %v3254_v44  ;;  %4499 = vmatpush3.bf16.msra.mxu1 %v3254_v44 }
 0xe0f   :  { %v3255_v37 = vpack.c.bf16 %v4328_v61, %v3221_v14 }
 0xe11   :  { %v4331_v20 = vpop.f32.mrb[94].mxu0  ;;  %4345 = vmatprep.subr.bf16.mxu0 %v3255_v37  ;;  %4492 = vmatprep.subr.bf16.mxu1 %v3255_v37 }
 0xe12   :  { %v3231_v31 = vpop.f32.mrb[95].mxu0  ;;  %4346 = vmatpush3.bf16.msra.mxu0 %v3255_v37  ;;  %4500 = vmatpush3.bf16.msra.mxu1 %v3255_v37 }
 0xe13   :  { %v3256_v55 = vpack.c.bf16 %v4331_v20, %v3231_v31 }
 0xe15   :  { %v4334_v47 = vpop.f32.mrb[96].mxu0  ;;  %4347 = vmatprep.subr.bf16.mxu0 %v3256_v55  ;;  %4493 = vmatprep.subr.bf16.mxu1 %v3256_v55 }
 0xe16   :  { %v3241_v51 = vpop.f32.mrb[97].mxu0  ;;  %4348 = vmatpush3.bf16.msra.mxu0 %v3256_v55  ;;  %4501 = vmatpush3.bf16.msra.mxu1 %v3256_v55 }
 0xe17   :  { %v3257_v62 = vpack.c.bf16 %v4334_v47, %v3241_v51 }
 0xe19   :  { %4349 = vmatprep.subr.bf16.mxu0 %v3257_v62  ;;  %4494 = vmatprep.subr.bf16.mxu1 %v3257_v62 }
 0xe1a   :  { %4350 = vmatpush3.bf16.msra.mxu0 %v3257_v62  ;;  %4502 = vmatpush3.bf16.msra.mxu1 %v3257_v62 }
 0xe1d   :  { %4352 = vmatmul.mubr.bf16.vlgmr.msra.gmra.mrb[100].mxu0 %v5285_v9  ;;  %4356 = vmatmul.mubr.bf16.vlgmr.msra.gmra.mrb[68].mxu1 %v5296_v4 }
 0xe1e   :  { %4359 = vmatprep.mubr.bf16.mxu1 %v5301_v54 }
 0xe25   :  { %4360 = vmatmul.mubr.bf16.gmra.mrb[72].mxu1 %v5306_v56 }
 0xe26   :  { %4363 = vmatprep.mubr.bf16.mxu1 %v5311_v7 }
 0xe2d   :  { %4364 = vmatmul.mubr.bf16.gmra.mrb[76].mxu1 %v5316_v6 }
 0xef0   :  { %v4353_v48 = vpop.f32.mrb[100].mxu0  ;;  %v4357_v23 = vpop.f32.mrb[68].mxu1 }
 0xef1   :  { %v6061_v40 = vadd.f32 %v4353_v48, %v6058_v45  ;;  %v6064_v9 = vadd.f32 %v4357_v23, %v6058_v45  ;;  %v3299_v4 = vpop.f32.mrb[101].mxu0  ;;  %v3315_v54 = vpop.f32.mrb[69].mxu1 }
 0xef2   :  { %v6067_v56 = vadd.f32 %v6058_v45, %v3299_v4  ;;  %v6070_v7 = vadd.f32 %v6058_v45, %v3315_v54  ;;  %v4354_v6 = vpop.f32.mrb[102].mxu0  ;;  %v4358_v2 = vpop.f32.mrb[70].mxu1 }
 0xef3   :  { %v3380_v18 = vmin.f32 %v6061_v40, 0.0  ;;  %v3384_v29 = vmin.f32 %v6064_v9, 0.0  ;;  %v3302_v30 = vpop.f32.mrb[103].mxu0  ;;  %v3318_v16 = vpop.f32.mrb[71].mxu1  ;;  %v6077_v63 = vadd.f32 %v4354_v6, %v6058_v45  ;;  %v6080_v49 = vadd.f32 %v4358_v2, %v6058_v45 }
 0xef4   :  { %v3378_v1 = vmin.f32 %v6067_v56, 0.0  ;;  %v3382_v36 = vmin.f32 %v6070_v7, 0.0  ;;  %v6083_v17 = vadd.f32 %v6058_v45, %v3302_v30  ;;  %v6086_v52 = vadd.f32 %v6058_v45, %v3318_v16 }
 0xef5   :  { %v3398_v11 = vmul.f32 1.442695, %v3380_v18  ;;  %v3406_v58 = vmul.f32 1.442695, %v3384_v29  ;;  %v3381_v26 = vmin.f32 %v6077_v63, 0.0  ;;  %v3385_v57 = vmin.f32 %v6080_v49, 0.0 }
 0xef6   :  { %v3394_v8 = vmul.f32 1.442695, %v3378_v1  ;;  %v3402_v50 = vmul.f32 1.442695, %v3382_v36  ;;  %v3379_v3 = vmin.f32 %v6083_v17, 0.0  ;;  %v3383_v53 = vmin.f32 %v6086_v52, 0.0 }
 0xef7   :  { %4766 = vpow2.f32 %v3398_v11  ;;  %v3400_v10 = vmul.f32 1.442695, %v3381_v26  ;;  %v3408_v42 = vmul.f32 1.442695, %v3385_v57  ;;  %vm3364_vm1 = vcmp.gt.f32.partialorder %v6061_v40, 0.0 }
 0xef8   :  { %4768 = vpow2.f32 %v3406_v58  ;;  %v4361_v33 = vpop.f32.mrb[72].mxu1  ;;  %v3396_v27 = vmul.f32 1.442695, %v3379_v3  ;;  %v3404_v24 = vmul.f32 1.442695, %v3383_v53  ;;  %vm3368_vm12 = vcmp.gt.f32.partialorder %v6064_v9, 0.0 }
 0xef9   :  { %4770 = vpow2.f32 %v3394_v8  ;;  %v3331_v5 = vpop.f32.mrb[73].mxu1  ;;  %v6093_v19 = vadd.f32 %v4361_v33, %v6058_v45  ;;  %vm3362_vm13 = vcmp.gt.f32.partialorder %v6067_v56, 0.0  ;;  %vm3366_vm14 = vcmp.gt.f32.partialorder %v6070_v7, 0.0 }
 0xefa   :  { %4772 = vpow2.f32 %v3402_v50  ;;  %v4362_v38 = vpop.f32.mrb[74].mxu1  ;;  %v6096_v12 = vadd.f32 %v6058_v45, %v3331_v5  ;;  %vm3365_vm15 = vcmp.gt.f32.partialorder %v6077_v63, 0.0  ;;  %vm3369_vm5 = vcmp.gt.f32.partialorder %v6080_v49, 0.0 }
 0xefb   :  { %4774 = vpow2.f32 %v3400_v10  ;;  %v6099_v15 = vadd.f32 %v4362_v38, %v6058_v45  ;;  %v3334_v21 = vpop.f32.mrb[75].mxu1  ;;  %v3388_v25 = vmin.f32 %v6093_v19, 0.0  ;;  %vm3363_vm6 = vcmp.gt.f32.partialorder %v6083_v17, 0.0 }
 0xefc   :  { %4776 = vpow2.f32 %v3408_v42  ;;  %v6103_v22 = vadd.f32 %v6058_v45, %v3334_v21  ;;  %v3386_v41 = vmin.f32 %v6096_v12, 0.0  ;;  %vm3367_vm7 = vcmp.gt.f32.partialorder %v6086_v52, 0.0 }
 0xefd   :  { %4778 = vpow2.f32 %v3396_v27  ;;  %v3414_v59 = vmul.f32 1.442695, %v3388_v25  ;;  %v3389_v35 = vmin.f32 %v6099_v15, 0.0  ;;  %vm3372_vm8 = vcmp.gt.f32.partialorder %v6093_v19, 0.0 }
 0xefe   :  { %4780 = vpow2.f32 %v3404_v24  ;;  %v3410_v39 = vmul.f32 1.442695, %v3386_v41  ;;  %v3387_v13 = vmin.f32 %v6103_v22, 0.0  ;;  %vm3370_vm9 = vcmp.gt.f32.partialorder %v6096_v12, 0.0 }
 0xeff   :  { %4782 = vpow2.f32 %v3414_v59  ;;  %v3416_v46 = vmul.f32 1.442695, %v3389_v35  ;;  %vm3373_vm10 = vcmp.gt.f32.partialorder %v6099_v15, 0.0  ;;  %vm3371_vm2 = vcmp.gt.f32.partialorder %v6103_v22, 0.0 }
 0xf00   :  { %v4365_v0 = vpop.f32.mrb[76].mxu1  ;;  %4784 = vpow2.f32 %v3410_v39  ;;  %v3412_v43 = vmul.f32 1.442695, %v3387_v13 }
 0xf01   :  { %v4767_v32 = vpop.eup %4766  ;;  %v6111_v60 = vadd.f32 %v4365_v0, %v6058_v45  ;;  %v3347_v28 = vpop.f32.mrb[77].mxu1  ;;  %4786 = vpow2.f32 %v3416_v46 }
 0xf02   :  { %v4769_v34 = vpop.eup %4768  ;;  %v3683_v44 = vadd.f32 -1.0, %v4767_v32  ;;  %v6115_v61 = vadd.f32 %v6058_v45, %v3347_v28  ;;  %v4366_v14 = vpop.f32.mrb[78].mxu1  ;;  %4788 = vpow2.f32 %v3412_v43 }
 0xf03   :  { %v4771_v37 = vpop.eup %4770  ;;  %v3687_v20 = vadd.f32 -1.0, %v4769_v34  ;;  %v3392_v31 = vmin.f32 %v6111_v60, 0.0  ;;  %v3350_v55 = vpop.f32.mrb[79].mxu1  ;;  %v6132_v2 = vadd.f32 %v4366_v14, %v6058_v45  ;;  %vm3376_vm3 = vcmp.gt.f32.partialorder %v6111_v60, 0.0 }
 0xf04   :  { %v4773_v47 = vpop.eup %4772  ;;  %v3444_v51 = vsel %vm3364_vm1, %v6061_v40, %v3683_v44  ;;  %v3681_v62 = vadd.f32 -1.0, %v4771_v37  ;;  %v3390_v48 = vmin.f32 %v6115_v61, 0.0  ;;  %v6142_v16 = vadd.f32 %v6058_v45, %v3350_v55 }
 0xf05   :  { %v4775_v23 = vpop.eup %4774  ;;  %3460 = vst.msk [vmem:[%s6247_s17 + $0x10] sm:$0xff] %vm124_vm0, %v3444_v51  ;;  %v3448_v4 = vsel %vm3368_vm12, %v6064_v9, %v3687_v20  ;;  %v3685_v54 = vadd.f32 -1.0, %v4773_v47  ;;  %v3422_v6 = vmul.f32 1.442695, %v3392_v31  ;;  %v3393_v58 = vmin.f32 %v6132_v2, 0.0 }
 0xf06   :  { %v4777_v40 = vpop.eup %4776  ;;  %3464 = vst.msk [vmem:[%s6247_s17 + $0x30] sm:$0xff] %vm124_vm0, %v3448_v4  ;;  %v3442_v18 = vsel %vm3362_vm13, %v6067_v56, %v3681_v62  ;;  %v3684_v29 = vadd.f32 -1.0, %v4775_v23  ;;  %v3418_v30 = vmul.f32 1.442695, %v3390_v48  ;;  %v3391_v50 = vmin.f32 %v6142_v16, 0.0 }
 0xf07   :  { %v4779_v9 = vpop.eup %4778  ;;  %3458 = vst.msk [vmem:[%s6247_s17] sm:$0xff] %vm124_vm0, %v3442_v18  ;;  %v3446_v1 = vsel %vm3366_vm14, %v6070_v7, %v3685_v54  ;;  %v3688_v36 = vadd.f32 -1.0, %v4777_v40  ;;  %4790 = vpow2.f32 %v3422_v6  ;;  %v3424_v57 = vmul.f32 1.442695, %v3393_v58 }
 0xf08   :  { %v4781_v56 = vpop.eup %4780  ;;  %3462 = vst.msk [vmem:[%s6247_s17 + $0x20] sm:$0xff] %vm124_vm0, %v3446_v1  ;;  %v3445_v45 = vsel %vm3365_vm15, %v6077_v63, %v3684_v29  ;;  %v3682_v11 = vadd.f32 -1.0, %v4779_v9  ;;  %4792 = vpow2.f32 %v3418_v30  ;;  %v3420_v10 = vmul.f32 1.442695, %v3391_v50 }
 0xf09   :  { %3461 = vst.msk [vmem:[%s6247_s17 + $0x18] sm:$0xff] %vm124_vm0, %v3445_v45  ;;  %v3449_v7 = vsel %vm3369_vm5, %v6080_v49, %v3688_v36  ;;  %v3686_v8 = vadd.f32 -1.0, %v4781_v56  ;;  %v4783_v26 = vpop.eup %4782  ;;  %4794 = vpow2.f32 %v3424_v57  ;;  %vm3374_vm4 = vcmp.gt.f32.partialorder %v6115_v61, 0.0 }
 0xf0a   :  { %3465 = vst.msk [vmem:[%s6247_s17 + $0x38] sm:$0xff] %vm124_vm0, %v3449_v7  ;;  %v3443_v63 = vsel %vm3363_vm6, %v6083_v17, %v3682_v11  ;;  %v4785_v3 = vpop.eup %4784  ;;  %v3691_v33 = vadd.f32 -1.0, %v4783_v26  ;;  %4796 = vpow2.f32 %v3420_v10  ;;  %vm3377_vm11 = vcmp.gt.f32.partialorder %v6132_v2, 0.0 }
 0xf0b   :  { %3459 = vst.msk [vmem:[%s6247_s17 + $0x8] sm:$0xff] %vm124_vm0, %v3443_v63  ;;  %v3447_v49 = vsel %vm3367_vm7, %v6086_v52, %v3686_v8  ;;  %v4787_v53 = vpop.eup %4786  ;;  %v3689_v17 = vadd.f32 -1.0, %v4785_v3  ;;  %vm3375_vm1 = vcmp.gt.f32.partialorder %v6142_v16, 0.0 }
 0xf0c   :  { %3463 = vst.msk [vmem:[%s6247_s17 + $0x28] sm:$0xff] %vm124_vm0, %v3447_v49  ;;  %v4789_v5 = vpop.eup %4788  ;;  %v3452_v42 = vsel %vm3372_vm8, %v6093_v19, %v3691_v33  ;;  %v3692_v27 = vadd.f32 -1.0, %v4787_v53 }
 0xf0d   :  { %3468 = vst.msk [vmem:[%s6247_s17 + $0x50] sm:$0xff] %vm124_vm0, %v3452_v42  ;;  %v3450_v52 = vsel %vm3370_vm9, %v6096_v12, %v3689_v17  ;;  %v3690_v38 = vadd.f32 -1.0, %v4789_v5 }
 0xf0e   :  { %3466 = vst.msk [vmem:[%s6247_s17 + $0x40] sm:$0xff] %vm124_vm0, %v3450_v52  ;;  %v3453_v19 = vsel %vm3373_vm10, %v6099_v15, %v3692_v27 }
 0xf0f   :  { %3469 = vst.msk [vmem:[%s6247_s17 + $0x58] sm:$0xff] %vm124_vm0, %v3453_v19  ;;  %v3451_v24 = vsel %vm3371_vm2, %v6103_v22, %v3690_v38 }
 0xf10   :  { %3467 = vst.msk [vmem:[%s6247_s17 + $0x48] sm:$0xff] %vm124_vm0, %v3451_v24 }
 0xf11   :  { %v4791_v12 = vpop.eup %4790 }
 0xf12   :  { %v4793_v21 = vpop.eup %4792  ;;  %v3695_v25 = vadd.f32 -1.0, %v4791_v12 }
 0xf13   :  { %v3693_v15 = vadd.f32 -1.0, %v4793_v21  ;;  %v4795_v59 = vpop.eup %4794 }
 0xf14   :  { %v3456_v41 = vsel %vm3376_vm3, %v6111_v60, %v3695_v25  ;;  %v4797_v35 = vpop.eup %4796  ;;  %v3696_v39 = vadd.f32 -1.0, %v4795_v59 }
 0xf15   :  { %3472 = vst.msk [vmem:[%s6247_s17 + $0x70] sm:$0xff] %vm124_vm0, %v3456_v41  ;;  %v3454_v22 = vsel %vm3374_vm4, %v6115_v61, %v3693_v15  ;;  %v3694_v13 = vadd.f32 -1.0, %v4797_v35 }
 0xf16   :  { %3470 = vst.msk [vmem:[%s6247_s17 + $0x60] sm:$0xff] %vm124_vm0, %v3454_v22  ;;  %v3457_v46 = vsel %vm3377_vm11, %v6132_v2, %v3696_v39 }
 0xf17   :  { %3473 = vst.msk [vmem:[%s6247_s17 + $0x78] sm:$0xff] %vm124_vm0, %v3457_v46  ;;  %v3455_v0 = vsel %vm3375_vm1, %v6142_v16, %v3694_v13 }
 0xf18   :  { %3471 = vst.msk [vmem:[%s6247_s17 + $0x68] sm:$0xff] %vm124_vm0, %v3455_v0 }

</bundles_post_ra>
